<compile_context>
chip_gen: v7x
topology: tpu7x:2x2x1
jax: 0.10.0
libtpu: 0.0.40
codegen_flags: <defaults>
</compile_context>

<pallas_src>
import functools
import math

import jax
import jax.numpy as jnp
from jax.experimental import pallas as pl
from jax.experimental.pallas import tpu as pltpu

EXPANSION = 4
BN_EPS = 1e-5
_VMEM_LIMIT = 32 * 1024 * 1024


def _round_up(x, m):
    return (x + m - 1) // m * m


def _pick_tile(rows, cap):
    """Largest multiple-of-8 divisor of `rows` that is <= cap."""
    start = min(cap, rows)
    start -= start % 8
    for c in range(start, 7, -8):
        if rows % c == 0:
            return c
    return 8


def _pad_rows(a, rows):
    pad = rows - a.shape[0]
    return a if pad == 0 else jnp.pad(a, ((0, pad), (0, 0)))


# --------------------------------------------------------------------------
# GEMM kernel: optional fused (BN affine + ReLU) prologue on A, bf16 output,
# per-M-tile partial column sum / sum-of-squares for training-mode BatchNorm.
# --------------------------------------------------------------------------
def _gemm_stats_kernel(has_prologue, need_mask, m_valid, tm, *refs):
    if has_prologue:
        a_ref, b_ref, ps_ref, pt_ref, y_ref, sum_ref, ssq_ref = refs
    else:
        a_ref, b_ref, y_ref, sum_ref, ssq_ref = refs

    a = a_ref[...]
    if has_prologue:
        # BN affine + ReLU of the previous conv, applied on the fly (f32 math,
        # cast back to bf16 for the MXU).
        a = jnp.maximum(a.astype(jnp.float32) * ps_ref[...] + pt_ref[...], 0.0)
        a = a.astype(jnp.bfloat16)
    if need_mask:
        # Zero out padded rows so they contribute neither to y nor to the
        # batch statistics (only traced when row padding actually happened).
        row = (jax.lax.broadcasted_iota(jnp.int32, (tm, 1), 0)
               + pl.program_id(0) * tm)
        a = jnp.where(row < m_valid, a, jnp.zeros_like(a))

    y = jnp.dot(a, b_ref[...], preferred_element_type=jnp.float32)
    y_ref[...] = y.astype(y_ref.dtype)

    # Column stats in f32, accumulated over 64-row strips so the squared
    # temporaries never hold the whole (tm, Np) tile live in vregs.
    rows, cols = y.shape
    acc_s = jnp.zeros((1, cols), jnp.float32)
    acc_q = jnp.zeros((1, cols), jnp.float32)
    for r0 in range(0, rows, 64):
        ys = y[r0:min(r0 + 64, rows)]
        acc_s = acc_s + jnp.sum(ys, axis=0, keepdims=True)
        acc_q = acc_q + jnp.sum(ys * ys, axis=0, keepdims=True)
    sum_ref[...] = acc_s.reshape(sum_ref.shape)
    ssq_ref[...] = acc_q.reshape(ssq_ref.shape)


def gemm_with_stats(a_bf16, b_bf16, *, prologue_scale=None, prologue_shift=None,
                    valid_rows=None):
    """y = relu(a*ps+pt) @ b (prologue optional), bf16 out, plus column stats.

    a_bf16: (M, K) bf16 activations.  b_bf16: (K, Np) bf16 weight, Np % 128 == 0.
    Returns (y (Mp, Np) bf16, col_sum (Np,) f32, col_sumsq (Np,) f32).
    """
    M, K = a_bf16.shape
    Kb, Np = b_bf16.shape
    assert Kb == K and Np % 128 == 0
    n_valid = int(valid_rows) if valid_rows is not None else M

    Mp = _round_up(M, 8)
    a_p = _pad_rows(a_bf16, Mp)                  # no-op in the common case
    tm = _pick_tile(Mp, 512)
    n_tiles = Mp // tm

    has_prologue = prologue_scale is not None
    need_mask = (Mp != n_valid)

    inputs = [a_p, b_bf16]
    in_specs = [pl.BlockSpec((tm, K), lambda i: (i, 0)),
                pl.BlockSpec((K, Np), lambda i: (0, 0))]      # weight resident
    if has_prologue:
        inputs += [prologue_scale.reshape(1, K).astype(jnp.float32),
                   prologue_shift.reshape(1, K).astype(jnp.float32)]
        in_specs += [pl.BlockSpec((1, K), lambda i: (0, 0)),
                     pl.BlockSpec((1, K), lambda i: (0, 0))]

    flops = 2 * Mp * Np * K + (3 * Mp * K if has_prologue else 0)
    bytes_accessed = Mp * K * 2 + K * Np * 2 + Mp * Np * 2 + 2 * n_tiles * Np * 4

    kernel = functools.partial(_gemm_stats_kernel, has_prologue, need_mask,
                               n_valid, tm)

    y, ps, pq = pl.pallas_call(
        kernel,
        out_shape=(jax.ShapeDtypeStruct((Mp, Np), jnp.bfloat16),
                   jax.ShapeDtypeStruct((n_tiles, 1, Np), jnp.float32),
                   jax.ShapeDtypeStruct((n_tiles, 1, Np), jnp.float32)),
        grid_spec=pltpu.PrefetchScalarGridSpec(
            num_scalar_prefetch=0,
            grid=(n_tiles,),
            in_specs=in_specs,
            out_specs=[pl.BlockSpec((tm, Np), lambda i: (i, 0)),
                       pl.BlockSpec((1, 1, Np), lambda i: (i, 0, 0)),
                       pl.BlockSpec((1, 1, Np), lambda i: (i, 0, 0))],
        ),
        compiler_params=pltpu.CompilerParams(
            dimension_semantics=("parallel",),
            vmem_limit_bytes=_VMEM_LIMIT),
        cost_estimate=pl.CostEstimate(flops=flops, transcendentals=0,
                                      bytes_accessed=bytes_accessed),
    )(*inputs)

    col_sum = jnp.sum(ps[:, 0, :], axis=0)
    col_ssq = jnp.sum(pq[:, 0, :], axis=0)
    return y, col_sum, col_ssq


# --------------------------------------------------------------------------
# Per-channel affine (+ optional second affined residual) (+ optional ReLU).
# Lane-dense (C is always a multiple of 128 in this pipeline), bf16 output.
# --------------------------------------------------------------------------
def _affine_kernel(relu, has_res, *refs):
    if has_res:
        x_ref, r_ref, s_ref, t_ref, rs_ref, rt_ref, o_ref = refs
    else:
        x_ref, s_ref, t_ref, o_ref = refs
    y = x_ref[...].astype(jnp.float32) * s_ref[...] + t_ref[...]
    if has_res:
        y = y + (r_ref[...].astype(jnp.float32) * rs_ref[...] + rt_ref[...])
    if relu:
        y = jnp.maximum(y, 0.0)
    o_ref[...] = y.astype(o_ref.dtype)


def affine_apply(x2d, scale, shift, *, relu, residual=None,
                 res_scale=None, res_shift=None):
    M, C = x2d.shape
    assert M % 8 == 0 and C % 128 == 0
    cap = max(8, min(1024, (262144 // C) // 8 * 8))   # keep blocks VMEM-friendly
    tm = _pick_tile(M, cap)
    has_res = residual is not None

    row_spec = pl.BlockSpec((tm, C), lambda i: (i, 0))
    vec_spec = pl.BlockSpec((1, C), lambda i: (0, 0))

    inputs = [x2d]
    in_specs = [row_spec]
    if has_res:
        inputs.append(residual)
        in_specs.append(row_spec)
    inputs += [scale.reshape(1, C).astype(jnp.float32),
               shift.reshape(1, C).astype(jnp.float32)]
    in_specs += [vec_spec, vec_spec]
    if has_res:
        rs = (jnp.ones((1, C), jnp.float32) if res_scale is None
              else res_scale.reshape(1, C).astype(jnp.float32))
        rt = (jnp.zeros((1, C), jnp.float32) if res_shift is None
              else res_shift.reshape(1, C).astype(jnp.float32))
        inputs += [rs, rt]
        in_specs += [vec_spec, vec_spec]

    return pl.pallas_call(
        functools.partial(_affine_kernel, relu, has_res),
        out_shape=jax.ShapeDtypeStruct((M, C), jnp.bfloat16),
        grid_spec=pltpu.PrefetchScalarGridSpec(
            num_scalar_prefetch=0,
            grid=(M // tm,),
            in_specs=in_specs,
            out_specs=pl.BlockSpec((tm, C), lambda i: (i, 0)),
        ),
        compiler_params=pltpu.CompilerParams(
            dimension_semantics=("parallel",),
            vmem_limit_bytes=_VMEM_LIMIT),
    )(*inputs)


# --------------------------------------------------------------------------
# Training-mode BatchNorm2d scale/shift from fused column statistics.
# Channel-padded gammas are zero, so padded columns stay exactly zero.
# --------------------------------------------------------------------------
def _bn_scale_shift(col_sum, col_ssq, n_rows, gamma_pad, beta_pad):
    mean = col_sum / n_rows
    var = jnp.maximum(col_ssq / n_rows - mean * mean, 0.0)
    scale = gamma_pad * jax.lax.rsqrt(var + BN_EPS)
    shift = beta_pad - mean * scale
    return scale, shift


# --------------------------------------------------------------------------
# Bottleneck forward.  NHWC/bf16 entry point for stacking; NCHW/f32 wrapper
# matching the PyTorch module interface.
# --------------------------------------------------------------------------
def bottleneck_forward_nhwc(params, x_nhwc, *, inplanes, planes, stride):
    x = x_nhwc.astype(jnp.bfloat16)
    N, H, W, Cin = x.shape
    out_ch = planes * EXPANSION
    Np1 = _round_up(planes, 128)
    Np3 = _round_up(out_ch, 128)
    M1 = N * H * W

    # conv1 (1x1) + batch stats
    y1, s1, q1 = gemm_with_stats(x.reshape(M1, Cin), params['conv1_w'])
    sc1, sh1 = _bn_scale_shift(s1, q1, M1, params['bn1_g'], params['bn1_b'])

    # bn1 + relu (standalone: conv2's spatial zero-padding must see true zeros)
    out1 = affine_apply(y1, sc1, sh1, relu=True)
    if out1.shape[0] != M1 or out1.shape[1] != planes:
        out1 = out1[:M1, :planes]

    # im2col for conv2 (3x3, stride, pad=1) in bf16
    Ho = (H + 2 - 3) // stride + 1
    Wo = (W + 2 - 3) // stride + 1
    xp = jnp.pad(out1.reshape(N, H, W, planes), ((0, 0), (1, 1), (1, 1), (0, 0)))
    patches = [xp[:, kh:kh + stride * (Ho - 1) + 1:stride,
                  kw:kw + stride * (Wo - 1) + 1:stride, :]
               for kh in range(3) for kw in range(3)]
    M2 = N * Ho * Wo
    a2 = jnp.concatenate(patches, axis=-1).reshape(M2, 9 * planes)

    # conv2 GEMM + stats (bn2 is NOT applied here; it is fused into conv3)
    y2, s2, q2 = gemm_with_stats(a2, params['conv2_w'])
    sc2, sh2 = _bn_scale_shift(s2, q2, M2, params['bn2_g'], params['bn2_b'])

    # conv3 (1x1) with bn2+relu fused into its prologue
    y3, s3, q3 = gemm_with_stats(y2, params['conv3_w'],
                                 prologue_scale=sc2, prologue_shift=sh2,
                                 valid_rows=M2)
    sc3, sh3 = _bn_scale_shift(s3, q3, M2, params['bn3_g'], params['bn3_b'])

    # residual branch
    if 'ds_w' in params:
        xs = x if stride == 1 else x[:, ::stride, ::stride, :]
        a_d = xs.reshape(-1, Cin)
        yd, sd, qd = gemm_with_stats(a_d, params['ds_w'])
        scd, shd = _bn_scale_shift(sd, qd, a_d.shape[0],
                                   params['ds_g'], params['ds_b'])
        res = _pad_rows(yd, y3.shape[0])
        res_scale, res_shift = scd, shd
    else:
        res = x.reshape(M1, Cin)
        if Np3 != Cin:
            res = jnp.pad(res, ((0, 0), (0, Np3 - Cin)))
        res = _pad_rows(res, y3.shape[0])
        res_scale, res_shift = None, None

    # bn3 + (affined) residual + relu, fused into one epilogue kernel
    out = affine_apply(y3, sc3, sh3, relu=True, residual=res,
                       res_scale=res_scale, res_shift=res_shift)
    out = out[:M2, :out_ch]
    return out.reshape(N, Ho, Wo, out_ch)


def bottleneck_forward(params, x_nchw, *, inplanes, planes, stride):
    x = jnp.transpose(x_nchw, (0, 2, 3, 1))            # NCHW -> NHWC (entry only)
    out = bottleneck_forward_nhwc(params, x, inplanes=inplanes,
                                  planes=planes, stride=stride)
    return jnp.transpose(out, (0, 3, 1, 2)).astype(jnp.float32)


# --------------------------------------------------------------------------
# Deterministic parameter init.  Conv weights are stored GEMM-ready:
# (Cout, Cin, KH, KW) -> (KH*KW*Cin [K-padded], Cout [padded to 128-multiple]),
# bf16, hoisted out of the forward.  BN gammas/betas are channel-padded (zeros
# in dead channels so padded columns stay exactly zero through the block).
# --------------------------------------------------------------------------
def _conv_weight_matrix(key, cout, cin, kh, kw, k_pad, n_pad):
    std = math.sqrt(2.0 / (kh * kw * cout))
    w = jax.random.normal(key, (cout, cin, kh, kw), jnp.float32) * std
    m = jnp.transpose(w, (2, 3, 1, 0)).reshape(kh * kw * cin, cout)
    m = jnp.pad(m, ((0, k_pad - m.shape[0]), (0, n_pad - m.shape[1])))
    return m.astype(jnp.bfloat16)


def _bn_param(c, c_pad):
    gamma = jnp.pad(jnp.ones((c,), jnp.float32), (0, c_pad - c))
    beta = jnp.zeros((c_pad,), jnp.float32)
    return gamma, beta


def init_bottleneck_params(key, inplanes, planes, stride):
    keys = jax.random.split(key, 4)
    out_ch = planes * EXPANSION
    Np1 = _round_up(planes, 128)
    Np3 = _round_up(out_ch, 128)
    p = {}
    p['conv1_w'] = _conv_weight_matrix(keys[0], planes, inplanes, 1, 1,
                                       inplanes, Np1)
    p['bn1_g'], p['bn1_b'] = _bn_param(planes, Np1)
    p['conv2_w'] = _conv_weight_matrix(keys[1], planes, planes, 3, 3,
                                       9 * planes, Np1)
    p['bn2_g'], p['bn2_b'] = _bn_param(planes, Np1)
    # conv3's A is the (channel-padded) conv2 output -> pad K to Np1.
    p['conv3_w'] = _conv_weight_matrix(keys[2], out_ch, planes, 1, 1, Np1, Np3)
    p['bn3_g'], p['bn3_b'] = _bn_param(out_ch, Np3)
    if stride != 1 or inplanes != out_ch:
        p['ds_w'] = _conv_weight_matrix(keys[3], out_ch, inplanes, 1, 1,
                                        inplanes, Np3)
        p['ds_g'], p['ds_b'] = _bn_param(out_ch, Np3)
    return p


# --------------------------------------------------------------------------
# Pure-JAX f32 reference (same math, same stored weights) for a sanity check.
# --------------------------------------------------------------------------
def reference_forward(params, x_nchw, *, inplanes, planes, stride):
    out_ch = planes * EXPANSION
    x = jnp.transpose(x_nchw, (0, 2, 3, 1)).astype(jnp.float32)
    N, H, W, _ = x.shape

    def bn(y, g, b):
        mean = y.mean(0)
        var = jnp.maximum((y * y).mean(0) - mean * mean, 0.0)
        return (y - mean) * (g * jax.lax.rsqrt(var + BN_EPS)) + b

    w1 = params['conv1_w'].astype(jnp.float32)[:, :planes]
    o1 = jax.nn.relu(bn(x.reshape(-1, inplanes) @ w1,
                        params['bn1_g'][:planes], params['bn1_b'][:planes]))
    o1 = o1.reshape(N, H, W, planes)
    Ho = (H + 2 - 3) // stride + 1
    Wo = (W + 2 - 3) // stride + 1
    xp = jnp.pad(o1, ((0, 0), (1, 1), (1, 1), (0, 0)))
    pats = [xp[:, kh:kh + stride * (Ho - 1) + 1:stride,
               kw:kw + stride * (Wo - 1) + 1:stride, :]
            for kh in range(3) for kw in range(3)]
    a2 = jnp.concatenate(pats, -1).reshape(-1, 9 * planes)
    w2 = params['conv2_w'].astype(jnp.float32)[:, :planes]
    o2 = jax.nn.relu(bn(a2 @ w2, params['bn2_g'][:planes],
                        params['bn2_b'][:planes]))
    w3 = params['conv3_w'].astype(jnp.float32)[:planes, :out_ch]
    o3 = bn(o2 @ w3, params['bn3_g'][:out_ch], params['bn3_b'][:out_ch])
    if 'ds_w' in params:
        xs = x[:, ::stride, ::stride, :].reshape(-1, inplanes)
        wd = params['ds_w'].astype(jnp.float32)[:, :out_ch]
        res = bn(xs @ wd, params['ds_g'][:out_ch], params['ds_b'][:out_ch])
    else:
        res = x.reshape(-1, inplanes)
    out = jax.nn.relu(o3 + res)
    return jnp.transpose(out.reshape(N, Ho, Wo, out_ch), (0, 3, 1, 2))


# --------------------------------------------------------------------------
if __name__ == "__main__":
    key = jax.random.PRNGKey(0)
    pkey, xkey = jax.random.split(key)

    INPLANES, PLANES, STRIDE = 64, 32, 2        # downsample branch is active
    params = init_bottleneck_params(pkey, INPLANES, PLANES, STRIDE)

    # NCHW input, like the PyTorch module.
    x = jax.random.normal(xkey, (2, INPLANES, 16, 16), jnp.float32)

    fwd = jax.jit(functools.partial(bottleneck_forward, inplanes=INPLANES,
                                    planes=PLANES, stride=STRIDE))
    out = jax.block_until_ready(fwd(params, x))

    assert out.shape == (2, PLANES * EXPANSION, 8, 8), out.shape
    assert bool(jnp.all(jnp.isfinite(out)))

    ref = reference_forward(params, x, inplanes=INPLANES, planes=PLANES,
                            stride=STRIDE)
    max_diff = float(jnp.max(jnp.abs(out - ref)))
    assert max_diff < 0.25, f"max abs diff vs f32 reference: {max_diff}"

    print("KERNEL_OK")
</pallas_src>

<mosaic_0001>
module attributes {stable_mosaic.version = 11 : i64} {
  func.func @_affine_kernel(%arg0: i32, %arg1: memref<512x128xbf16, #tpu.memory_space<vmem>>, %arg2: memref<1x128xf32, #tpu.memory_space<vmem>>, %arg3: memref<1x128xf32, #tpu.memory_space<vmem>>, %arg4: memref<512x128xbf16, #tpu.memory_space<vmem>>) attributes {dimension_semantics = [#tpu.dimension_semantics<parallel>], iteration_bounds = array<i64: 1>, scalar_prefetch = 0 : i64, scratch_operands = 0 : i64, tpu.core_type = #tpu.core_type<tc>, window_params = [{transform_indices = @transform_0, window_bounds = array<i64: 512, 128>}, {pipeline_mode = #tpu.pipeline_mode<synchronous>, transform_indices = @transform_1, window_bounds = array<i64: 1, 128>}, {pipeline_mode = #tpu.pipeline_mode<synchronous>, transform_indices = @transform_2, window_bounds = array<i64: 1, 128>}, {transform_indices = @transform_3, window_bounds = array<i64: 512, 128>}]} {
    %c0 = arith.constant 0 : index
    %c0_0 = arith.constant 0 : index
    %0 = vector.load %arg1[%c0, %c0_0] : memref<512x128xbf16, #tpu.memory_space<vmem>>, vector<512x128xbf16>
    %1 = arith.extf %0 : vector<512x128xbf16> to vector<512x128xf32>
    %c0_1 = arith.constant 0 : index
    %c0_2 = arith.constant 0 : index
    %2 = vector.load %arg2[%c0_1, %c0_2] : memref<1x128xf32, #tpu.memory_space<vmem>>, vector<1x128xf32>
    %3 = vector.broadcast %2 : vector<1x128xf32> to vector<512x128xf32>
    %4 = arith.mulf %1, %3 : vector<512x128xf32>
    %c0_3 = arith.constant 0 : index
    %c0_4 = arith.constant 0 : index
    %5 = vector.load %arg3[%c0_3, %c0_4] : memref<1x128xf32, #tpu.memory_space<vmem>>, vector<1x128xf32>
    %6 = vector.broadcast %5 : vector<1x128xf32> to vector<512x128xf32>
    %7 = arith.addf %4, %6 : vector<512x128xf32>
    %cst = arith.constant 0.000000e+00 : f32
    %8 = vector.broadcast %cst : f32 to vector<512x128xf32>
    %9 = arith.maximumf %7, %8 : vector<512x128xf32>
    %10 = arith.truncf %9 : vector<512x128xf32> to vector<512x128xbf16>
    %c0_5 = arith.constant 0 : index
    %c0_6 = arith.constant 0 : index
    %11 = vector.load %arg4[%c0_5, %c0_6] : memref<512x128xbf16, #tpu.memory_space<vmem>>, vector<512x128xbf16>
    tpu.vector_store %arg4[%c0_5, %c0_6], %10 {strides = array<i32>} : memref<512x128xbf16, #tpu.memory_space<vmem>>, vector<512x128xbf16>,
    return
  }
  func.func @transform_0(%arg0: i32) -> (i32, i32) {
    %c0_i32 = arith.constant 0 : i32
    %c0_i32_0 = arith.constant 0 : i32
    return %arg0, %c0_i32 : i32, i32
  }
  func.func @transform_1(%arg0: i32) -> (i32, i32) {
    %c0_i32 = arith.constant 0 : i32
    %c0_i32_0 = arith.constant 0 : i32
    %c0_i32_1 = arith.constant 0 : i32
    return %c0_i32, %c0_i32_0 : i32, i32
  }
  func.func @transform_2(%arg0: i32) -> (i32, i32) {
    %c0_i32 = arith.constant 0 : i32
    %c0_i32_0 = arith.constant 0 : i32
    %c0_i32_1 = arith.constant 0 : i32
    return %c0_i32, %c0_i32_0 : i32, i32
  }
  func.func @transform_3(%arg0: i32) -> (i32, i32) {
    %c0_i32 = arith.constant 0 : i32
    %c0_i32_0 = arith.constant 0 : i32
    return %arg0, %c0_i32 : i32, i32
  }
}

module attributes {stable_mosaic.version = 11 : i64} {
  func.func @_gemm_stats_kernel(%arg0: i32, %arg1: memref<512x64xbf16, #tpu.memory_space<vmem>>, %arg2: memref<64x128xbf16, #tpu.memory_space<vmem>>, %arg3: memref<512x128xbf16, #tpu.memory_space<vmem>>, %arg4: memref<1x1x128xf32, #tpu.memory_space<vmem>>, %arg5: memref<1x1x128xf32, #tpu.memory_space<vmem>>) attributes {dimension_semantics = [#tpu.dimension_semantics<parallel>], iteration_bounds = array<i64: 1>, scalar_prefetch = 0 : i64, scratch_operands = 0 : i64, tpu.core_type = #tpu.core_type<tc>, window_params = [{transform_indices = @transform_0, window_bounds = array<i64: 512, 64>}, {pipeline_mode = #tpu.pipeline_mode<synchronous>, transform_indices = @transform_1, window_bounds = array<i64: 64, 128>}, {transform_indices = @transform_2, window_bounds = array<i64: 512, 128>}, {transform_indices = @transform_3, window_bounds = array<i64: 1, 1, 128>}, {transform_indices = @transform_4, window_bounds = array<i64: 1, 1, 128>}]} {
    %c0 = arith.constant 0 : index
    %c0_0 = arith.constant 0 : index
    %0 = vector.load %arg1[%c0, %c0_0] : memref<512x64xbf16, #tpu.memory_space<vmem>>, vector<512x64xbf16>
    %c0_1 = arith.constant 0 : index
    %c0_2 = arith.constant 0 : index
    %1 = vector.load %arg2[%c0_1, %c0_2] : memref<64x128xbf16, #tpu.memory_space<vmem>>, vector<64x128xbf16>
    %cst = arith.constant dense<0.000000e+00> : vector<512x128xf32>
    %2 = tpu.matmul %0, %1, %cst {dimension_numbers = #tpu.dot_dimension_numbers<[1], [0], [0], [1], [0, 0, 1, 1], [], []>} : vector<512x64xbf16>, vector<64x128xbf16>, vector<512x128xf32> -> vector<512x128xf32>
    %3 = arith.truncf %2 : vector<512x128xf32> to vector<512x128xbf16>
    %c0_3 = arith.constant 0 : index
    %c0_4 = arith.constant 0 : index
    %4 = vector.load %arg3[%c0_3, %c0_4] : memref<512x128xbf16, #tpu.memory_space<vmem>>, vector<512x128xbf16>
    tpu.vector_store %arg3[%c0_3, %c0_4], %3 {strides = array<i32>} : memref<512x128xbf16, #tpu.memory_space<vmem>>, vector<512x128xbf16>,
    %cst_5 = arith.constant 0.000000e+00 : f32
    %5 = vector.broadcast %cst_5 : f32 to vector<1x128xf32>
    %cst_6 = arith.constant 0.000000e+00 : f32
    %6 = vector.broadcast %cst_6 : f32 to vector<1x128xf32>
    %7 = vector.extract_strided_slice %2 {offsets = [0, 0], sizes = [64, 128], strides = [1, 1]} : vector<512x128xf32> to vector<64x128xf32>
    %cst_7 = arith.constant dense<0.000000e+00> : vector<128xf32>
    %8 = vector.multi_reduction <add>, %7, %cst_7 [0] : vector<64x128xf32> to vector<128xf32>
    %9 = vector.shape_cast %8 : vector<128xf32> to vector<1x128xf32>
    %10 = arith.addf %5, %9 : vector<1x128xf32>
    %11 = arith.mulf %7, %7 : vector<64x128xf32>
    %cst_8 = arith.constant dense<0.000000e+00> : vector<128xf32>
    %12 = vector.multi_reduction <add>, %11, %cst_8 [0] : vector<64x128xf32> to vector<128xf32>
    %13 = vector.shape_cast %12 : vector<128xf32> to vector<1x128xf32>
    %14 = arith.addf %6, %13 : vector<1x128xf32>
    %15 = vector.extract_strided_slice %2 {offsets = [64, 0], sizes = [64, 128], strides = [1, 1]} : vector<512x128xf32> to vector<64x128xf32>
    %cst_9 = arith.constant dense<0.000000e+00> : vector<128xf32>
    %16 = vector.multi_reduction <add>, %15, %cst_9 [0] : vector<64x128xf32> to vector<128xf32>
    %17 = vector.shape_cast %16 : vector<128xf32> to vector<1x128xf32>
    %18 = arith.addf %10, %17 : vector<1x128xf32>
    %19 = arith.mulf %15, %15 : vector<64x128xf32>
    %cst_10 = arith.constant dense<0.000000e+00> : vector<128xf32>
    %20 = vector.multi_reduction <add>, %19, %cst_10 [0] : vector<64x128xf32> to vector<128xf32>
    %21 = vector.shape_cast %20 : vector<128xf32> to vector<1x128xf32>
    %22 = arith.addf %14, %21 : vector<1x128xf32>
    %23 = vector.extract_strided_slice %2 {offsets = [128, 0], sizes = [64, 128], strides = [1, 1]} : vector<512x128xf32> to vector<64x128xf32>
    %cst_11 = arith.constant dense<0.000000e+00> : vector<128xf32>
    %24 = vector.multi_reduction <add>, %23, %cst_11 [0] : vector<64x128xf32> to vector<128xf32>
    %25 = vector.shape_cast %24 : vector<128xf32> to vector<1x128xf32>
    %26 = arith.addf %18, %25 : vector<1x128xf32>
    %27 = arith.mulf %23, %23 : vector<64x128xf32>
    %cst_12 = arith.constant dense<0.000000e+00> : vector<128xf32>
    %28 = vector.multi_reduction <add>, %27, %cst_12 [0] : vector<64x128xf32> to vector<128xf32>
    %29 = vector.shape_cast %28 : vector<128xf32> to vector<1x128xf32>
    %30 = arith.addf %22, %29 : vector<1x128xf32>
    %31 = vector.extract_strided_slice %2 {offsets = [192, 0], sizes = [64, 128], strides = [1, 1]} : vector<512x128xf32> to vector<64x128xf32>
    %cst_13 = arith.constant dense<0.000000e+00> : vector<128xf32>
    %32 = vector.multi_reduction <add>, %31, %cst_13 [0] : vector<64x128xf32> to vector<128xf32>
    %33 = vector.shape_cast %32 : vector<128xf32> to vector<1x128xf32>
    %34 = arith.addf %26, %33 : vector<1x128xf32>
    %35 = arith.mulf %31, %31 : vector<64x128xf32>
    %cst_14 = arith.constant dense<0.000000e+00> : vector<128xf32>
    %36 = vector.multi_reduction <add>, %35, %cst_14 [0] : vector<64x128xf32> to vector<128xf32>
    %37 = vector.shape_cast %36 : vector<128xf32> to vector<1x128xf32>
    %38 = arith.addf %30, %37 : vector<1x128xf32>
    %39 = vector.extract_strided_slice %2 {offsets = [256, 0], sizes = [64, 128], strides = [1, 1]} : vector<512x128xf32> to vector<64x128xf32>
    %cst_15 = arith.constant dense<0.000000e+00> : vector<128xf32>
    %40 = vector.multi_reduction <add>, %39, %cst_15 [0] : vector<64x128xf32> to vector<128xf32>
    %41 = vector.shape_cast %40 : vector<128xf32> to vector<1x128xf32>
    %42 = arith.addf %34, %41 : vector<1x128xf32>
    %43 = arith.mulf %39, %39 : vector<64x128xf32>
    %cst_16 = arith.constant dense<0.000000e+00> : vector<128xf32>
    %44 = vector.multi_reduction <add>, %43, %cst_16 [0] : vector<64x128xf32> to vector<128xf32>
    %45 = vector.shape_cast %44 : vector<128xf32> to vector<1x128xf32>
    %46 = arith.addf %38, %45 : vector<1x128xf32>
    %47 = vector.extract_strided_slice %2 {offsets = [320, 0], sizes = [64, 128], strides = [1, 1]} : vector<512x128xf32> to vector<64x128xf32>
    %cst_17 = arith.constant dense<0.000000e+00> : vector<128xf32>
    %48 = vector.multi_reduction <add>, %47, %cst_17 [0] : vector<64x128xf32> to vector<128xf32>
    %49 = vector.shape_cast %48 : vector<128xf32> to vector<1x128xf32>
    %50 = arith.addf %42, %49 : vector<1x128xf32>
    %51 = arith.mulf %47, %47 : vector<64x128xf32>
    %cst_18 = arith.constant dense<0.000000e+00> : vector<128xf32>
    %52 = vector.multi_reduction <add>, %51, %cst_18 [0] : vector<64x128xf32> to vector<128xf32>
    %53 = vector.shape_cast %52 : vector<128xf32> to vector<1x128xf32>
    %54 = arith.addf %46, %53 : vector<1x128xf32>
    %55 = vector.extract_strided_slice %2 {offsets = [384, 0], sizes = [64, 128], strides = [1, 1]} : vector<512x128xf32> to vector<64x128xf32>
    %cst_19 = arith.constant dense<0.000000e+00> : vector<128xf32>
    %56 = vector.multi_reduction <add>, %55, %cst_19 [0] : vector<64x128xf32> to vector<128xf32>
    %57 = vector.shape_cast %56 : vector<128xf32> to vector<1x128xf32>
    %58 = arith.addf %50, %57 : vector<1x128xf32>
    %59 = arith.mulf %55, %55 : vector<64x128xf32>
    %cst_20 = arith.constant dense<0.000000e+00> : vector<128xf32>
    %60 = vector.multi_reduction <add>, %59, %cst_20 [0] : vector<64x128xf32> to vector<128xf32>
    %61 = vector.shape_cast %60 : vector<128xf32> to vector<1x128xf32>
    %62 = arith.addf %54, %61 : vector<1x128xf32>
    %63 = vector.extract_strided_slice %2 {offsets = [448, 0], sizes = [64, 128], strides = [1, 1]} : vector<512x128xf32> to vector<64x128xf32>
    %cst_21 = arith.constant dense<0.000000e+00> : vector<128xf32>
    %64 = vector.multi_reduction <add>, %63, %cst_21 [0] : vector<64x128xf32> to vector<128xf32>
    %65 = vector.shape_cast %64 : vector<128xf32> to vector<1x128xf32>
    %66 = arith.addf %58, %65 : vector<1x128xf32>
    %67 = arith.mulf %63, %63 : vector<64x128xf32>
    %cst_22 = arith.constant dense<0.000000e+00> : vector<128xf32>
    %68 = vector.multi_reduction <add>, %67, %cst_22 [0] : vector<64x128xf32> to vector<128xf32>
    %69 = vector.shape_cast %68 : vector<128xf32> to vector<1x128xf32>
    %70 = arith.addf %62, %69 : vector<1x128xf32>
    %71 = vector.shape_cast %66 : vector<1x128xf32> to vector<1x1x128xf32>
    %c0_23 = arith.constant 0 : index
    %c0_24 = arith.constant 0 : index
    %c0_25 = arith.constant 0 : index
    %72 = vector.load %arg4[%c0_23, %c0_24, %c0_25] : memref<1x1x128xf32, #tpu.memory_space<vmem>>, vector<1x1x128xf32>
    tpu.vector_store %arg4[%c0_23, %c0_24, %c0_25], %71 {strides = array<i32>} : memref<1x1x128xf32, #tpu.memory_space<vmem>>, vector<1x1x128xf32>,
    %73 = vector.shape_cast %70 : vector<1x128xf32> to vector<1x1x128xf32>
    %c0_26 = arith.constant 0 : index
    %c0_27 = arith.constant 0 : index
    %c0_28 = arith.constant 0 : index
    %74 = vector.load %arg5[%c0_26, %c0_27, %c0_28] : memref<1x1x128xf32, #tpu.memory_space<vmem>>, vector<1x1x128xf32>
    tpu.vector_store %arg5[%c0_26, %c0_27, %c0_28], %73 {strides = array<i32>} : memref<1x1x128xf32, #tpu.memory_space<vmem>>, vector<1x1x128xf32>,
    return
  }
  func.func @transform_0(%arg0: i32) -> (i32, i32) {
    %c0_i32 = arith.constant 0 : i32
    %c0_i32_0 = arith.constant 0 : i32
    return %arg0, %c0_i32 : i32, i32
  }
  func.func @transform_1(%arg0: i32) -> (i32, i32) {
    %c0_i32 = arith.constant 0 : i32
    %c0_i32_0 = arith.constant 0 : i32
    %c0_i32_1 = arith.constant 0 : i32
    return %c0_i32, %c0_i32_0 : i32, i32
  }
  func.func @transform_2(%arg0: i32) -> (i32, i32) {
    %c0_i32 = arith.constant 0 : i32
    %c0_i32_0 = arith.constant 0 : i32
    return %arg0, %c0_i32 : i32, i32
  }
  func.func @transform_3(%arg0: i32) -> (i32, i32, i32) {
    %c0_i32 = arith.constant 0 : i32
    %c0_i32_0 = arith.constant 0 : i32
    %c0_i32_1 = arith.constant 0 : i32
    return %arg0, %c0_i32, %c0_i32_0 : i32, i32, i32
  }
  func.func @transform_4(%arg0: i32) -> (i32, i32, i32) {
    %c0_i32 = arith.constant 0 : i32
    %c0_i32_0 = arith.constant 0 : i32
    %c0_i32_1 = arith.constant 0 : i32
    return %arg0, %c0_i32, %c0_i32_0 : i32, i32, i32
  }
}

module attributes {stable_mosaic.version = 11 : i64} {
  func.func @_gemm_stats_kernel(%arg0: i32, %arg1: memref<128x288xbf16, #tpu.memory_space<vmem>>, %arg2: memref<288x128xbf16, #tpu.memory_space<vmem>>, %arg3: memref<128x128xbf16, #tpu.memory_space<vmem>>, %arg4: memref<1x1x128xf32, #tpu.memory_space<vmem>>, %arg5: memref<1x1x128xf32, #tpu.memory_space<vmem>>) attributes {dimension_semantics = [#tpu.dimension_semantics<parallel>], iteration_bounds = array<i64: 1>, scalar_prefetch = 0 : i64, scratch_operands = 0 : i64, tpu.core_type = #tpu.core_type<tc>, window_params = [{transform_indices = @transform_0, window_bounds = array<i64: 128, 288>}, {pipeline_mode = #tpu.pipeline_mode<synchronous>, transform_indices = @transform_1, window_bounds = array<i64: 288, 128>}, {transform_indices = @transform_2, window_bounds = array<i64: 128, 128>}, {transform_indices = @transform_3, window_bounds = array<i64: 1, 1, 128>}, {transform_indices = @transform_4, window_bounds = array<i64: 1, 1, 128>}]} {
    %c0 = arith.constant 0 : index
    %c0_0 = arith.constant 0 : index
    %0 = vector.load %arg1[%c0, %c0_0] : memref<128x288xbf16, #tpu.memory_space<vmem>>, vector<128x288xbf16>
    %c0_1 = arith.constant 0 : index
    %c0_2 = arith.constant 0 : index
    %1 = vector.load %arg2[%c0_1, %c0_2] : memref<288x128xbf16, #tpu.memory_space<vmem>>, vector<288x128xbf16>
    %cst = arith.constant dense<0.000000e+00> : vector<128x128xf32>
    %2 = tpu.matmul %0, %1, %cst {dimension_numbers = #tpu.dot_dimension_numbers<[1], [0], [0], [1], [0, 0, 1, 1], [], []>} : vector<128x288xbf16>, vector<288x128xbf16>, vector<128x128xf32> -> vector<128x128xf32>
    %3 = arith.truncf %2 : vector<128x128xf32> to vector<128x128xbf16>
    %c0_3 = arith.constant 0 : index
    %c0_4 = arith.constant 0 : index
    %4 = vector.load %arg3[%c0_3, %c0_4] : memref<128x128xbf16, #tpu.memory_space<vmem>>, vector<128x128xbf16>
    tpu.vector_store %arg3[%c0_3, %c0_4], %3 {strides = array<i32>} : memref<128x128xbf16, #tpu.memory_space<vmem>>, vector<128x128xbf16>,
    %cst_5 = arith.constant 0.000000e+00 : f32
    %5 = vector.broadcast %cst_5 : f32 to vector<1x128xf32>
    %cst_6 = arith.constant 0.000000e+00 : f32
    %6 = vector.broadcast %cst_6 : f32 to vector<1x128xf32>
    %7 = vector.extract_strided_slice %2 {offsets = [0, 0], sizes = [64, 128], strides = [1, 1]} : vector<128x128xf32> to vector<64x128xf32>
    %cst_7 = arith.constant dense<0.000000e+00> : vector<128xf32>
    %8 = vector.multi_reduction <add>, %7, %cst_7 [0] : vector<64x128xf32> to vector<128xf32>
    %9 = vector.shape_cast %8 : vector<128xf32> to vector<1x128xf32>
    %10 = arith.addf %5, %9 : vector<1x128xf32>
    %11 = arith.mulf %7, %7 : vector<64x128xf32>
    %cst_8 = arith.constant dense<0.000000e+00> : vector<128xf32>
    %12 = vector.multi_reduction <add>, %11, %cst_8 [0] : vector<64x128xf32> to vector<128xf32>
    %13 = vector.shape_cast %12 : vector<128xf32> to vector<1x128xf32>
    %14 = arith.addf %6, %13 : vector<1x128xf32>
    %15 = vector.extract_strided_slice %2 {offsets = [64, 0], sizes = [64, 128], strides = [1, 1]} : vector<128x128xf32> to vector<64x128xf32>
    %cst_9 = arith.constant dense<0.000000e+00> : vector<128xf32>
    %16 = vector.multi_reduction <add>, %15, %cst_9 [0] : vector<64x128xf32> to vector<128xf32>
    %17 = vector.shape_cast %16 : vector<128xf32> to vector<1x128xf32>
    %18 = arith.addf %10, %17 : vector<1x128xf32>
    %19 = arith.mulf %15, %15 : vector<64x128xf32>
    %cst_10 = arith.constant dense<0.000000e+00> : vector<128xf32>
    %20 = vector.multi_reduction <add>, %19, %cst_10 [0] : vector<64x128xf32> to vector<128xf32>
    %21 = vector.shape_cast %20 : vector<128xf32> to vector<1x128xf32>
    %22 = arith.addf %14, %21 : vector<1x128xf32>
    %23 = vector.shape_cast %18 : vector<1x128xf32> to vector<1x1x128xf32>
    %c0_11 = arith.constant 0 : index
    %c0_12 = arith.constant 0 : index
    %c0_13 = arith.constant 0 : index
    %24 = vector.load %arg4[%c0_11, %c0_12, %c0_13] : memref<1x1x128xf32, #tpu.memory_space<vmem>>, vector<1x1x128xf32>
    tpu.vector_store %arg4[%c0_11, %c0_12, %c0_13], %23 {strides = array<i32>} : memref<1x1x128xf32, #tpu.memory_space<vmem>>, vector<1x1x128xf32>,
    %25 = vector.shape_cast %22 : vector<1x128xf32> to vector<1x1x128xf32>
    %c0_14 = arith.constant 0 : index
    %c0_15 = arith.constant 0 : index
    %c0_16 = arith.constant 0 : index
    %26 = vector.load %arg5[%c0_14, %c0_15, %c0_16] : memref<1x1x128xf32, #tpu.memory_space<vmem>>, vector<1x1x128xf32>
    tpu.vector_store %arg5[%c0_14, %c0_15, %c0_16], %25 {strides = array<i32>} : memref<1x1x128xf32, #tpu.memory_space<vmem>>, vector<1x1x128xf32>,
    return
  }
  func.func @transform_0(%arg0: i32) -> (i32, i32) {
    %c0_i32 = arith.constant 0 : i32
    %c0_i32_0 = arith.constant 0 : i32
    return %arg0, %c0_i32 : i32, i32
  }
  func.func @transform_1(%arg0: i32) -> (i32, i32) {
    %c0_i32 = arith.constant 0 : i32
    %c0_i32_0 = arith.constant 0 : i32
    %c0_i32_1 = arith.constant 0 : i32
    return %c0_i32, %c0_i32_0 : i32, i32
  }
  func.func @transform_2(%arg0: i32) -> (i32, i32) {
    %c0_i32 = arith.constant 0 : i32
    %c0_i32_0 = arith.constant 0 : i32
    return %arg0, %c0_i32 : i32, i32
  }
  func.func @transform_3(%arg0: i32) -> (i32, i32, i32) {
    %c0_i32 = arith.constant 0 : i32
    %c0_i32_0 = arith.constant 0 : i32
    %c0_i32_1 = arith.constant 0 : i32
    return %arg0, %c0_i32, %c0_i32_0 : i32, i32, i32
  }
  func.func @transform_4(%arg0: i32) -> (i32, i32, i32) {
    %c0_i32 = arith.constant 0 : i32
    %c0_i32_0 = arith.constant 0 : i32
    %c0_i32_1 = arith.constant 0 : i32
    return %arg0, %c0_i32, %c0_i32_0 : i32, i32, i32
  }
}

module attributes {stable_mosaic.version = 11 : i64} {
  func.func @_gemm_stats_kernel(%arg0: i32, %arg1: memref<128x128xbf16, #tpu.memory_space<vmem>>, %arg2: memref<128x128xbf16, #tpu.memory_space<vmem>>, %arg3: memref<1x128xf32, #tpu.memory_space<vmem>>, %arg4: memref<1x128xf32, #tpu.memory_space<vmem>>, %arg5: memref<128x128xbf16, #tpu.memory_space<vmem>>, %arg6: memref<1x1x128xf32, #tpu.memory_space<vmem>>, %arg7: memref<1x1x128xf32, #tpu.memory_space<vmem>>) attributes {dimension_semantics = [#tpu.dimension_semantics<parallel>], iteration_bounds = array<i64: 1>, scalar_prefetch = 0 : i64, scratch_operands = 0 : i64, tpu.core_type = #tpu.core_type<tc>, window_params = [{transform_indices = @transform_0, window_bounds = array<i64: 128, 128>}, {pipeline_mode = #tpu.pipeline_mode<synchronous>, transform_indices = @transform_1, window_bounds = array<i64: 128, 128>}, {pipeline_mode = #tpu.pipeline_mode<synchronous>, transform_indices = @transform_2, window_bounds = array<i64: 1, 128>}, {pipeline_mode = #tpu.pipeline_mode<synchronous>, transform_indices = @transform_3, window_bounds = array<i64: 1, 128>}, {transform_indices = @transform_4, window_bounds = array<i64: 128, 128>}, {transform_indices = @transform_5, window_bounds = array<i64: 1, 1, 128>}, {transform_indices = @transform_6, window_bounds = array<i64: 1, 1, 128>}]} {
    %c0 = arith.constant 0 : index
    %c0_0 = arith.constant 0 : index
    %0 = vector.load %arg1[%c0, %c0_0] : memref<128x128xbf16, #tpu.memory_space<vmem>>, vector<128x128xbf16>
    %1 = arith.extf %0 : vector<128x128xbf16> to vector<128x128xf32>
    %c0_1 = arith.constant 0 : index
    %c0_2 = arith.constant 0 : index
    %2 = vector.load %arg3[%c0_1, %c0_2] : memref<1x128xf32, #tpu.memory_space<vmem>>, vector<1x128xf32>
    %3 = vector.broadcast %2 : vector<1x128xf32> to vector<128x128xf32>
    %4 = arith.mulf %1, %3 : vector<128x128xf32>
    %c0_3 = arith.constant 0 : index
    %c0_4 = arith.constant 0 : index
    %5 = vector.load %arg4[%c0_3, %c0_4] : memref<1x128xf32, #tpu.memory_space<vmem>>, vector<1x128xf32>
    %6 = vector.broadcast %5 : vector<1x128xf32> to vector<128x128xf32>
    %7 = arith.addf %4, %6 : vector<128x128xf32>
    %cst = arith.constant 0.000000e+00 : f32
    %8 = vector.broadcast %cst : f32 to vector<128x128xf32>
    %9 = arith.maximumf %7, %8 : vector<128x128xf32>
    %10 = arith.truncf %9 : vector<128x128xf32> to vector<128x128xbf16>
    %c0_5 = arith.constant 0 : index
    %c0_6 = arith.constant 0 : index
    %11 = vector.load %arg2[%c0_5, %c0_6] : memref<128x128xbf16, #tpu.memory_space<vmem>>, vector<128x128xbf16>
    %cst_7 = arith.constant dense<0.000000e+00> : vector<128x128xf32>
    %12 = tpu.matmul %10, %11, %cst_7 {dimension_numbers = #tpu.dot_dimension_numbers<[1], [0], [0], [1], [0, 0, 1, 1], [], []>} : vector<128x128xbf16>, vector<128x128xbf16>, vector<128x128xf32> -> vector<128x128xf32>
    %13 = arith.truncf %12 : vector<128x128xf32> to vector<128x128xbf16>
    %c0_8 = arith.constant 0 : index
    %c0_9 = arith.constant 0 : index
    %14 = vector.load %arg5[%c0_8, %c0_9] : memref<128x128xbf16, #tpu.memory_space<vmem>>, vector<128x128xbf16>
    tpu.vector_store %arg5[%c0_8, %c0_9], %13 {strides = array<i32>} : memref<128x128xbf16, #tpu.memory_space<vmem>>, vector<128x128xbf16>,
    %cst_10 = arith.constant 0.000000e+00 : f32
    %15 = vector.broadcast %cst_10 : f32 to vector<1x128xf32>
    %cst_11 = arith.constant 0.000000e+00 : f32
    %16 = vector.broadcast %cst_11 : f32 to vector<1x128xf32>
    %17 = vector.extract_strided_slice %12 {offsets = [0, 0], sizes = [64, 128], strides = [1, 1]} : vector<128x128xf32> to vector<64x128xf32>
    %cst_12 = arith.constant dense<0.000000e+00> : vector<128xf32>
    %18 = vector.multi_reduction <add>, %17, %cst_12 [0] : vector<64x128xf32> to vector<128xf32>
    %19 = vector.shape_cast %18 : vector<128xf32> to vector<1x128xf32>
    %20 = arith.addf %15, %19 : vector<1x128xf32>
    %21 = arith.mulf %17, %17 : vector<64x128xf32>
    %cst_13 = arith.constant dense<0.000000e+00> : vector<128xf32>
    %22 = vector.multi_reduction <add>, %21, %cst_13 [0] : vector<64x128xf32> to vector<128xf32>
    %23 = vector.shape_cast %22 : vector<128xf32> to vector<1x128xf32>
    %24 = arith.addf %16, %23 : vector<1x128xf32>
    %25 = vector.extract_strided_slice %12 {offsets = [64, 0], sizes = [64, 128], strides = [1, 1]} : vector<128x128xf32> to vector<64x128xf32>
    %cst_14 = arith.constant dense<0.000000e+00> : vector<128xf32>
    %26 = vector.multi_reduction <add>, %25, %cst_14 [0] : vector<64x128xf32> to vector<128xf32>
    %27 = vector.shape_cast %26 : vector<128xf32> to vector<1x128xf32>
    %28 = arith.addf %20, %27 : vector<1x128xf32>
    %29 = arith.mulf %25, %25 : vector<64x128xf32>
    %cst_15 = arith.constant dense<0.000000e+00> : vector<128xf32>
    %30 = vector.multi_reduction <add>, %29, %cst_15 [0] : vector<64x128xf32> to vector<128xf32>
    %31 = vector.shape_cast %30 : vector<128xf32> to vector<1x128xf32>
    %32 = arith.addf %24, %31 : vector<1x128xf32>
    %33 = vector.shape_cast %28 : vector<1x128xf32> to vector<1x1x128xf32>
    %c0_16 = arith.constant 0 : index
    %c0_17 = arith.constant 0 : index
    %c0_18 = arith.constant 0 : index
    %34 = vector.load %arg6[%c0_16, %c0_17, %c0_18] : memref<1x1x128xf32, #tpu.memory_space<vmem>>, vector<1x1x128xf32>
    tpu.vector_store %arg6[%c0_16, %c0_17, %c0_18], %33 {strides = array<i32>} : memref<1x1x128xf32, #tpu.memory_space<vmem>>, vector<1x1x128xf32>,
    %35 = vector.shape_cast %32 : vector<1x128xf32> to vector<1x1x128xf32>
    %c0_19 = arith.constant 0 : index
    %c0_20 = arith.constant 0 : index
    %c0_21 = arith.constant 0 : index
    %36 = vector.load %arg7[%c0_19, %c0_20, %c0_21] : memref<1x1x128xf32, #tpu.memory_space<vmem>>, vector<1x1x128xf32>
    tpu.vector_store %arg7[%c0_19, %c0_20, %c0_21], %35 {strides = array<i32>} : memref<1x1x128xf32, #tpu.memory_space<vmem>>, vector<1x1x128xf32>,
    return
  }
  func.func @transform_0(%arg0: i32) -> (i32, i32) {
    %c0_i32 = arith.constant 0 : i32
    %c0_i32_0 = arith.constant 0 : i32
    return %arg0, %c0_i32 : i32, i32
  }
  func.func @transform_1(%arg0: i32) -> (i32, i32) {
    %c0_i32 = arith.constant 0 : i32
    %c0_i32_0 = arith.constant 0 : i32
    %c0_i32_1 = arith.constant 0 : i32
    return %c0_i32, %c0_i32_0 : i32, i32
  }
  func.func @transform_2(%arg0: i32) -> (i32, i32) {
    %c0_i32 = arith.constant 0 : i32
    %c0_i32_0 = arith.constant 0 : i32
    %c0_i32_1 = arith.constant 0 : i32
    return %c0_i32, %c0_i32_0 : i32, i32
  }
  func.func @transform_3(%arg0: i32) -> (i32, i32) {
    %c0_i32 = arith.constant 0 : i32
    %c0_i32_0 = arith.constant 0 : i32
    %c0_i32_1 = arith.constant 0 : i32
    return %c0_i32, %c0_i32_0 : i32, i32
  }
  func.func @transform_4(%arg0: i32) -> (i32, i32) {
    %c0_i32 = arith.constant 0 : i32
    %c0_i32_0 = arith.constant 0 : i32
    return %arg0, %c0_i32 : i32, i32
  }
  func.func @transform_5(%arg0: i32) -> (i32, i32, i32) {
    %c0_i32 = arith.constant 0 : i32
    %c0_i32_0 = arith.constant 0 : i32
    %c0_i32_1 = arith.constant 0 : i32
    return %arg0, %c0_i32, %c0_i32_0 : i32, i32, i32
  }
  func.func @transform_6(%arg0: i32) -> (i32, i32, i32) {
    %c0_i32 = arith.constant 0 : i32
    %c0_i32_0 = arith.constant 0 : i32
    %c0_i32_1 = arith.constant 0 : i32
    return %arg0, %c0_i32, %c0_i32_0 : i32, i32, i32
  }
}

module attributes {stable_mosaic.version = 11 : i64} {
  func.func @_gemm_stats_kernel(%arg0: i32, %arg1: memref<128x64xbf16, #tpu.memory_space<vmem>>, %arg2: memref<64x128xbf16, #tpu.memory_space<vmem>>, %arg3: memref<128x128xbf16, #tpu.memory_space<vmem>>, %arg4: memref<1x1x128xf32, #tpu.memory_space<vmem>>, %arg5: memref<1x1x128xf32, #tpu.memory_space<vmem>>) attributes {dimension_semantics = [#tpu.dimension_semantics<parallel>], iteration_bounds = array<i64: 1>, scalar_prefetch = 0 : i64, scratch_operands = 0 : i64, tpu.core_type = #tpu.core_type<tc>, window_params = [{transform_indices = @transform_0, window_bounds = array<i64: 128, 64>}, {pipeline_mode = #tpu.pipeline_mode<synchronous>, transform_indices = @transform_1, window_bounds = array<i64: 64, 128>}, {transform_indices = @transform_2, window_bounds = array<i64: 128, 128>}, {transform_indices = @transform_3, window_bounds = array<i64: 1, 1, 128>}, {transform_indices = @transform_4, window_bounds = array<i64: 1, 1, 128>}]} {
    %c0 = arith.constant 0 : index
    %c0_0 = arith.constant 0 : index
    %0 = vector.load %arg1[%c0, %c0_0] : memref<128x64xbf16, #tpu.memory_space<vmem>>, vector<128x64xbf16>
    %c0_1 = arith.constant 0 : index
    %c0_2 = arith.constant 0 : index
    %1 = vector.load %arg2[%c0_1, %c0_2] : memref<64x128xbf16, #tpu.memory_space<vmem>>, vector<64x128xbf16>
    %cst = arith.constant dense<0.000000e+00> : vector<128x128xf32>
    %2 = tpu.matmul %0, %1, %cst {dimension_numbers = #tpu.dot_dimension_numbers<[1], [0], [0], [1], [0, 0, 1, 1], [], []>} : vector<128x64xbf16>, vector<64x128xbf16>, vector<128x128xf32> -> vector<128x128xf32>
    %3 = arith.truncf %2 : vector<128x128xf32> to vector<128x128xbf16>
    %c0_3 = arith.constant 0 : index
    %c0_4 = arith.constant 0 : index
    %4 = vector.load %arg3[%c0_3, %c0_4] : memref<128x128xbf16, #tpu.memory_space<vmem>>, vector<128x128xbf16>
    tpu.vector_store %arg3[%c0_3, %c0_4], %3 {strides = array<i32>} : memref<128x128xbf16, #tpu.memory_space<vmem>>, vector<128x128xbf16>,
    %cst_5 = arith.constant 0.000000e+00 : f32
    %5 = vector.broadcast %cst_5 : f32 to vector<1x128xf32>
    %cst_6 = arith.constant 0.000000e+00 : f32
    %6 = vector.broadcast %cst_6 : f32 to vector<1x128xf32>
    %7 = vector.extract_strided_slice %2 {offsets = [0, 0], sizes = [64, 128], strides = [1, 1]} : vector<128x128xf32> to vector<64x128xf32>
    %cst_7 = arith.constant dense<0.000000e+00> : vector<128xf32>
    %8 = vector.multi_reduction <add>, %7, %cst_7 [0] : vector<64x128xf32> to vector<128xf32>
    %9 = vector.shape_cast %8 : vector<128xf32> to vector<1x128xf32>
    %10 = arith.addf %5, %9 : vector<1x128xf32>
    %11 = arith.mulf %7, %7 : vector<64x128xf32>
    %cst_8 = arith.constant dense<0.000000e+00> : vector<128xf32>
    %12 = vector.multi_reduction <add>, %11, %cst_8 [0] : vector<64x128xf32> to vector<128xf32>
    %13 = vector.shape_cast %12 : vector<128xf32> to vector<1x128xf32>
    %14 = arith.addf %6, %13 : vector<1x128xf32>
    %15 = vector.extract_strided_slice %2 {offsets = [64, 0], sizes = [64, 128], strides = [1, 1]} : vector<128x128xf32> to vector<64x128xf32>
    %cst_9 = arith.constant dense<0.000000e+00> : vector<128xf32>
    %16 = vector.multi_reduction <add>, %15, %cst_9 [0] : vector<64x128xf32> to vector<128xf32>
    %17 = vector.shape_cast %16 : vector<128xf32> to vector<1x128xf32>
    %18 = arith.addf %10, %17 : vector<1x128xf32>
    %19 = arith.mulf %15, %15 : vector<64x128xf32>
    %cst_10 = arith.constant dense<0.000000e+00> : vector<128xf32>
    %20 = vector.multi_reduction <add>, %19, %cst_10 [0] : vector<64x128xf32> to vector<128xf32>
    %21 = vector.shape_cast %20 : vector<128xf32> to vector<1x128xf32>
    %22 = arith.addf %14, %21 : vector<1x128xf32>
    %23 = vector.shape_cast %18 : vector<1x128xf32> to vector<1x1x128xf32>
    %c0_11 = arith.constant 0 : index
    %c0_12 = arith.constant 0 : index
    %c0_13 = arith.constant 0 : index
    %24 = vector.load %arg4[%c0_11, %c0_12, %c0_13] : memref<1x1x128xf32, #tpu.memory_space<vmem>>, vector<1x1x128xf32>
    tpu.vector_store %arg4[%c0_11, %c0_12, %c0_13], %23 {strides = array<i32>} : memref<1x1x128xf32, #tpu.memory_space<vmem>>, vector<1x1x128xf32>,
    %25 = vector.shape_cast %22 : vector<1x128xf32> to vector<1x1x128xf32>
    %c0_14 = arith.constant 0 : index
    %c0_15 = arith.constant 0 : index
    %c0_16 = arith.constant 0 : index
    %26 = vector.load %arg5[%c0_14, %c0_15, %c0_16] : memref<1x1x128xf32, #tpu.memory_space<vmem>>, vector<1x1x128xf32>
    tpu.vector_store %arg5[%c0_14, %c0_15, %c0_16], %25 {strides = array<i32>} : memref<1x1x128xf32, #tpu.memory_space<vmem>>, vector<1x1x128xf32>,
    return
  }
  func.func @transform_0(%arg0: i32) -> (i32, i32) {
    %c0_i32 = arith.constant 0 : i32
    %c0_i32_0 = arith.constant 0 : i32
    return %arg0, %c0_i32 : i32, i32
  }
  func.func @transform_1(%arg0: i32) -> (i32, i32) {
    %c0_i32 = arith.constant 0 : i32
    %c0_i32_0 = arith.constant 0 : i32
    %c0_i32_1 = arith.constant 0 : i32
    return %c0_i32, %c0_i32_0 : i32, i32
  }
  func.func @transform_2(%arg0: i32) -> (i32, i32) {
    %c0_i32 = arith.constant 0 : i32
    %c0_i32_0 = arith.constant 0 : i32
    return %arg0, %c0_i32 : i32, i32
  }
  func.func @transform_3(%arg0: i32) -> (i32, i32, i32) {
    %c0_i32 = arith.constant 0 : i32
    %c0_i32_0 = arith.constant 0 : i32
    %c0_i32_1 = arith.constant 0 : i32
    return %arg0, %c0_i32, %c0_i32_0 : i32, i32, i32
  }
  func.func @transform_4(%arg0: i32) -> (i32, i32, i32) {
    %c0_i32 = arith.constant 0 : i32
    %c0_i32_0 = arith.constant 0 : i32
    %c0_i32_1 = arith.constant 0 : i32
    return %arg0, %c0_i32, %c0_i32_0 : i32, i32, i32
  }
}

module attributes {stable_mosaic.version = 11 : i64} {
  func.func @_affine_kernel(%arg0: i32, %arg1: memref<128x128xbf16, #tpu.memory_space<vmem>>, %arg2: memref<128x128xbf16, #tpu.memory_space<vmem>>, %arg3: memref<1x128xf32, #tpu.memory_space<vmem>>, %arg4: memref<1x128xf32, #tpu.memory_space<vmem>>, %arg5: memref<1x128xf32, #tpu.memory_space<vmem>>, %arg6: memref<1x128xf32, #tpu.memory_space<vmem>>, %arg7: memref<128x128xbf16, #tpu.memory_space<vmem>>) attributes {dimension_semantics = [#tpu.dimension_semantics<parallel>], iteration_bounds = array<i64: 1>, scalar_prefetch = 0 : i64, scratch_operands = 0 : i64, tpu.core_type = #tpu.core_type<tc>, window_params = [{transform_indices = @transform_0, window_bounds = array<i64: 128, 128>}, {transform_indices = @transform_1, window_bounds = array<i64: 128, 128>}, {pipeline_mode = #tpu.pipeline_mode<synchronous>, transform_indices = @transform_2, window_bounds = array<i64: 1, 128>}, {pipeline_mode = #tpu.pipeline_mode<synchronous>, transform_indices = @transform_3, window_bounds = array<i64: 1, 128>}, {pipeline_mode = #tpu.pipeline_mode<synchronous>, transform_indices = @transform_4, window_bounds = array<i64: 1, 128>}, {pipeline_mode = #tpu.pipeline_mode<synchronous>, transform_indices = @transform_5, window_bounds = array<i64: 1, 128>}, {transform_indices = @transform_6, window_bounds = array<i64: 128, 128>}]} {
    %c0 = arith.constant 0 : index
    %c0_0 = arith.constant 0 : index
    %0 = vector.load %arg1[%c0, %c0_0] : memref<128x128xbf16, #tpu.memory_space<vmem>>, vector<128x128xbf16>
    %1 = arith.extf %0 : vector<128x128xbf16> to vector<128x128xf32>
    %c0_1 = arith.constant 0 : index
    %c0_2 = arith.constant 0 : index
    %2 = vector.load %arg3[%c0_1, %c0_2] : memref<1x128xf32, #tpu.memory_space<vmem>>, vector<1x128xf32>
    %3 = vector.broadcast %2 : vector<1x128xf32> to vector<128x128xf32>
    %4 = arith.mulf %1, %3 : vector<128x128xf32>
    %c0_3 = arith.constant 0 : index
    %c0_4 = arith.constant 0 : index
    %5 = vector.load %arg4[%c0_3, %c0_4] : memref<1x128xf32, #tpu.memory_space<vmem>>, vector<1x128xf32>
    %6 = vector.broadcast %5 : vector<1x128xf32> to vector<128x128xf32>
    %7 = arith.addf %4, %6 : vector<128x128xf32>
    %c0_5 = arith.constant 0 : index
    %c0_6 = arith.constant 0 : index
    %8 = vector.load %arg2[%c0_5, %c0_6] : memref<128x128xbf16, #tpu.memory_space<vmem>>, vector<128x128xbf16>
    %9 = arith.extf %8 : vector<128x128xbf16> to vector<128x128xf32>
    %c0_7 = arith.constant 0 : index
    %c0_8 = arith.constant 0 : index
    %10 = vector.load %arg5[%c0_7, %c0_8] : memref<1x128xf32, #tpu.memory_space<vmem>>, vector<1x128xf32>
    %11 = vector.broadcast %10 : vector<1x128xf32> to vector<128x128xf32>
    %12 = arith.mulf %9, %11 : vector<128x128xf32>
    %c0_9 = arith.constant 0 : index
    %c0_10 = arith.constant 0 : index
    %13 = vector.load %arg6[%c0_9, %c0_10] : memref<1x128xf32, #tpu.memory_space<vmem>>, vector<1x128xf32>
    %14 = vector.broadcast %13 : vector<1x128xf32> to vector<128x128xf32>
    %15 = arith.addf %12, %14 : vector<128x128xf32>
    %16 = arith.addf %7, %15 : vector<128x128xf32>
    %cst = arith.constant 0.000000e+00 : f32
    %17 = vector.broadcast %cst : f32 to vector<128x128xf32>
    %18 = arith.maximumf %16, %17 : vector<128x128xf32>
    %19 = arith.truncf %18 : vector<128x128xf32> to vector<128x128xbf16>
    %c0_11 = arith.constant 0 : index
    %c0_12 = arith.constant 0 : index
    %20 = vector.load %arg7[%c0_11, %c0_12] : memref<128x128xbf16, #tpu.memory_space<vmem>>, vector<128x128xbf16>
    tpu.vector_store %arg7[%c0_11, %c0_12], %19 {strides = array<i32>} : memref<128x128xbf16, #tpu.memory_space<vmem>>, vector<128x128xbf16>,
    return
  }
  func.func @transform_0(%arg0: i32) -> (i32, i32) {
    %c0_i32 = arith.constant 0 : i32
    %c0_i32_0 = arith.constant 0 : i32
    return %arg0, %c0_i32 : i32, i32
  }
  func.func @transform_1(%arg0: i32) -> (i32, i32) {
    %c0_i32 = arith.constant 0 : i32
    %c0_i32_0 = arith.constant 0 : i32
    return %arg0, %c0_i32 : i32, i32
  }
  func.func @transform_2(%arg0: i32) -> (i32, i32) {
    %c0_i32 = arith.constant 0 : i32
    %c0_i32_0 = arith.constant 0 : i32
    %c0_i32_1 = arith.constant 0 : i32
    return %c0_i32, %c0_i32_0 : i32, i32
  }
  func.func @transform_3(%arg0: i32) -> (i32, i32) {
    %c0_i32 = arith.constant 0 : i32
    %c0_i32_0 = arith.constant 0 : i32
    %c0_i32_1 = arith.constant 0 : i32
    return %c0_i32, %c0_i32_0 : i32, i32
  }
  func.func @transform_4(%arg0: i32) -> (i32, i32) {
    %c0_i32 = arith.constant 0 : i32
    %c0_i32_0 = arith.constant 0 : i32
    %c0_i32_1 = arith.constant 0 : i32
    return %c0_i32, %c0_i32_0 : i32, i32
  }
  func.func @transform_5(%arg0: i32) -> (i32, i32) {
    %c0_i32 = arith.constant 0 : i32
    %c0_i32_0 = arith.constant 0 : i32
    %c0_i32_1 = arith.constant 0 : i32
    return %c0_i32, %c0_i32_0 : i32, i32
  }
  func.func @transform_6(%arg0: i32) -> (i32, i32) {
    %c0_i32 = arith.constant 0 : i32
    %c0_i32_0 = arith.constant 0 : i32
    return %arg0, %c0_i32 : i32, i32
  }
}

</mosaic_0001>

<bundles_post_ra>
// kernel: bottleneck_forward.7
= control target key start
LH: loop header
LB: loop body
LE: loop exit
PB: predicated region body
PF: predicated region fallthrough
CT: control target
= control target key end

     0   :  { %s1502_s0 = inlined_call_operand.vmem [shape: bf16[512,128], index: 0, kind: input, shape index: {}]   ;;  %s1503_s1 = inlined_call_operand.vmem [shape: f32[1,128], index: 1, kind: input, shape index: {}]   ;;  %s1504_s2 = inlined_call_operand.vmem [shape: f32[1,128], index: 2, kind: input, shape index: {}]   ;;  %s1505_s3 = inlined_call_operand.vmem [shape: bf16[512,128], index: 3, kind: output, shape index: {}]  }
   0x1   :  { %v803_v0 = vld [vmem:[%s1502_s0] sm:$0xff]   ;;  %v1090_v4 = vld [vmem:[%s1502_s0 + $0x8] sm:$0xff]   ;;  %v1091_v5 = vld [vmem:[%s1502_s0 + $0x10] sm:$0xff]  }
   0x2   :  { %v1178_v1 = vld [vmem:[%s1503_s1] ss:$0 sm:$0xff]  ;;  %v804_v2 = vunpack.c.l.bf16 %v803_v0  ;;  %v805_v3 = vunpack.c.h.bf16 %v803_v0  ;;  %v1092_v6 = vld [vmem:[%s1502_s0 + $0x18] sm:$0xff]   ;;  %v808_v8 = vunpack.c.l.bf16 %v1090_v4  ;;  %v809_v9 = vunpack.c.h.bf16 %v1090_v4  ;;  %v1094_v33 = vld [vmem:[%s1502_s0 + $0x28] sm:$0xff]  }
   0x3   :  { %v1192_v7 = vld [vmem:[%s1504_s2] ss:$0 sm:$0xff]  ;;  %v812_v10 = vunpack.c.l.bf16 %v1091_v5  ;;  %v813_v11 = vunpack.c.h.bf16 %v1091_v5  ;;  %v816_v14 = vunpack.c.l.bf16 %v1092_v6  ;;  %v817_v15 = vunpack.c.h.bf16 %v1092_v6  ;;  %v1095_v38 = vld [vmem:[%s1502_s0 + $0x30] sm:$0xff]   ;;  %v1096_v43 = vld [vmem:[%s1502_s0 + $0x38] sm:$0xff]  }
   0x4   :  { %v149_v12 = vmul.f32 %v804_v2, %v1178_v1  ;;  %v150_v13 = vmul.f32 %v805_v3, %v1178_v1  ;;  %v151_v16 = vmul.f32 %v808_v8, %v1178_v1  ;;  %v152_v17 = vmul.f32 %v809_v9, %v1178_v1  ;;  %v1093_v28 = vld [vmem:[%s1502_s0 + $0x20] sm:$0xff]  }
   0x5   :  { %v153_v18 = vmul.f32 %v812_v10, %v1178_v1  ;;  %v154_v19 = vmul.f32 %v813_v11, %v1178_v1  ;;  %v155_v22 = vmul.f32 %v816_v14, %v1178_v1  ;;  %v156_v23 = vmul.f32 %v817_v15, %v1178_v1  ;;  %v1097_v0 = vld [vmem:[%s1502_s0 + $0x40] sm:$0xff]   ;;  %v1098_v11 = vld [vmem:[%s1502_s0 + $0x48] sm:$0xff]  }
   0x6   :  { %v220_v20 = vadd.f32 %v1192_v7, %v149_v12  ;;  %v221_v21 = vadd.f32 %v1192_v7, %v150_v13  ;;  %v222_v24 = vadd.f32 %v1192_v7, %v151_v16  ;;  %v223_v25 = vadd.f32 %v1192_v7, %v152_v17  ;;  %v1099_v16 = vld [vmem:[%s1502_s0 + $0x50] sm:$0xff]  }
   0x7   :  { %v224_v26 = vadd.f32 %v1192_v7, %v153_v18  ;;  %v225_v27 = vadd.f32 %v1192_v7, %v154_v19  ;;  %v226_v31 = vadd.f32 %v1192_v7, %v155_v22  ;;  %v227_v32 = vadd.f32 %v1192_v7, %v156_v23 }
   0x8   :  { %v284_v29 = vmax.f32 %v220_v20, 0.0  ;;  %v285_v30 = vmax.f32 %v221_v21, 0.0  ;;  %v286_v34 = vmax.f32 %v222_v24, 0.0  ;;  %v287_v35 = vmax.f32 %v223_v25, 0.0  ;;  %v1100_v25 = vld [vmem:[%s1502_s0 + $0x58] sm:$0xff]  }
   0x9   :  { %v288_v36 = vmax.f32 %v224_v26, 0.0  ;;  %v289_v37 = vmax.f32 %v225_v27, 0.0  ;;  %v290_v40 = vmax.f32 %v226_v31, 0.0  ;;  %v291_v41 = vmax.f32 %v227_v32, 0.0 }
   0xa   :  { %v933_v39 = vpack.c.bf16 %v285_v30, %v284_v29  ;;  %v820_v42 = vunpack.c.l.bf16 %v1093_v28  ;;  %v938_v44 = vpack.c.bf16 %v287_v35, %v286_v34  ;;  %v821_v46 = vunpack.c.h.bf16 %v1093_v28 }
   0xb   :  { %v943_v45 = vpack.c.bf16 %v289_v37, %v288_v36  ;;  %v824_v47 = vunpack.c.l.bf16 %v1094_v33  ;;  %v948_v48 = vpack.c.bf16 %v291_v41, %v290_v40  ;;  %v825_v50 = vunpack.c.h.bf16 %v1094_v33 }
   0xc   :  { %934 = vst [vmem:[%s1505_s3] sm:$0xff] %v933_v39   ;;  %v157_v49 = vmul.f32 %v820_v42, %v1178_v1  ;;  %v828_v51 = vunpack.c.l.bf16 %v1095_v38  ;;  %1121 = vst [vmem:[%s1505_s3 + $0x8] sm:$0xff] %v938_v44   ;;  %v158_v52 = vmul.f32 %v821_v46, %v1178_v1  ;;  %v829_v54 = vunpack.c.h.bf16 %v1095_v38  ;;  %v1101_v38 = vld [vmem:[%s1502_s0 + $0x60] sm:$0xff]  }
   0xd   :  { %1122 = vst [vmem:[%s1505_s3 + $0x10] sm:$0xff] %v943_v45   ;;  %v159_v53 = vmul.f32 %v824_v47, %v1178_v1  ;;  %v832_v55 = vunpack.c.l.bf16 %v1096_v43  ;;  %1123 = vst [vmem:[%s1505_s3 + $0x18] sm:$0xff] %v948_v48   ;;  %v160_v57 = vmul.f32 %v825_v50, %v1178_v1  ;;  %v833_v59 = vunpack.c.h.bf16 %v1096_v43 }
   0xe   :  { %v228_v56 = vadd.f32 %v1192_v7, %v157_v49  ;;  %v161_v58 = vmul.f32 %v828_v51, %v1178_v1  ;;  %v229_v60 = vadd.f32 %v1192_v7, %v158_v52  ;;  %v162_v62 = vmul.f32 %v829_v54, %v1178_v1  ;;  %v1102_v51 = vld [vmem:[%s1502_s0 + $0x68] sm:$0xff]  }
   0xf   :  { %v230_v61 = vadd.f32 %v1192_v7, %v159_v53  ;;  %v163_v63 = vmul.f32 %v832_v55, %v1178_v1  ;;  %v231_v3 = vadd.f32 %v1192_v7, %v160_v57  ;;  %v164_v5 = vmul.f32 %v833_v59, %v1178_v1 }
  0x10   :  { %v292_v2 = vmax.f32 %v228_v56, 0.0  ;;  %v232_v4 = vadd.f32 %v1192_v7, %v161_v58  ;;  %v293_v6 = vmax.f32 %v229_v60, 0.0  ;;  %v233_v9 = vadd.f32 %v1192_v7, %v162_v62  ;;  %v1103_v60 = vld [vmem:[%s1502_s0 + $0x70] sm:$0xff]  }
  0x11   :  { %v294_v8 = vmax.f32 %v230_v61, 0.0  ;;  %v234_v10 = vadd.f32 %v1192_v7, %v163_v63  ;;  %v295_v12 = vmax.f32 %v231_v3, 0.0  ;;  %v235_v14 = vadd.f32 %v1192_v7, %v164_v5 }
  0x12   :  { %v296_v13 = vmax.f32 %v232_v4, 0.0  ;;  %v836_v15 = vunpack.c.l.bf16 %v1097_v0  ;;  %v953_v17 = vpack.c.bf16 %v293_v6, %v292_v2  ;;  %v297_v18 = vmax.f32 %v233_v9, 0.0  ;;  %v1104_v2 = vld [vmem:[%s1502_s0 + $0x78] sm:$0xff]  }
  0x13   :  { %v298_v19 = vmax.f32 %v234_v10, 0.0  ;;  %v837_v20 = vunpack.c.h.bf16 %v1097_v0  ;;  %v958_v21 = vpack.c.bf16 %v295_v12, %v294_v8  ;;  %v299_v22 = vmax.f32 %v235_v14, 0.0  ;;  %v1105_v12 = vld [vmem:[%s1502_s0 + $0x80] sm:$0xff]  }
  0x14   :  { %v165_v23 = vmul.f32 %v836_v15, %v1178_v1  ;;  %v840_v24 = vunpack.c.l.bf16 %v1098_v11  ;;  %1124 = vst [vmem:[%s1505_s3 + $0x20] sm:$0xff] %v953_v17   ;;  %v963_v26 = vpack.c.bf16 %v297_v18, %v296_v13  ;;  %v841_v28 = vunpack.c.h.bf16 %v1098_v11 }
  0x15   :  { %v166_v27 = vmul.f32 %v837_v20, %v1178_v1  ;;  %v844_v29 = vunpack.c.l.bf16 %v1099_v16  ;;  %1125 = vst [vmem:[%s1505_s3 + $0x28] sm:$0xff] %v958_v21   ;;  %v968_v30 = vpack.c.bf16 %v299_v22, %v298_v19  ;;  %v845_v33 = vunpack.c.h.bf16 %v1099_v16 }
  0x16   :  { %v236_v31 = vadd.f32 %v1192_v7, %v165_v23  ;;  %v167_v32 = vmul.f32 %v840_v24, %v1178_v1  ;;  %1126 = vst [vmem:[%s1505_s3 + $0x30] sm:$0xff] %v963_v26   ;;  %v168_v35 = vmul.f32 %v841_v28, %v1178_v1  ;;  %v848_v37 = vunpack.c.l.bf16 %v1100_v25 }
  0x17   :  { %v237_v34 = vadd.f32 %v1192_v7, %v166_v27  ;;  %v169_v36 = vmul.f32 %v844_v29, %v1178_v1  ;;  %1127 = vst [vmem:[%s1505_s3 + $0x38] sm:$0xff] %v968_v30   ;;  %v170_v41 = vmul.f32 %v845_v33, %v1178_v1  ;;  %v849_v42 = vunpack.c.h.bf16 %v1100_v25  ;;  %v1106_v29 = vld [vmem:[%s1502_s0 + $0x88] sm:$0xff]  }
  0x18   :  { %v300_v39 = vmax.f32 %v236_v31, 0.0  ;;  %v238_v40 = vadd.f32 %v1192_v7, %v167_v32  ;;  %v239_v44 = vadd.f32 %v1192_v7, %v168_v35  ;;  %v171_v46 = vmul.f32 %v848_v37, %v1178_v1 }
  0x19   :  { %v301_v43 = vmax.f32 %v237_v34, 0.0  ;;  %v240_v45 = vadd.f32 %v1192_v7, %v169_v36  ;;  %v241_v48 = vadd.f32 %v1192_v7, %v170_v41  ;;  %v172_v49 = vmul.f32 %v849_v42, %v1178_v1  ;;  %v1107_v34 = vld [vmem:[%s1502_s0 + $0x90] sm:$0xff]  }
  0x1a   :  { %v302_v47 = vmax.f32 %v238_v40, 0.0  ;;  %v852_v50 = vunpack.c.l.bf16 %v1101_v38  ;;  %v303_v53 = vmax.f32 %v239_v44, 0.0  ;;  %v242_v55 = vadd.f32 %v1192_v7, %v171_v46 }
  0x1b   :  { %v973_v52 = vpack.c.bf16 %v301_v43, %v300_v39  ;;  %v304_v54 = vmax.f32 %v240_v45, 0.0  ;;  %v305_v56 = vmax.f32 %v241_v48, 0.0  ;;  %v243_v57 = vadd.f32 %v1192_v7, %v172_v49  ;;  %v1108_v43 = vld [vmem:[%s1502_s0 + $0x98] sm:$0xff]  }
  0x1c   :  { %v853_v58 = vunpack.c.h.bf16 %v1101_v38  ;;  %v173_v59 = vmul.f32 %v852_v50, %v1178_v1  ;;  %v978_v61 = vpack.c.bf16 %v303_v53, %v302_v47  ;;  %v306_v62 = vmax.f32 %v242_v55, 0.0 }
  0x1d   :  { %1128 = vst [vmem:[%s1505_s3 + $0x40] sm:$0xff] %v973_v52   ;;  %v856_v63 = vunpack.c.l.bf16 %v1102_v51  ;;  %v857_v0 = vunpack.c.h.bf16 %v1102_v51  ;;  %v983_v3 = vpack.c.bf16 %v305_v56, %v304_v54  ;;  %v307_v4 = vmax.f32 %v243_v57, 0.0  ;;  %v1109_v56 = vld [vmem:[%s1502_s0 + $0xa0] sm:$0xff]  }
  0x1e   :  { %v174_v5 = vmul.f32 %v853_v58, %v1178_v1  ;;  %v244_v6 = vadd.f32 %v1192_v7, %v173_v59  ;;  %1129 = vst [vmem:[%s1505_s3 + $0x48] sm:$0xff] %v978_v61   ;;  %v860_v10 = vunpack.c.l.bf16 %v1103_v60  ;;  %v861_v11 = vunpack.c.h.bf16 %v1103_v60 }
  0x1f   :  { %v175_v8 = vmul.f32 %v856_v63, %v1178_v1  ;;  %v176_v9 = vmul.f32 %v857_v0, %v1178_v1  ;;  %1130 = vst [vmem:[%s1505_s3 + $0x50] sm:$0xff] %v983_v3   ;;  %v988_v13 = vpack.c.bf16 %v307_v4, %v306_v62  ;;  %v864_v16 = vunpack.c.l.bf16 %v1104_v2 }
  0x20   :  { %v245_v14 = vadd.f32 %v1192_v7, %v174_v5  ;;  %v308_v15 = vmax.f32 %v244_v6, 0.0  ;;  %v177_v19 = vmul.f32 %v860_v10, %v1178_v1  ;;  %v178_v20 = vmul.f32 %v861_v11, %v1178_v1 }
  0x21   :  { %v246_v17 = vadd.f32 %v1192_v7, %v175_v8  ;;  %v247_v18 = vadd.f32 %v1192_v7, %v176_v9  ;;  %1131 = vst [vmem:[%s1505_s3 + $0x58] sm:$0xff] %v988_v13   ;;  %v865_v22 = vunpack.c.h.bf16 %v1104_v2  ;;  %v179_v23 = vmul.f32 %v864_v16, %v1178_v1  ;;  %v1110_v2 = vld [vmem:[%s1502_s0 + $0xa8] sm:$0xff]   ;;  %v1111_v16 = vld [vmem:[%s1502_s0 + $0xb0] sm:$0xff]  }
  0x22   :  { %v309_v21 = vmax.f32 %v245_v14, 0.0  ;;  %v868_v24 = vunpack.c.l.bf16 %v1105_v12  ;;  %v248_v27 = vadd.f32 %v1192_v7, %v177_v19  ;;  %v249_v28 = vadd.f32 %v1192_v7, %v178_v20 }
  0x23   :  { %v310_v25 = vmax.f32 %v246_v17, 0.0  ;;  %v311_v26 = vmax.f32 %v247_v18, 0.0  ;;  %v180_v31 = vmul.f32 %v865_v22, %v1178_v1  ;;  %v250_v32 = vadd.f32 %v1192_v7, %v179_v23 }
  0x24   :  { %v993_v30 = vpack.c.bf16 %v309_v21, %v308_v15  ;;  %v869_v33 = vunpack.c.h.bf16 %v1105_v12  ;;  %v312_v36 = vmax.f32 %v248_v27, 0.0  ;;  %v313_v37 = vmax.f32 %v249_v28, 0.0  ;;  %v1112_v21 = vld [vmem:[%s1502_s0 + $0xb8] sm:$0xff]  }
  0x25   :  { %v998_v35 = vpack.c.bf16 %v311_v26, %v310_v25  ;;  %v181_v38 = vmul.f32 %v868_v24, %v1178_v1  ;;  %v251_v39 = vadd.f32 %v1192_v7, %v180_v31  ;;  %v314_v40 = vmax.f32 %v250_v32, 0.0 }
  0x26   :  { %1132 = vst [vmem:[%s1505_s3 + $0x60] sm:$0xff] %v993_v30   ;;  %v182_v41 = vmul.f32 %v869_v33, %v1178_v1  ;;  %v872_v42 = vunpack.c.l.bf16 %v1106_v29  ;;  %v1003_v44 = vpack.c.bf16 %v313_v37, %v312_v36  ;;  %v873_v46 = vunpack.c.h.bf16 %v1106_v29 }
  0x27   :  { %1133 = vst [vmem:[%s1505_s3 + $0x68] sm:$0xff] %v998_v35   ;;  %v252_v45 = vadd.f32 %v1192_v7, %v181_v38  ;;  %v876_v47 = vunpack.c.l.bf16 %v1107_v34  ;;  %v315_v48 = vmax.f32 %v251_v39, 0.0  ;;  %v877_v51 = vunpack.c.h.bf16 %v1107_v34  ;;  %v1113_v34 = vld [vmem:[%s1502_s0 + $0xc0] sm:$0xff]  }
  0x28   :  { %v253_v49 = vadd.f32 %v1192_v7, %v182_v41  ;;  %v183_v50 = vmul.f32 %v872_v42, %v1178_v1  ;;  %1134 = vst [vmem:[%s1505_s3 + $0x70] sm:$0xff] %v1003_v44   ;;  %v184_v53 = vmul.f32 %v873_v46, %v1178_v1  ;;  %v880_v55 = vunpack.c.l.bf16 %v1108_v43 }
  0x29   :  { %v316_v52 = vmax.f32 %v252_v45, 0.0  ;;  %v185_v54 = vmul.f32 %v876_v47, %v1178_v1  ;;  %v1008_v57 = vpack.c.bf16 %v315_v48, %v314_v40  ;;  %v186_v60 = vmul.f32 %v877_v51, %v1178_v1  ;;  %v1114_v47 = vld [vmem:[%s1502_s0 + $0xc8] sm:$0xff]  }
  0x2a   :  { %v317_v58 = vmax.f32 %v253_v49, 0.0  ;;  %v254_v59 = vadd.f32 %v1192_v7, %v183_v50  ;;  %v255_v61 = vadd.f32 %v1192_v7, %v184_v53  ;;  %v881_v63 = vunpack.c.h.bf16 %v1108_v43 }
  0x2b   :  { %v256_v62 = vadd.f32 %v1192_v7, %v185_v54  ;;  %v187_v0 = vmul.f32 %v880_v55, %v1178_v1  ;;  %1135 = vst [vmem:[%s1505_s3 + $0x78] sm:$0xff] %v1008_v57   ;;  %v257_v5 = vadd.f32 %v1192_v7, %v186_v60  ;;  %v884_v6 = vunpack.c.l.bf16 %v1109_v56 }
  0x2c   :  { %v1013_v3 = vpack.c.bf16 %v317_v58, %v316_v52  ;;  %v318_v4 = vmax.f32 %v254_v59, 0.0  ;;  %v319_v8 = vmax.f32 %v255_v61, 0.0  ;;  %v188_v10 = vmul.f32 %v881_v63, %v1178_v1  ;;  %v1115_v52 = vld [vmem:[%s1502_s0 + $0xd0] sm:$0xff]   ;;  %v1116_v61 = vld [vmem:[%s1502_s0 + $0xd8] sm:$0xff]  }
  0x2d   :  { %v320_v9 = vmax.f32 %v256_v62, 0.0  ;;  %v258_v11 = vadd.f32 %v1192_v7, %v187_v0  ;;  %v321_v12 = vmax.f32 %v257_v5, 0.0  ;;  %v885_v13 = vunpack.c.h.bf16 %v1109_v56 }
  0x2e   :  { %1136 = vst [vmem:[%s1505_s3 + $0x80] sm:$0xff] %v1013_v3   ;;  %v189_v14 = vmul.f32 %v884_v6, %v1178_v1  ;;  %v888_v15 = vunpack.c.l.bf16 %v1110_v2  ;;  %v1018_v17 = vpack.c.bf16 %v319_v8, %v318_v4  ;;  %v259_v18 = vadd.f32 %v1192_v7, %v188_v10 }
  0x2f   :  { %v322_v19 = vmax.f32 %v258_v11, 0.0  ;;  %v889_v20 = vunpack.c.h.bf16 %v1110_v2  ;;  %v1023_v22 = vpack.c.bf16 %v321_v12, %v320_v9  ;;  %v190_v23 = vmul.f32 %v885_v13, %v1178_v1  ;;  %v1117_v12 = vld [vmem:[%s1502_s0 + $0xe0] sm:$0xff]  }
  0x30   :  { %v260_v24 = vadd.f32 %v1192_v7, %v189_v14  ;;  %v191_v25 = vmul.f32 %v888_v15, %v1178_v1  ;;  %1137 = vst [vmem:[%s1505_s3 + $0x88] sm:$0xff] %v1018_v17   ;;  %v323_v26 = vmax.f32 %v259_v18, 0.0  ;;  %v892_v28 = vunpack.c.l.bf16 %v1111_v16 }
  0x31   :  { %v192_v27 = vmul.f32 %v889_v20, %v1178_v1  ;;  %v893_v29 = vunpack.c.h.bf16 %v1111_v16  ;;  %1138 = vst [vmem:[%s1505_s3 + $0x90] sm:$0xff] %v1023_v22   ;;  %v261_v30 = vadd.f32 %v1192_v7, %v190_v23  ;;  %v896_v33 = vunpack.c.l.bf16 %v1112_v21 }
  0x32   :  { %v324_v31 = vmax.f32 %v260_v24, 0.0  ;;  %v262_v32 = vadd.f32 %v1192_v7, %v191_v25  ;;  %v1028_v35 = vpack.c.bf16 %v323_v26, %v322_v19  ;;  %v193_v37 = vmul.f32 %v892_v28, %v1178_v1 }
  0x33   :  { %v263_v36 = vadd.f32 %v1192_v7, %v192_v27  ;;  %v194_v38 = vmul.f32 %v893_v29, %v1178_v1  ;;  %v325_v39 = vmax.f32 %v261_v30, 0.0  ;;  %v897_v41 = vunpack.c.h.bf16 %v1112_v21  ;;  %v1118_v21 = vld [vmem:[%s1502_s0 + $0xe8] sm:$0xff]  }
  0x34   :  { %v326_v40 = vmax.f32 %v262_v32, 0.0  ;;  %v195_v42 = vmul.f32 %v896_v33, %v1178_v1  ;;  %1139 = vst [vmem:[%s1505_s3 + $0x98] sm:$0xff] %v1028_v35   ;;  %v264_v44 = vadd.f32 %v1192_v7, %v193_v37  ;;  %v900_v46 = vunpack.c.l.bf16 %v1113_v34 }
  0x35   :  { %v327_v43 = vmax.f32 %v263_v36, 0.0  ;;  %v265_v45 = vadd.f32 %v1192_v7, %v194_v38  ;;  %v1033_v48 = vpack.c.bf16 %v325_v39, %v324_v31  ;;  %v196_v49 = vmul.f32 %v897_v41, %v1178_v1  ;;  %v1120_v39 = vld [vmem:[%s1502_s0 + $0xf8] sm:$0xff]  }
  0x36   :  { %v266_v50 = vadd.f32 %v1192_v7, %v195_v42  ;;  %v901_v51 = vunpack.c.h.bf16 %v1113_v34  ;;  %v328_v54 = vmax.f32 %v264_v44, 0.0  ;;  %v197_v56 = vmul.f32 %v900_v46, %v1178_v1  ;;  %v1119_v34 = vld [vmem:[%s1502_s0 + $0xf0] sm:$0xff]  }
  0x37   :  { %v1038_v53 = vpack.c.bf16 %v327_v43, %v326_v40  ;;  %v329_v55 = vmax.f32 %v265_v45, 0.0  ;;  %1140 = vst [vmem:[%s1505_s3 + $0xa0] sm:$0xff] %v1033_v48   ;;  %v267_v57 = vadd.f32 %v1192_v7, %v196_v49  ;;  %v904_v60 = vunpack.c.l.bf16 %v1114_v47 }
  0x38   :  { %v330_v58 = vmax.f32 %v266_v50, 0.0  ;;  %v198_v59 = vmul.f32 %v901_v51, %v1178_v1  ;;  %v268_v63 = vadd.f32 %v1192_v7, %v197_v56  ;;  %v905_v0 = vunpack.c.h.bf16 %v1114_v47 }
  0x39   :  { %1141 = vst [vmem:[%s1505_s3 + $0xa8] sm:$0xff] %v1038_v53   ;;  %v1043_v62 = vpack.c.bf16 %v329_v55, %v328_v54  ;;  %v908_v2 = vunpack.c.l.bf16 %v1115_v52  ;;  %v331_v3 = vmax.f32 %v267_v57, 0.0  ;;  %v199_v5 = vmul.f32 %v904_v60, %v1178_v1 }
  0x3a   :  { %v269_v4 = vadd.f32 %v1192_v7, %v198_v59  ;;  %v909_v6 = vunpack.c.h.bf16 %v1115_v52  ;;  %v332_v8 = vmax.f32 %v268_v63, 0.0  ;;  %v200_v9 = vmul.f32 %v905_v0, %v1178_v1 }
  0x3b   :  { %1142 = vst [vmem:[%s1505_s3 + $0xb0] sm:$0xff] %v1043_v62   ;;  %v201_v10 = vmul.f32 %v908_v2, %v1178_v1  ;;  %v912_v11 = vunpack.c.l.bf16 %v1116_v61  ;;  %v1048_v13 = vpack.c.bf16 %v331_v3, %v330_v58  ;;  %v270_v15 = vadd.f32 %v1192_v7, %v199_v5 }
  0x3c   :  { %v333_v14 = vmax.f32 %v269_v4, 0.0  ;;  %v202_v16 = vmul.f32 %v909_v6, %v1178_v1  ;;  %v271_v17 = vadd.f32 %v1192_v7, %v200_v9  ;;  %v913_v19 = vunpack.c.h.bf16 %v1116_v61 }
  0x3d   :  { %v272_v18 = vadd.f32 %v1192_v7, %v201_v10  ;;  %v203_v20 = vmul.f32 %v912_v11, %v1178_v1  ;;  %1143 = vst [vmem:[%s1505_s3 + $0xb8] sm:$0xff] %v1048_v13   ;;  %v334_v23 = vmax.f32 %v270_v15, 0.0  ;;  %v916_v25 = vunpack.c.l.bf16 %v1117_v12 }
  0x3e   :  { %v1053_v22 = vpack.c.bf16 %v333_v14, %v332_v8  ;;  %v273_v24 = vadd.f32 %v1192_v7, %v202_v16  ;;  %v335_v26 = vmax.f32 %v271_v17, 0.0  ;;  %v204_v28 = vmul.f32 %v913_v19, %v1178_v1 }
  0x3f   :  { %v336_v27 = vmax.f32 %v272_v18, 0.0  ;;  %v274_v29 = vadd.f32 %v1192_v7, %v203_v20  ;;  %v917_v31 = vunpack.c.h.bf16 %v1117_v12  ;;  %v205_v32 = vmul.f32 %v916_v25, %v1178_v1 }
  0x40   :  { %1144 = vst [vmem:[%s1505_s3 + $0xc0] sm:$0xff] %v1053_v22   ;;  %v337_v30 = vmax.f32 %v273_v24, 0.0  ;;  %v920_v33 = vunpack.c.l.bf16 %v1118_v21  ;;  %v1058_v35 = vpack.c.bf16 %v335_v26, %v334_v23  ;;  %v275_v36 = vadd.f32 %v1192_v7, %v204_v28 }
  0x41   :  { %v338_v37 = vmax.f32 %v274_v29, 0.0  ;;  %v921_v38 = vunpack.c.h.bf16 %v1118_v21  ;;  %v206_v41 = vmul.f32 %v917_v31, %v1178_v1  ;;  %v276_v42 = vadd.f32 %v1192_v7, %v205_v32 }
  0x42   :  { %v1063_v40 = vpack.c.bf16 %v337_v30, %v336_v27  ;;  %v207_v43 = vmul.f32 %v920_v33, %v1178_v1  ;;  %1145 = vst [vmem:[%s1505_s3 + $0xc8] sm:$0xff] %v1058_v35   ;;  %v339_v44 = vmax.f32 %v275_v36, 0.0  ;;  %v924_v46 = vunpack.c.l.bf16 %v1119_v34 }
  0x43   :  { %v208_v45 = vmul.f32 %v921_v38, %v1178_v1  ;;  %v925_v47 = vunpack.c.h.bf16 %v1119_v34  ;;  %v277_v48 = vadd.f32 %v1192_v7, %v206_v41  ;;  %v340_v49 = vmax.f32 %v276_v42, 0.0 }
  0x44   :  { %1146 = vst [vmem:[%s1505_s3 + $0xd0] sm:$0xff] %v1063_v40   ;;  %v278_v50 = vadd.f32 %v1192_v7, %v207_v43  ;;  %v928_v51 = vunpack.c.l.bf16 %v1120_v39  ;;  %v1068_v52 = vpack.c.bf16 %v339_v44, %v338_v37  ;;  %v209_v54 = vmul.f32 %v924_v46, %v1178_v1 }
  0x45   :  { %v279_v53 = vadd.f32 %v1192_v7, %v208_v45  ;;  %v210_v55 = vmul.f32 %v925_v47, %v1178_v1  ;;  %v341_v56 = vmax.f32 %v277_v48, 0.0  ;;  %v929_v58 = vunpack.c.h.bf16 %v1120_v39 }
  0x46   :  { %v342_v57 = vmax.f32 %v278_v50, 0.0  ;;  %v211_v59 = vmul.f32 %v928_v51, %v1178_v1  ;;  %1147 = vst [vmem:[%s1505_s3 + $0xd8] sm:$0xff] %v1068_v52   ;;  %v280_v61 = vadd.f32 %v1192_v7, %v209_v54 }
  0x47   :  { %v343_v60 = vmax.f32 %v279_v53, 0.0  ;;  %v281_v62 = vadd.f32 %v1192_v7, %v210_v55  ;;  %v1073_v63 = vpack.c.bf16 %v341_v56, %v340_v49  ;;  %v212_v0 = vmul.f32 %v929_v58, %v1178_v1 }
  0x48   :  { %v282_v2 = vadd.f32 %v1192_v7, %v211_v59  ;;  %v344_v4 = vmax.f32 %v280_v61, 0.0 }
  0x49   :  { %v1078_v3 = vpack.c.bf16 %v343_v60, %v342_v57  ;;  %v345_v5 = vmax.f32 %v281_v62, 0.0  ;;  %1148 = vst [vmem:[%s1505_s3 + $0xe0] sm:$0xff] %v1073_v63   ;;  %v283_v6 = vadd.f32 %v1192_v7, %v212_v0 }
  0x4a   :  { %v346_v8 = vmax.f32 %v282_v2, 0.0 }
  0x4b   :  { %1149 = vst [vmem:[%s1505_s3 + $0xe8] sm:$0xff] %v1078_v3   ;;  %v1083_v9 = vpack.c.bf16 %v345_v5, %v344_v4  ;;  %v347_v10 = vmax.f32 %v283_v6, 0.0 }
  0x4d   :  { %1150 = vst [vmem:[%s1505_s3 + $0xf0] sm:$0xff] %v1083_v9   ;;  %v1088_v1 = vpack.c.bf16 %v347_v10, %v346_v8 }
  0x4f   :  { %1151 = vst [vmem:[%s1505_s3 + $0xf8] sm:$0xff] %v1088_v1  }

// kernel: bottleneck_forward.6
= control target key start
LH: loop header
LB: loop body
LE: loop exit
PB: predicated region body
PF: predicated region fallthrough
CT: control target
= control target key end

     0   :  { %vm271_vm0 = vcmask 523264   ;;  %s2243_s1 = inlined_call_operand.vmem [shape: bf16[64,128], index: 1, kind: input, shape index: {}]   ;;  %s2244_s0 = inlined_call_operand.vmem [shape: bf16[512,64], index: 0, kind: input, shape index: {}]   ;;  %s2245_s2 = inlined_call_operand.vmem [shape: bf16[512,128], index: 2, kind: output, shape index: {0}]   ;;  %s2246_s3 = inlined_call_operand.vmem [shape: f32[1,1,128], index: 3, kind: output, shape index: {1}]   ;;  %s2247_s4 = inlined_call_operand.vmem [shape: f32[1,1,128], index: 4, kind: output, shape index: {2}]  }
   0x1   :  { %v1782_v0 = vld [vmem:[%s2243_s1] sm:$0xff]   ;;  %v1783_v1 = vld [vmem:[%s2243_s1 + $0x8] sm:$0xff]   ;;  %v1784_v2 = vld [vmem:[%s2243_s1 + $0x10] sm:$0xff]  }
   0x2   :  { %1702 = vmatprep.subr.bf16.mxu0 %v1782_v0  ;;  %1774 = vmatprep.subr.bf16.mxu1 %v1782_v0  ;;  %v1786_v3 = vld [vmem:[%s2244_s0] sm:$0xff]   ;;  %v1785_v5 = vld [vmem:[%s2243_s1 + $0x18] sm:$0xff]   ;;  %v1788_v6 = vld [vmem:[%s2244_s0 + $0x8] sm:$0xff]  }
   0x3   :  { %1703 = vmatpush3.bf16.msra.mxu0 %v1782_v0  ;;  %1778 = vmatpush3.bf16.msra.mxu1 %v1782_v0  ;;  %v1787_v4 = vld [vmem:[%s2244_s0 + $0x80] sm:$0xff]   ;;  %v1789_v7 = vld [vmem:[%s2244_s0 + $0x88] sm:$0xff]   ;;  %v1790_v8 = vld [vmem:[%s2244_s0 + $0x10] sm:$0xff]  }
   0x4   :  { %1704 = vmatprep.subr.bf16.mxu0 %v1783_v1  ;;  %1775 = vmatprep.subr.bf16.mxu1 %v1783_v1  ;;  %v1791_v9 = vld [vmem:[%s2244_s0 + $0x90] sm:$0xff]   ;;  %v1792_v10 = vld [vmem:[%s2244_s0 + $0x18] sm:$0xff]   ;;  %v1794_v12 = vld [vmem:[%s2244_s0 + $0x20] sm:$0xff]  }
   0x5   :  { %1710 = vmatprep.mubr.msk.bf16.mxu0 %vm271_vm0, %v1786_v3  ;;  %1742 = vmatprep.mubr.msk.bf16.mxu1 %vm271_vm0, %v1787_v4  ;;  %v1793_v11 = vld [vmem:[%s2244_s0 + $0x98] sm:$0xff]   ;;  %v1795_v13 = vld [vmem:[%s2244_s0 + $0xa0] sm:$0xff]   ;;  %v1796_v14 = vld [vmem:[%s2244_s0 + $0x28] sm:$0xff]  }
   0x6   :  { %v1797_v15 = vld [vmem:[%s2244_s0 + $0xa8] sm:$0xff]   ;;  %v1798_v16 = vld [vmem:[%s2244_s0 + $0x30] sm:$0xff]   ;;  %v1800_v18 = vld [vmem:[%s2244_s0 + $0x38] sm:$0xff]  }
   0x7   :  { %1705 = vmatpush3.bf16.msra.mxu0 %v1783_v1  ;;  %1779 = vmatpush3.bf16.msra.mxu1 %v1783_v1  ;;  %v1799_v17 = vld [vmem:[%s2244_s0 + $0xb0] sm:$0xff]   ;;  %v1801_v19 = vld [vmem:[%s2244_s0 + $0xb8] sm:$0xff]   ;;  %v1802_v20 = vld [vmem:[%s2244_s0 + $0x40] sm:$0xff]  }
   0x8   :  { %1706 = vmatprep.subr.bf16.mxu0 %v1784_v2  ;;  %1776 = vmatprep.subr.bf16.mxu1 %v1784_v2  ;;  %v1803_v21 = vld [vmem:[%s2244_s0 + $0xc0] sm:$0xff]   ;;  %v1804_v22 = vld [vmem:[%s2244_s0 + $0x48] sm:$0xff]   ;;  %v1806_v24 = vld [vmem:[%s2244_s0 + $0x50] sm:$0xff]  }
   0x9   :  { %v1805_v23 = vld [vmem:[%s2244_s0 + $0xc8] sm:$0xff]   ;;  %v1807_v25 = vld [vmem:[%s2244_s0 + $0xd0] sm:$0xff]   ;;  %v1808_v26 = vld [vmem:[%s2244_s0 + $0x58] sm:$0xff]  }
   0xa   :  { %v1809_v27 = vld [vmem:[%s2244_s0 + $0xd8] sm:$0xff]   ;;  %v1810_v28 = vld [vmem:[%s2244_s0 + $0x60] sm:$0xff]   ;;  %v1812_v30 = vld [vmem:[%s2244_s0 + $0x68] sm:$0xff]  }
   0xb   :  { %1707 = vmatpush3.bf16.msra.mxu0 %v1784_v2  ;;  %1780 = vmatpush3.bf16.msra.mxu1 %v1784_v2  ;;  %v1811_v29 = vld [vmem:[%s2244_s0 + $0xe0] sm:$0xff]   ;;  %v1813_v31 = vld [vmem:[%s2244_s0 + $0xe8] sm:$0xff]   ;;  %v1814_v32 = vld [vmem:[%s2244_s0 + $0x70] sm:$0xff]  }
   0xc   :  { %1708 = vmatprep.subr.bf16.mxu0 %v1785_v5  ;;  %1777 = vmatprep.subr.bf16.mxu1 %v1785_v5  ;;  %v1815_v33 = vld [vmem:[%s2244_s0 + $0xf0] sm:$0xff]   ;;  %v1816_v34 = vld [vmem:[%s2244_s0 + $0x78] sm:$0xff]  }
   0xd   :  { %v1817_v35 = vld [vmem:[%s2244_s0 + $0xf8] sm:$0xff]  }
   0xf   :  { %1709 = vmatpush3.bf16.msra.mxu0 %v1785_v5  ;;  %1781 = vmatpush3.bf16.msra.mxu1 %v1785_v5 }
  0x12   :  { %1711 = vmatmul.mubr.msk.bf16.vlgmr.msra.gmra.mrb[0].mxu0 %vm271_vm0, %v1788_v6  ;;  %1743 = vmatmul.mubr.msk.bf16.vlgmr.msra.gmra.mrb[0].mxu1 %vm271_vm0, %v1789_v7 }
  0x13   :  { %1714 = vmatprep.mubr.msk.bf16.mxu0 %vm271_vm0, %v1790_v8  ;;  %1746 = vmatprep.mubr.msk.bf16.mxu1 %vm271_vm0, %v1791_v9 }
  0x1a   :  { %1715 = vmatmul.mubr.msk.bf16.gmra.mrb[4].mxu0 %vm271_vm0, %v1792_v10  ;;  %1747 = vmatmul.mubr.msk.bf16.gmra.mrb[4].mxu1 %vm271_vm0, %v1793_v11 }
  0x1b   :  { %1718 = vmatprep.mubr.msk.bf16.mxu0 %vm271_vm0, %v1794_v12  ;;  %1750 = vmatprep.mubr.msk.bf16.mxu1 %vm271_vm0, %v1795_v13 }
  0x22   :  { %1719 = vmatmul.mubr.msk.bf16.gmra.mrb[8].mxu0 %vm271_vm0, %v1796_v14  ;;  %1751 = vmatmul.mubr.msk.bf16.gmra.mrb[8].mxu1 %vm271_vm0, %v1797_v15 }
  0x23   :  { %1722 = vmatprep.mubr.msk.bf16.mxu0 %vm271_vm0, %v1798_v16  ;;  %1754 = vmatprep.mubr.msk.bf16.mxu1 %vm271_vm0, %v1799_v17 }
  0x2a   :  { %1723 = vmatmul.mubr.msk.bf16.gmra.mrb[12].mxu0 %vm271_vm0, %v1800_v18  ;;  %1755 = vmatmul.mubr.msk.bf16.gmra.mrb[12].mxu1 %vm271_vm0, %v1801_v19 }
  0x2b   :  { %1726 = vmatprep.mubr.msk.bf16.mxu0 %vm271_vm0, %v1802_v20  ;;  %1758 = vmatprep.mubr.msk.bf16.mxu1 %vm271_vm0, %v1803_v21 }
  0x32   :  { %1727 = vmatmul.mubr.msk.bf16.gmra.mrb[16].mxu0 %vm271_vm0, %v1804_v22  ;;  %1759 = vmatmul.mubr.msk.bf16.gmra.mrb[16].mxu1 %vm271_vm0, %v1805_v23 }
  0x33   :  { %1730 = vmatprep.mubr.msk.bf16.mxu0 %vm271_vm0, %v1806_v24  ;;  %1762 = vmatprep.mubr.msk.bf16.mxu1 %vm271_vm0, %v1807_v25 }
  0x3a   :  { %1731 = vmatmul.mubr.msk.bf16.gmra.mrb[20].mxu0 %vm271_vm0, %v1808_v26  ;;  %1763 = vmatmul.mubr.msk.bf16.gmra.mrb[20].mxu1 %vm271_vm0, %v1809_v27 }
  0x3b   :  { %1734 = vmatprep.mubr.msk.bf16.mxu0 %vm271_vm0, %v1810_v28  ;;  %1766 = vmatprep.mubr.msk.bf16.mxu1 %vm271_vm0, %v1811_v29 }
  0x42   :  { %1735 = vmatmul.mubr.msk.bf16.gmra.mrb[24].mxu0 %vm271_vm0, %v1812_v30  ;;  %1767 = vmatmul.mubr.msk.bf16.gmra.mrb[24].mxu1 %vm271_vm0, %v1813_v31 }
  0x43   :  { %1738 = vmatprep.mubr.msk.bf16.mxu0 %vm271_vm0, %v1814_v32  ;;  %1770 = vmatprep.mubr.msk.bf16.mxu1 %vm271_vm0, %v1815_v33 }
  0x4a   :  { %1739 = vmatmul.mubr.msk.bf16.gmra.mrb[28].mxu0 %vm271_vm0, %v1816_v34  ;;  %1771 = vmatmul.mubr.msk.bf16.gmra.mrb[28].mxu1 %vm271_vm0, %v1817_v35 }
  0xe5   :  { %v1712_v36 = vpop.f32.mrb[0].mxu0  ;;  %v1744_v37 = vpop.f32.mrb[0].mxu1 }
  0xe6   :  { %v402_v38 = vpop.f32.mrb[1].mxu0  ;;  %v530_v39 = vpop.f32.mrb[1].mxu1  ;;  %v1137_v52 = vmul.f32 %v1744_v37, %v1744_v37  ;;  %v993_v55 = vmul.f32 %v1712_v36, %v1712_v36 }
  0xe7   :  { %v1713_v40 = vpop.f32.mrb[2].mxu0  ;;  %v1745_v41 = vpop.f32.mrb[2].mxu1  ;;  %v991_v42 = vmul.f32 %v402_v38, %v402_v38  ;;  %v1135_v43 = vmul.f32 %v530_v39, %v530_v39 }
  0xe8   :  { %v1483_v44 = vpack.c.bf16 %v1713_v40, %v1712_v36  ;;  %v1563_v45 = vpack.c.bf16 %v1745_v41, %v1744_v37  ;;  %v405_v46 = vpop.f32.mrb[3].mxu0  ;;  %v533_v47 = vpop.f32.mrb[3].mxu1  ;;  %v1138_v58 = vmul.f32 %v1745_v41, %v1745_v41  ;;  %v994_v61 = vmul.f32 %v1713_v40, %v1713_v40 }
  0xe9   :  { %v1478_v48 = vpack.c.bf16 %v405_v46, %v402_v38  ;;  %v977_v49 = vadd.f32 %v405_v46, %v402_v38  ;;  %v992_v50 = vmul.f32 %v405_v46, %v405_v46  ;;  %v1558_v51 = vpack.c.bf16 %v533_v47, %v530_v39 }
  0xea   :  { %1635 = vst [vmem:[%s2245_s2 + $0x8] sm:$0xff] %v1483_v44   ;;  %1651 = vst [vmem:[%s2245_s2 + $0x88] sm:$0xff] %v1563_v45   ;;  %v1121_v53 = vadd.f32 %v533_v47, %v530_v39  ;;  %v1136_v54 = vmul.f32 %v533_v47, %v533_v47 }
  0xeb   :  { %1479 = vst [vmem:[%s2245_s2] sm:$0xff] %v1478_v48   ;;  %v978_v56 = vadd.f32 %v1712_v36, %v977_v49  ;;  %v999_v57 = vadd.f32 %v992_v50, %v991_v42  ;;  %1650 = vst [vmem:[%s2245_s2 + $0x80] sm:$0xff] %v1558_v51  }
  0xec   :  { %v1122_v59 = vadd.f32 %v1744_v37, %v1121_v53  ;;  %v1143_v60 = vadd.f32 %v1136_v54, %v1135_v43 }
  0xed   :  { %v1000_v62 = vadd.f32 %v999_v57, %v993_v55  ;;  %v1716_v63 = vpop.f32.mrb[4].mxu0  ;;  %v1748_v0 = vpop.f32.mrb[4].mxu1  ;;  %v979_v1 = vadd.f32 %v1713_v40, %v978_v56 }
  0xee   :  { %v1144_v2 = vadd.f32 %v1143_v60, %v1137_v52  ;;  %v418_v3 = vpop.f32.mrb[5].mxu0  ;;  %v546_v4 = vpop.f32.mrb[5].mxu1  ;;  %v1123_v5 = vadd.f32 %v1745_v41, %v1122_v59  ;;  %v1141_v24 = vmul.f32 %v1748_v0, %v1748_v0  ;;  %v997_v27 = vmul.f32 %v1716_v63, %v1716_v63 }
  0xef   :  { %v980_v6 = vadd.f32 %v979_v1, %v418_v3  ;;  %v995_v7 = vmul.f32 %v418_v3, %v418_v3  ;;  %v1001_v8 = vadd.f32 %v1000_v62, %v994_v61  ;;  %v1139_v9 = vmul.f32 %v546_v4, %v546_v4  ;;  %v1717_v10 = vpop.f32.mrb[6].mxu0  ;;  %v1749_v11 = vpop.f32.mrb[6].mxu1 }
  0xf0   :  { %v1124_v12 = vadd.f32 %v1123_v5, %v546_v4  ;;  %v1145_v13 = vadd.f32 %v1144_v2, %v1138_v58  ;;  %v1493_v14 = vpack.c.bf16 %v1717_v10, %v1716_v63  ;;  %v421_v15 = vpop.f32.mrb[7].mxu0  ;;  %v549_v16 = vpop.f32.mrb[7].mxu1  ;;  %v1573_v18 = vpack.c.bf16 %v1749_v11, %v1748_v0 }
  0xf1   :  { %v1002_v17 = vadd.f32 %v1001_v8, %v995_v7  ;;  %v1488_v19 = vpack.c.bf16 %v421_v15, %v418_v3  ;;  %v981_v21 = vadd.f32 %v980_v6, %v421_v15  ;;  %v996_v22 = vmul.f32 %v421_v15, %v421_v15 }
  0xf2   :  { %v1146_v20 = vadd.f32 %v1145_v13, %v1139_v9  ;;  %1637 = vst [vmem:[%s2245_s2 + $0x18] sm:$0xff] %v1493_v14   ;;  %v1568_v23 = vpack.c.bf16 %v549_v16, %v546_v4  ;;  %1653 = vst [vmem:[%s2245_s2 + $0x98] sm:$0xff] %v1573_v18   ;;  %v1125_v25 = vadd.f32 %v1124_v12, %v549_v16 }
  0xf3   :  { %1636 = vst [vmem:[%s2245_s2 + $0x10] sm:$0xff] %v1488_v19   ;;  %v1140_v26 = vmul.f32 %v549_v16, %v549_v16  ;;  %v982_v28 = vadd.f32 %v1716_v63, %v981_v21  ;;  %v1003_v29 = vadd.f32 %v1002_v17, %v996_v22  ;;  %v1142_v30 = vmul.f32 %v1749_v11, %v1749_v11 }
  0xf4   :  { %1652 = vst [vmem:[%s2245_s2 + $0x90] sm:$0xff] %v1568_v23   ;;  %v1126_v31 = vadd.f32 %v1748_v0, %v1125_v25  ;;  %v998_v35 = vmul.f32 %v1717_v10, %v1717_v10 }
  0xf5   :  { %v1147_v32 = vadd.f32 %v1146_v20, %v1140_v26  ;;  %v1720_v33 = vpop.f32.mrb[8].mxu0  ;;  %v1752_v34 = vpop.f32.mrb[8].mxu1  ;;  %v983_v36 = vadd.f32 %v1717_v10, %v982_v28  ;;  %v1004_v37 = vadd.f32 %v1003_v29, %v997_v27 }
  0xf6   :  { %v434_v38 = vpop.f32.mrb[9].mxu0  ;;  %v562_v39 = vpop.f32.mrb[9].mxu1  ;;  %v2007_v40 = vadd.f32 %v1749_v11, %v1126_v31  ;;  %v1029_v57 = vmul.f32 %v1720_v33, %v1720_v33  ;;  %v1173_v61 = vmul.f32 %v1752_v34, %v1752_v34 }
  0xf7   :  { %v1148_v41 = vadd.f32 %v1147_v32, %v1141_v24  ;;  %v1721_v42 = vpop.f32.mrb[10].mxu0  ;;  %v1753_v43 = vpop.f32.mrb[10].mxu1  ;;  %v1005_v44 = vadd.f32 %v1004_v37, %v998_v35  ;;  %v984_v48 = vrot.slane %v983_v36, 4  ;;  %v1027_v53 = vmul.f32 %v434_v38, %v434_v38 }
  0xf8   :  { %v1503_v45 = vpack.c.bf16 %v1721_v42, %v1720_v33  ;;  %v437_v46 = vpop.f32.mrb[11].mxu0  ;;  %v565_v47 = vpop.f32.mrb[11].mxu1  ;;  %v1583_v50 = vpack.c.bf16 %v1753_v43, %v1752_v34  ;;  %v1171_v54 = vmul.f32 %v562_v39, %v562_v39  ;;  %v1030_v10 = vmul.f32 %v1721_v42, %v1721_v42 }
  0xf9   :  { %v2009_v49 = vadd.f32 %v1148_v41, %v1142_v30  ;;  %v1498_v51 = vpack.c.bf16 %v437_v46, %v434_v38  ;;  %v1013_v52 = vadd.f32 %v437_v46, %v434_v38  ;;  %v1028_v55 = vmul.f32 %v437_v46, %v437_v46 }
  0xfa   :  { %1639 = vst [vmem:[%s2245_s2 + $0x28] sm:$0xff] %v1503_v45   ;;  %1655 = vst [vmem:[%s2245_s2 + $0xa8] sm:$0xff] %v1583_v50   ;;  %v1578_v56 = vpack.c.bf16 %v565_v47, %v562_v39  ;;  %v1157_v59 = vadd.f32 %v565_v47, %v562_v39  ;;  %v985_v60 = vadd.f32 %v984_v48, %v983_v36  ;;  %v1006_v9 = vrot.slane %v1005_v44, 4 }
  0xfb   :  { %1638 = vst [vmem:[%s2245_s2 + $0x20] sm:$0xff] %v1498_v51   ;;  %v1014_v58 = vadd.f32 %v1720_v33, %v1013_v52  ;;  %v1035_v62 = vadd.f32 %v1028_v55, %v1027_v53  ;;  %v1172_v63 = vmul.f32 %v565_v47, %v565_v47  ;;  %v1174_v11 = vmul.f32 %v1753_v43, %v1753_v43 }
  0xfc   :  { %1654 = vst [vmem:[%s2245_s2 + $0xa0] sm:$0xff] %v1578_v56   ;;  %v1158_v2 = vadd.f32 %v1752_v34, %v1157_v59  ;;  %v986_v15 = vrot.slane %v985_v60, 2  ;;  %v2023_v22 = vadd.f32 %v1006_v9, %v1005_v44 }
  0xfd   :  { %v1724_v0 = vpop.f32.mrb[12].mxu0  ;;  %v1756_v1 = vpop.f32.mrb[12].mxu1  ;;  %v1036_v5 = vadd.f32 %v1035_v62, %v1029_v57  ;;  %v1179_v6 = vadd.f32 %v1172_v63, %v1171_v54  ;;  %v1015_v12 = vadd.f32 %v1721_v42, %v1014_v58 }
  0xfe   :  { %v450_v3 = vpop.f32.mrb[13].mxu0  ;;  %v578_v4 = vpop.f32.mrb[13].mxu1  ;;  %v1159_v20 = vadd.f32 %v1753_v43, %v1158_v2  ;;  %v2025_v26 = vadd.f32 %v986_v15, %v985_v60  ;;  %v1177_v31 = vmul.f32 %v1756_v1, %v1756_v1  ;;  %v1008_v44 = vrot.slane %v2023_v22, 2 }
  0xff   :  { %v1725_v7 = vpop.f32.mrb[14].mxu0  ;;  %v1757_v8 = vpop.f32.mrb[14].mxu1  ;;  %v1180_v16 = vadd.f32 %v1179_v6, %v1173_v61  ;;  %v1031_v17 = vmul.f32 %v450_v3, %v450_v3  ;;  %v1016_v18 = vadd.f32 %v1015_v12, %v450_v3  ;;  %v1037_v19 = vadd.f32 %v1036_v5, %v1030_v10 }
 0x100   :  { %v453_v13 = vpop.f32.mrb[15].mxu0  ;;  %v581_v14 = vpop.f32.mrb[15].mxu1  ;;  %v1175_v21 = vmul.f32 %v578_v4, %v578_v4  ;;  %v1513_v25 = vpack.c.bf16 %v1725_v7, %v1724_v0  ;;  %v1160_v27 = vadd.f32 %v1159_v20, %v578_v4  ;;  %v1593_v28 = vpack.c.bf16 %v1757_v8, %v1756_v1 }
 0x101   :  { %v1038_v23 = vadd.f32 %v1037_v19, %v1031_v17  ;;  %v1181_v24 = vadd.f32 %v1180_v16, %v1174_v11  ;;  %v1508_v33 = vpack.c.bf16 %v453_v13, %v450_v3  ;;  %v1017_v34 = vadd.f32 %v1016_v18, %v453_v13 }
 0x102   :  { %1641 = vst [vmem:[%s2245_s2 + $0x38] sm:$0xff] %v1513_v25   ;;  %1657 = vst [vmem:[%s2245_s2 + $0xb8] sm:$0xff] %v1593_v28   ;;  %v1032_v37 = vmul.f32 %v453_v13, %v453_v13  ;;  %v1588_v38 = vpack.c.bf16 %v581_v14, %v578_v4  ;;  %v1161_v39 = vadd.f32 %v1160_v27, %v581_v14  ;;  %v988_v20 = vrot.slane %v2025_v26, 1 }
 0x103   :  { %v1182_v32 = vadd.f32 %v1181_v24, %v1175_v21  ;;  %v1176_v41 = vmul.f32 %v581_v14, %v581_v14  ;;  %v1033_v45 = vmul.f32 %v1724_v0, %v1724_v0  ;;  %v1034_v46 = vmul.f32 %v1725_v7, %v1725_v7  ;;  %1640 = vst [vmem:[%s2245_s2 + $0x30] sm:$0xff] %v1508_v33  }
 0x104   :  { %v1018_v47 = vadd.f32 %v1724_v0, %v1017_v34  ;;  %v1178_v51 = vmul.f32 %v1757_v8, %v1757_v8  ;;  %v1039_v52 = vadd.f32 %v1038_v23, %v1032_v37  ;;  %1656 = vst [vmem:[%s2245_s2 + $0xb0] sm:$0xff] %v1588_v38   ;;  %v1162_v53 = vadd.f32 %v1756_v1, %v1161_v39 }
 0x105   :  { %v1728_v29 = vpop.f32.mrb[16].mxu0  ;;  %v2027_v30 = vpop.f32.mrb[16].mxu1  ;;  %v1183_v54 = vadd.f32 %v1182_v32, %v1176_v41  ;;  %v1009_v28 = vadd.f32 %v1008_v44, %v2023_v22 }
 0x106   :  { %v466_v35 = vpop.f32.mrb[17].mxu0  ;;  %v594_v36 = vpop.f32.mrb[17].mxu1  ;;  %v1019_v55 = vadd.f32 %v1725_v7, %v1018_v47  ;;  %v1065_v56 = vmul.f32 %v1728_v29, %v1728_v29  ;;  %v1040_v59 = vadd.f32 %v1039_v52, %v1033_v45  ;;  %v2046_v60 = vadd.f32 %v1757_v8, %v1162_v53 }
 0x107   :  { %v1729_v42 = vpop.f32.mrb[18].mxu0  ;;  %v2035_v43 = vpop.f32.mrb[18].mxu1  ;;  %v1184_v61 = vadd.f32 %v1183_v54, %v1177_v31  ;;  %v1063_v62 = vmul.f32 %v466_v35, %v466_v35  ;;  %v1207_v5 = vmul.f32 %v594_v36, %v594_v36  ;;  %v1209_v16 = vmul.f32 %v2027_v30, %v2027_v30 }
 0x108   :  { %v469_v48 = vpop.f32.mrb[19].mxu0  ;;  %v597_v50 = vpop.f32.mrb[19].mxu1  ;;  %v1523_v57 = vpack.c.bf16 %v1729_v42, %v1728_v29  ;;  %v1603_v58 = vpack.c.bf16 %v2035_v43, %v2027_v30  ;;  %v1020_v63 = vrot.slane %v1019_v55, 4  ;;  %v1041_v3 = vadd.f32 %v1040_v59, %v1034_v46 }
 0x109   :  { %v1518_v0 = vpack.c.bf16 %v469_v48, %v466_v35  ;;  %v1049_v1 = vadd.f32 %v469_v48, %v466_v35  ;;  %v1064_v2 = vmul.f32 %v469_v48, %v469_v48  ;;  %v2054_v4 = vadd.f32 %v1184_v61, %v1178_v51 }
 0x10a   :  { %1643 = vst [vmem:[%s2245_s2 + $0x48] sm:$0xff] %v1523_v57   ;;  %1659 = vst [vmem:[%s2245_s2 + $0xc8] sm:$0xff] %v1603_v58   ;;  %v1598_v6 = vpack.c.bf16 %v597_v50, %v594_v36  ;;  %v1021_v9 = vadd.f32 %v1020_v63, %v1019_v55  ;;  %v1193_v12 = vadd.f32 %v597_v50, %v594_v36  ;;  %v1042_v15 = vrot.slane %v1041_v3, 4 }
 0x10b   :  { %1642 = vst [vmem:[%s2245_s2 + $0x40] sm:$0xff] %v1518_v0   ;;  %v1050_v10 = vadd.f32 %v1728_v29, %v1049_v1  ;;  %v1071_v11 = vadd.f32 %v1064_v2, %v1063_v62  ;;  %v1208_v17 = vmul.f32 %v597_v50, %v597_v50  ;;  %v1066_v31 = vmul.f32 %v1729_v42, %v1729_v42 }
 0x10c   :  { %1658 = vst [vmem:[%s2245_s2 + $0xc0] sm:$0xff] %v1598_v6   ;;  %v1022_v21 = vrot.slane %v1021_v9, 2  ;;  %v1194_v24 = vadd.f32 %v2027_v30, %v1193_v12  ;;  %v1043_v29 = vadd.f32 %v1042_v15, %v1041_v3  ;;  %v1210_v34 = vmul.f32 %v2035_v43, %v2035_v43 }
 0x10d   :  { %v2056_v7 = vpop.f32.mrb[20].mxu0  ;;  %v2058_v8 = vpop.f32.mrb[20].mxu1  ;;  %v1072_v23 = vadd.f32 %v1071_v11, %v1065_v56  ;;  %v1215_v32 = vadd.f32 %v1208_v17, %v1207_v5  ;;  %v1051_v35 = vadd.f32 %v1729_v42, %v1050_v10  ;;  %v989_v46 = vadd.f32 %v988_v20, %v2025_v26 }
 0x10e   :  { %v482_v13 = vpop.f32.mrb[21].mxu0  ;;  %v2063_v14 = vpop.f32.mrb[21].mxu1  ;;  %v1023_v33 = vadd.f32 %v1022_v21, %v1021_v9  ;;  %v1044_v37 = vrot.slane %v1043_v29, 2  ;;  %v1195_v30 = vadd.f32 %v2035_v43, %v1194_v24  ;;  %v1010_v47 = vrot.slane %v1009_v28, 1 }
 0x10f   :  { %v2070_v18 = vpop.f32.mrb[22].mxu0  ;;  %v2072_v19 = vpop.f32.mrb[22].mxu1  ;;  %v1067_v36 = vmul.f32 %v482_v13, %v482_v13  ;;  %v1216_v38 = vadd.f32 %v1215_v32, %v1209_v16  ;;  %v1052_v41 = vadd.f32 %v1051_v35, %v482_v13  ;;  %v1073_v45 = vadd.f32 %v1072_v23, %v1066_v31 }
 0x110   :  { %v485_v25 = vpop.f32.mrb[23].mxu0  ;;  %v613_v27 = vpop.f32.mrb[23].mxu1  ;;  %v1024_v39 = vrot.slane %v1023_v33, 1  ;;  %v1045_v22 = vadd.f32 %v1044_v37, %v1043_v29  ;;  %v1211_v44 = vmul.f32 %v2063_v14, %v2063_v14  ;;  %v1196_v52 = vadd.f32 %v1195_v30, %v2063_v14 }
 0x111   :  { %v1074_v51 = vadd.f32 %v1073_v45, %v1067_v36  ;;  %v1217_v53 = vadd.f32 %v1216_v38, %v1210_v34  ;;  %v1533_v26 = vpack.c.bf16 %v2070_v18, %v2056_v7  ;;  %v1613_v61 = vpack.c.bf16 %v2072_v19, %v2058_v8 }
 0x112   :  { %v1025_v42 = vadd.f32 %v1024_v39, %v1023_v33  ;;  %v1046_v43 = vrot.slane %v1045_v22, 1  ;;  %v1011_v0 = vadd.f32 %v1010_v47, %v1009_v28  ;;  %v1528_v2 = vpack.c.bf16 %v485_v25, %v482_v13 }
 0x113   :  { %v1218_v59 = vadd.f32 %v1217_v53, %v1211_v44  ;;  %1645 = vst [vmem:[%s2245_s2 + $0x58] sm:$0xff] %v1533_v26   ;;  %1661 = vst [vmem:[%s2245_s2 + $0xd8] sm:$0xff] %v1613_v61   ;;  %v1053_v3 = vadd.f32 %v1052_v41, %v485_v25  ;;  %v1068_v5 = vmul.f32 %v485_v25, %v485_v25 }
 0x114   :  { %v2096_v58 = vadd.f32 %v1025_v42, %v989_v46  ;;  %v1047_v1 = vadd.f32 %v1046_v43, %v1045_v22  ;;  %v1608_v6 = vpack.c.bf16 %v613_v27, %v2063_v14  ;;  %v1197_v9 = vadd.f32 %v1196_v52, %v613_v27  ;;  %1644 = vst [vmem:[%s2245_s2 + $0x50] sm:$0xff] %v1528_v2  }
 0x115   :  { %v2083_v48 = vpop.f32.mrb[24].mxu0  ;;  %v2085_v50 = vpop.f32.mrb[24].mxu1  ;;  %v1213_v11 = vmul.f32 %v2058_v8, %v2058_v8  ;;  %v1212_v12 = vmul.f32 %v613_v27, %v613_v27  ;;  %v1069_v13 = vmul.f32 %v2056_v7, %v2056_v7  ;;  %v1054_v15 = vadd.f32 %v2056_v7, %v1053_v3 }
 0x116   :  { %v498_v54 = vpop.f32.mrb[25].mxu0  ;;  %v2088_v55 = vpop.f32.mrb[25].mxu1  ;;  %v2107_v10 = vadd.f32 %v1047_v1, %v1011_v0  ;;  %v1075_v16 = vadd.f32 %v1074_v51, %v1068_v5  ;;  %1660 = vst [vmem:[%s2245_s2 + $0xd0] sm:$0xff] %v1608_v6   ;;  %v1198_v14 = vadd.f32 %v2058_v8, %v1197_v9  ;;  %v1070_v17 = vmul.f32 %v2070_v18, %v2070_v18 }
 0x117   :  { %v2092_v56 = vpop.f32.mrb[26].mxu0  ;;  %v2094_v57 = vpop.f32.mrb[26].mxu1  ;;  %v1214_v20 = vmul.f32 %v2072_v19, %v2072_v19  ;;  %v1219_v21 = vadd.f32 %v1218_v59, %v1212_v12  ;;  %v1055_v25 = vadd.f32 %v2070_v18, %v1054_v15  ;;  %v1099_v33 = vmul.f32 %v498_v54, %v498_v54 }
 0x118   :  { %v501_v62 = vpop.f32.mrb[27].mxu0  ;;  %v629_v63 = vpop.f32.mrb[27].mxu1  ;;  %v1543_v23 = vpack.c.bf16 %v2092_v56, %v2083_v48  ;;  %v1076_v27 = vadd.f32 %v1075_v16, %v1069_v13  ;;  %v2133_v28 = vadd.f32 %v2072_v19, %v1198_v14  ;;  %v1623_v8 = vpack.c.bf16 %v2094_v57, %v2085_v50 }
 0x119   :  { %v1220_v32 = vadd.f32 %v1219_v21, %v1213_v11  ;;  %v1538_v34 = vpack.c.bf16 %v501_v62, %v498_v54  ;;  %v1085_v35 = vadd.f32 %v501_v62, %v498_v54  ;;  %v1056_v19 = vrot.slane %v1055_v25, 4 }
 0x11a   :  { %1647 = vst [vmem:[%s2245_s2 + $0x68] sm:$0xff] %v1543_v23   ;;  %v1077_v37 = vadd.f32 %v1076_v27, %v1070_v17  ;;  %v1243_v38 = vmul.f32 %v2088_v55, %v2088_v55  ;;  %1663 = vst [vmem:[%s2245_s2 + $0xe8] sm:$0xff] %v1623_v8   ;;  %v1100_v39 = vmul.f32 %v501_v62, %v501_v62  ;;  %v1128_v1 = vrot.slane %v2007_v40, 4 }
 0x11b   :  { %v2155_v30 = vadd.f32 %v1220_v32, %v1214_v20  ;;  %1646 = vst [vmem:[%s2245_s2 + $0x60] sm:$0xff] %v1538_v34   ;;  %v1086_v46 = vadd.f32 %v2083_v48, %v1085_v35  ;;  %v1618_v47 = vpack.c.bf16 %v629_v63, %v2088_v55  ;;  %v1229_v22 = vadd.f32 %v629_v63, %v2088_v55 }
 0x11c   :  { %v1057_v44 = vadd.f32 %v1056_v19, %v1055_v25  ;;  %v1078_v42 = vrot.slane %v1077_v37, 4  ;;  %v1101_v51 = vmul.f32 %v2083_v48, %v2083_v48  ;;  %v1107_v52 = vadd.f32 %v1100_v39, %v1099_v33 }
 0x11d   :  { %v2127_v24 = vpop.f32.mrb[28].mxu0  ;;  %v2129_v7 = vpop.f32.mrb[28].mxu1  ;;  %v1245_v53 = vmul.f32 %v2085_v50, %v2085_v50  ;;  %1662 = vst [vmem:[%s2245_s2 + $0xe0] sm:$0xff] %v1618_v47   ;;  %v1230_v54 = vadd.f32 %v2085_v50, %v1229_v22  ;;  %v1244_v43 = vmul.f32 %v629_v63, %v629_v63  ;;  %v1102_v55 = vmul.f32 %v2092_v56, %v2092_v56 }
 0x11e   :  { %v2137_v29 = vpop.f32.mrb[29].mxu0  ;;  %v2139_v31 = vpop.f32.mrb[29].mxu1  ;;  %v1058_v26 = vrot.slane %v1057_v44, 2  ;;  %v1079_v59 = vadd.f32 %v1078_v42, %v1077_v37  ;;  %v1108_v61 = vadd.f32 %v1107_v52, %v1101_v51  ;;  %v1246_v48 = vmul.f32 %v2094_v57, %v2094_v57 }
 0x11f   :  { %v2144_v18 = vpop.f32.mrb[30].mxu0  ;;  %v2146_v36 = vpop.f32.mrb[30].mxu1  ;;  %v1251_v62 = vadd.f32 %v1244_v43, %v1243_v38  ;;  %v1087_v0 = vadd.f32 %v2092_v56, %v1086_v46  ;;  %v1103_v50 = vmul.f32 %v2137_v29, %v2137_v29  ;;  %v1150_v63 = vrot.slane %v2009_v49, 4 }
 0x120   :  { %v517_v41 = vpop.f32.mrb[31].mxu0  ;;  %v2153_v45 = vpop.f32.mrb[31].mxu1  ;;  %v1059_v2 = vadd.f32 %v1058_v26, %v1057_v44  ;;  %v1080_v3 = vrot.slane %v1079_v59, 2  ;;  %v1109_v9 = vadd.f32 %v1108_v61, %v1102_v55  ;;  %v1231_v13 = vadd.f32 %v2094_v57, %v1230_v54 }
 0x121   :  { %v1252_v5 = vadd.f32 %v1251_v62, %v1245_v53  ;;  %v1088_v6 = vadd.f32 %v1087_v0, %v2137_v29  ;;  %v1247_v56 = vmul.f32 %v2139_v31, %v2139_v31  ;;  %v1129_v14 = vadd.f32 %v1128_v1, %v2007_v40 }
 0x122   :  { %v1060_v11 = vrot.slane %v1059_v2, 1  ;;  %v1081_v12 = vadd.f32 %v1080_v3, %v1079_v59  ;;  %v1110_v15 = vadd.f32 %v1109_v9, %v1103_v50  ;;  %v1232_v21 = vadd.f32 %v1231_v13, %v2139_v31 }
 0x123   :  { %v1253_v16 = vadd.f32 %v1252_v5, %v1246_v48  ;;  %v1151_v23 = vadd.f32 %v1150_v63, %v2009_v49  ;;  %v1164_v25 = vrot.slane %v2046_v60, 4  ;;  %v1553_v8 = vpack.c.bf16 %v2144_v18, %v2127_v24 }
 0x124   :  { %v1061_v17 = vadd.f32 %v1060_v11, %v1059_v2  ;;  %v1082_v20 = vrot.slane %v1081_v12, 1  ;;  %v1186_v57 = vrot.slane %v2054_v4, 4  ;;  %v1633_v40 = vpack.c.bf16 %v2146_v36, %v2129_v7 }
 0x125   :  { %v1254_v27 = vadd.f32 %v1253_v16, %v1247_v56  ;;  %v1249_v34 = vmul.f32 %v2129_v7, %v2129_v7  ;;  %1649 = vst [vmem:[%s2245_s2 + $0x78] sm:$0xff] %v1553_v8   ;;  %v1548_v49 = vpack.c.bf16 %v517_v41, %v2137_v29  ;;  %v1089_v35 = vadd.f32 %v1088_v6, %v517_v41 }
 0x126   :  { %v2192_v32 = vadd.f32 %v1061_v17, %v2096_v58  ;;  %v1083_v33 = vadd.f32 %v1082_v20, %v1081_v12  ;;  %v1104_v19 = vmul.f32 %v517_v41, %v517_v41  ;;  %1665 = vst [vmem:[%s2245_s2 + $0xf8] sm:$0xff] %v1633_v40   ;;  %v1628_v58 = vpack.c.bf16 %v2153_v45, %v2139_v31 }
 0x127   :  { %v1233_v38 = vadd.f32 %v1232_v21, %v2153_v45  ;;  %v1248_v39 = vmul.f32 %v2153_v45, %v2153_v45  ;;  %v1200_v46 = vrot.slane %v2133_v28, 4  ;;  %v1105_v29 = vmul.f32 %v2127_v24, %v2127_v24  ;;  %1648 = vst [vmem:[%s2245_s2 + $0x70] sm:$0xff] %v1548_v49  }
 0x128   :  { %v2203_v37 = vadd.f32 %v1083_v33, %v2107_v10  ;;  %v1090_v10 = vadd.f32 %v2127_v24, %v1089_v35  ;;  %v1111_v41 = vadd.f32 %v1110_v15, %v1104_v19  ;;  %v1165_v47 = vadd.f32 %v1164_v25, %v2046_v60  ;;  %1664 = vst [vmem:[%s2245_s2 + $0xf0] sm:$0xff] %v1628_v58  }
 0x129   :  { %v1250_v31 = vmul.f32 %v2146_v36, %v2146_v36  ;;  %v1234_v45 = vadd.f32 %v2129_v7, %v1233_v38  ;;  %v1255_v22 = vadd.f32 %v1254_v27, %v1248_v39  ;;  %v1222_v44 = vrot.slane %v2155_v30, 4 }
 0x12a   :  { %v1106_v42 = vmul.f32 %v2144_v18, %v2144_v18  ;;  %v1091_v24 = vadd.f32 %v2144_v18, %v1090_v10  ;;  %v1112_v51 = vadd.f32 %v1111_v41, %v1105_v29  ;;  %v1130_v52 = vrot.slane %v1129_v14, 2 }
 0x12b   :  { %v1187_v60 = vadd.f32 %v1186_v57, %v2054_v4  ;;  %v1235_v53 = vadd.f32 %v2146_v36, %v1234_v45  ;;  %v1256_v54 = vadd.f32 %v1255_v22, %v1249_v34  ;;  %v1201_v43 = vadd.f32 %v1200_v46, %v2133_v28 }
 0x12c   :  { %v1092_v26 = vrot.slane %v1091_v24, 4  ;;  %v1113_v59 = vadd.f32 %v1112_v51, %v1106_v42  ;;  %v1152_v7 = vrot.slane %v1151_v23, 2  ;;  %v1166_v61 = vrot.slane %v1165_v47, 2 }
 0x12d   :  { %v1236_v55 = vrot.slane %v1235_v53, 4  ;;  %v1257_v48 = vadd.f32 %v1256_v54, %v1250_v31  ;;  %v1223_v62 = vadd.f32 %v1222_v44, %v2155_v30  ;;  %v1131_v18 = vadd.f32 %v1130_v52, %v1129_v14 }
 0x12e   :  { %v1093_v0 = vadd.f32 %v1092_v26, %v1091_v24  ;;  %v1114_v1 = vrot.slane %v1113_v59, 4  ;;  %v1188_v2 = vrot.slane %v1187_v60, 2  ;;  %v1202_v4 = vrot.slane %v1201_v43, 2 }
 0x12f   :  { %v1237_v3 = vadd.f32 %v1236_v55, %v1235_v53  ;;  %v1258_v50 = vrot.slane %v1257_v48, 4  ;;  %v1153_v5 = vadd.f32 %v1152_v7, %v1151_v23  ;;  %v1167_v6 = vadd.f32 %v1166_v61, %v1165_v47 }
 0x130   :  { %v1094_v63 = vrot.slane %v1093_v0, 2  ;;  %v1115_v36 = vadd.f32 %v1114_v1, %v1113_v59  ;;  %v1224_v9 = vrot.slane %v1223_v62, 2  ;;  %v1132_v15 = vrot.slane %v1131_v18, 1 }
 0x131   :  { %v1259_v28 = vadd.f32 %v1258_v50, %v1257_v48  ;;  %v1238_v13 = vrot.slane %v1237_v3, 2  ;;  %v1189_v56 = vadd.f32 %v1188_v2, %v1187_v60  ;;  %v1203_v16 = vadd.f32 %v1202_v4, %v1201_v43 }
 0x132   :  { %v1095_v11 = vadd.f32 %v1094_v63, %v1093_v0  ;;  %v1116_v12 = vrot.slane %v1115_v36, 2  ;;  %v1154_v14 = vrot.slane %v1153_v5, 1  ;;  %v1168_v21 = vrot.slane %v1167_v6, 1 }
 0x133   :  { %v1260_v20 = vrot.slane %v1259_v28, 2  ;;  %v1225_v25 = vadd.f32 %v1224_v9, %v1223_v62  ;;  %v1239_v57 = vadd.f32 %v1238_v13, %v1237_v3  ;;  %v1133_v33 = vadd.f32 %v1132_v15, %v1131_v18 }
 0x134   :  { %v1096_v30 = vrot.slane %v1095_v11, 1  ;;  %v1117_v17 = vadd.f32 %v1116_v12, %v1115_v36  ;;  %v1190_v23 = vrot.slane %v1189_v56, 1  ;;  %v1204_v40 = vrot.slane %v1203_v16, 1 }
 0x135   :  { %v1261_v35 = vadd.f32 %v1260_v20, %v1259_v28  ;;  %v1155_v19 = vadd.f32 %v1154_v14, %v1153_v5  ;;  %v1169_v58 = vadd.f32 %v1168_v21, %v1167_v6  ;;  %v1226_v38 = vrot.slane %v1225_v25, 1 }
 0x136   :  { %v1097_v27 = vadd.f32 %v1096_v30, %v1095_v11  ;;  %v1118_v8 = vrot.slane %v1117_v17, 1  ;;  %v1240_v29 = vrot.slane %v1239_v57, 1  ;;  %v1191_v10 = vadd.f32 %v1190_v23, %v1189_v56 }
 0x137   :  { %v1205_v41 = vadd.f32 %v1204_v40, %v1203_v16  ;;  %v1262_v45 = vrot.slane %v1261_v35, 1  ;;  %v1227_v22 = vadd.f32 %v1226_v38, %v1225_v25 }
 0x138   :  { %v1098_v34 = vadd.f32 %v1097_v27, %v2192_v32  ;;  %v1119_v49 = vadd.f32 %v1118_v8, %v1117_v17  ;;  %v1241_v24 = vadd.f32 %v1240_v29, %v1239_v57 }
 0x139   :  { %v1263_v52 = vadd.f32 %v1262_v45, %v1261_v35 }
 0x13a   :  { %v1120_v39 = vadd.f32 %v1119_v49, %v2203_v37  ;;  %v1134_v46 = vadd.f32 %v1133_v33, %v1098_v34 }
 0x13c   :  { %v1156_v47 = vadd.f32 %v1155_v19, %v1120_v39  ;;  %v1170_v31 = vadd.f32 %v1169_v58, %v1134_v46 }
 0x13e   :  { %v1192_v44 = vadd.f32 %v1191_v10, %v1156_v47  ;;  %v1206_v42 = vadd.f32 %v1205_v41, %v1170_v31 }
 0x140   :  { %v1228_v51 = vadd.f32 %v1227_v22, %v1192_v44  ;;  %v1242_v32 = vadd.f32 %v1241_v24, %v1206_v42 }
 0x142   :  { %v1264_v60 = vadd.f32 %v1263_v52, %v1228_v51  ;;  %1265 = vst [vmem:[%s2246_s3] sm:$0x1] %v1242_v32 }
 0x144   :  { %1266 = vst [vmem:[%s2247_s4] sm:$0x1] %v1264_v60 }

// kernel: bottleneck_forward.9
= control target key start
LH: loop header
LB: loop body
LE: loop exit
PB: predicated region body
PF: predicated region fallthrough
CT: control target
= control target key end

     0   :  { %s805_s1 = inlined_call_operand.vmem [shape: bf16[128,128], index: 1, kind: input, shape index: {}]   ;;  %s806_s0 = inlined_call_operand.vmem [shape: bf16[128,128], index: 0, kind: input, shape index: {}]   ;;  %s807_s2 = inlined_call_operand.vmem [shape: f32[1,128], index: 2, kind: input, shape index: {}]   ;;  %s808_s3 = inlined_call_operand.vmem [shape: f32[1,128], index: 3, kind: input, shape index: {}]   ;;  %s809_s4 = inlined_call_operand.vmem [shape: bf16[128,128], index: 4, kind: output, shape index: {0}]   ;;  %s810_s5 = inlined_call_operand.vmem [shape: f32[1,1,128], index: 5, kind: output, shape index: {1}]   ;;  %s811_s6 = inlined_call_operand.vmem [shape: f32[1,1,128], index: 6, kind: output, shape index: {2}]  }
   0x1   :  { %v642_v0 = vld [vmem:[%s805_s1] sm:$0xff]   ;;  %v643_v1 = vld [vmem:[%s805_s1 + $0x8] sm:$0xff]   ;;  %v644_v2 = vld [vmem:[%s805_s1 + $0x10] sm:$0xff]  }
   0x2   :  { %594 = vmatprep.subr.bf16.mxu0 %v642_v0  ;;  %626 = vmatprep.subr.bf16.mxu1 %v642_v0  ;;  %v645_v3 = vld [vmem:[%s805_s1 + $0x18] sm:$0xff]   ;;  %v493_v4 = vld [vmem:[%s806_s0] sm:$0xff]   ;;  %v564_v9 = vld [vmem:[%s806_s0 + $0x8] sm:$0xff]  }
   0x3   :  { %595 = vmatpush3.bf16.msra.mxu0 %v642_v0  ;;  %634 = vmatpush3.bf16.msra.mxu1 %v642_v0  ;;  %v703_v5 = vld [vmem:[%s807_s2] ss:$0 sm:$0xff]  ;;  %v494_v6 = vunpack.c.l.bf16 %v493_v4  ;;  %v495_v7 = vunpack.c.h.bf16 %v493_v4  ;;  %v568_v13 = vld [vmem:[%s806_s0 + $0x28] sm:$0xff]   ;;  %v565_v16 = vld [vmem:[%s806_s0 + $0x10] sm:$0xff]   ;;  %v498_v20 = vunpack.c.l.bf16 %v564_v9  ;;  %v499_v21 = vunpack.c.h.bf16 %v564_v9 }
   0x4   :  { %596 = vmatprep.subr.bf16.mxu0 %v643_v1  ;;  %627 = vmatprep.subr.bf16.mxu1 %v643_v1  ;;  %v567_v8 = vld [vmem:[%s806_s0 + $0x20] sm:$0xff]   ;;  %v514_v24 = vunpack.c.l.bf16 %v568_v13  ;;  %v515_v25 = vunpack.c.h.bf16 %v568_v13  ;;  %v502_v28 = vunpack.c.l.bf16 %v565_v16  ;;  %v569_v31 = vld [vmem:[%s806_s0 + $0x30] sm:$0xff]   ;;  %v647_v32 = vld [vmem:[%s805_s1 + $0x28] sm:$0xff]   ;;  %v503_v40 = vunpack.c.h.bf16 %v565_v16 }
   0x5   :  { %v714_v10 = vld [vmem:[%s808_s3] ss:$0 sm:$0xff]  ;;  %v510_v11 = vunpack.c.l.bf16 %v567_v8  ;;  %v511_v12 = vunpack.c.h.bf16 %v567_v8  ;;  %v60_v14 = vmul.f32 %v494_v6, %v703_v5  ;;  %v61_v15 = vmul.f32 %v495_v7, %v703_v5  ;;  %v566_v44 = vld [vmem:[%s806_s0 + $0x18] sm:$0xff]   ;;  %v648_v48 = vld [vmem:[%s805_s1 + $0x30] sm:$0xff]  }
   0x6   :  { %v646_v17 = vld [vmem:[%s805_s1 + $0x20] sm:$0xff]   ;;  %v62_v35 = vmul.f32 %v498_v20, %v703_v5  ;;  %v63_v36 = vmul.f32 %v499_v21, %v703_v5  ;;  %v70_v38 = vmul.f32 %v514_v24, %v703_v5  ;;  %v71_v39 = vmul.f32 %v515_v25, %v703_v5  ;;  %v570_v47 = vld [vmem:[%s806_s0 + $0x38] sm:$0xff]  }
   0x7   :  { %597 = vmatpush3.bf16.msra.mxu0 %v643_v1  ;;  %635 = vmatpush3.bf16.msra.mxu1 %v643_v1  ;;  %v68_v18 = vmul.f32 %v510_v11, %v703_v5  ;;  %v69_v19 = vmul.f32 %v511_v12, %v703_v5  ;;  %v83_v22 = vadd.f32 %v714_v10, %v60_v14  ;;  %v518_v43 = vunpack.c.l.bf16 %v569_v31  ;;  %v649_v63 = vld [vmem:[%s805_s1 + $0x38] sm:$0xff]  }
   0x8   :  { %598 = vmatprep.subr.bf16.mxu0 %v644_v2  ;;  %628 = vmatprep.subr.bf16.mxu1 %v644_v2  ;;  %v84_v23 = vadd.f32 %v714_v10, %v61_v15  ;;  %v64_v42 = vmul.f32 %v502_v28, %v703_v5  ;;  %v65_v45 = vmul.f32 %v503_v40, %v703_v5  ;;  %v519_v46 = vunpack.c.h.bf16 %v569_v31 }
   0x9   :  { %v91_v26 = vadd.f32 %v714_v10, %v68_v18  ;;  %v92_v27 = vadd.f32 %v714_v10, %v69_v19  ;;  %v99_v29 = vmax.f32 %v83_v22, 0.0  ;;  %v85_v49 = vadd.f32 %v714_v10, %v62_v35 }
   0xa   :  { %v100_v30 = vmax.f32 %v84_v23, 0.0  ;;  %v86_v50 = vadd.f32 %v714_v10, %v63_v36  ;;  %v72_v51 = vmul.f32 %v518_v43, %v703_v5  ;;  %v93_v52 = vadd.f32 %v714_v10, %v70_v38 }
   0xb   :  { %599 = vmatpush3.bf16.msra.mxu0 %v644_v2  ;;  %636 = vmatpush3.bf16.msra.mxu1 %v644_v2  ;;  %v107_v33 = vmax.f32 %v91_v26, 0.0  ;;  %v108_v34 = vmax.f32 %v92_v27, 0.0  ;;  %v94_v53 = vadd.f32 %v714_v10, %v71_v39  ;;  %v73_v54 = vmul.f32 %v519_v46, %v703_v5 }
   0xc   :  { %600 = vmatprep.subr.bf16.mxu0 %v645_v3  ;;  %629 = vmatprep.subr.bf16.mxu1 %v645_v3  ;;  %v115_v37 = vpack.c.bf16 %v100_v30, %v99_v29  ;;  %v506_v55 = vunpack.c.l.bf16 %v566_v44  ;;  %v87_v56 = vadd.f32 %v714_v10, %v64_v42  ;;  %v507_v57 = vunpack.c.h.bf16 %v566_v44 }
   0xd   :  { %v119_v41 = vpack.c.bf16 %v108_v34, %v107_v33  ;;  %v522_v58 = vunpack.c.l.bf16 %v570_v47  ;;  %v523_v59 = vunpack.c.h.bf16 %v570_v47  ;;  %v88_v60 = vadd.f32 %v714_v10, %v65_v45 }
   0xe   :  { %610 = vmatprep.mubr.bf16.mxu0 %v115_v37  ;;  %v95_v61 = vadd.f32 %v714_v10, %v72_v51  ;;  %v96_v62 = vadd.f32 %v714_v10, %v73_v54  ;;  %v101_v0 = vmax.f32 %v85_v49, 0.0  ;;  %v102_v1 = vmax.f32 %v86_v50, 0.0 }
   0xf   :  { %601 = vmatpush3.bf16.msra.mxu0 %v645_v3  ;;  %637 = vmatpush3.bf16.msra.mxu1 %v645_v3  ;;  %v109_v2 = vmax.f32 %v93_v52, 0.0  ;;  %v110_v3 = vmax.f32 %v94_v53, 0.0  ;;  %v66_v4 = vmul.f32 %v506_v55, %v703_v5  ;;  %v67_v6 = vmul.f32 %v507_v57, %v703_v5 }
  0x10   :  { %602 = vmatprep.subr.bf16.mxu0 %v646_v17  ;;  %630 = vmatprep.subr.bf16.mxu1 %v646_v17  ;;  %v74_v7 = vmul.f32 %v522_v58, %v703_v5  ;;  %v75_v8 = vmul.f32 %v523_v59, %v703_v5  ;;  %v103_v9 = vmax.f32 %v87_v56, 0.0  ;;  %v104_v11 = vmax.f32 %v88_v60, 0.0 }
  0x11   :  { %618 = vmatprep.mubr.bf16.mxu1 %v119_v41  ;;  %v111_v12 = vmax.f32 %v95_v61, 0.0  ;;  %v112_v13 = vmax.f32 %v96_v62, 0.0  ;;  %v116_v14 = vpack.c.bf16 %v102_v1, %v101_v0  ;;  %v120_v15 = vpack.c.bf16 %v110_v3, %v109_v2 }
  0x12   :  { %v89_v16 = vadd.f32 %v714_v10, %v66_v4  ;;  %v97_v18 = vadd.f32 %v714_v10, %v74_v7  ;;  %v98_v19 = vadd.f32 %v714_v10, %v75_v8  ;;  %v117_v5 = vpack.c.bf16 %v104_v11, %v103_v9 }
  0x13   :  { %603 = vmatpush3.bf16.msra.mxu0 %v646_v17  ;;  %638 = vmatpush3.bf16.msra.mxu1 %v646_v17  ;;  %v90_v17 = vadd.f32 %v714_v10, %v67_v6  ;;  %v121_v20 = vpack.c.bf16 %v112_v13, %v111_v12 }
  0x14   :  { %604 = vmatprep.subr.bf16.mxu0 %v647_v32  ;;  %631 = vmatprep.subr.bf16.mxu1 %v647_v32  ;;  %v105_v21 = vmax.f32 %v89_v16, 0.0  ;;  %v113_v23 = vmax.f32 %v97_v18, 0.0  ;;  %v114_v24 = vmax.f32 %v98_v19, 0.0 }
  0x15   :  { %v106_v22 = vmax.f32 %v90_v17, 0.0 }
  0x16   :  { %v122_v26 = vpack.c.bf16 %v114_v24, %v113_v23 }
  0x17   :  { %605 = vmatpush3.bf16.msra.mxu0 %v647_v32  ;;  %639 = vmatpush3.bf16.msra.mxu1 %v647_v32  ;;  %v118_v25 = vpack.c.bf16 %v106_v22, %v105_v21 }
  0x18   :  { %606 = vmatprep.subr.bf16.mxu0 %v648_v48  ;;  %632 = vmatprep.subr.bf16.mxu1 %v648_v48 }
  0x1b   :  { %607 = vmatpush3.bf16.msra.mxu0 %v648_v48  ;;  %640 = vmatpush3.bf16.msra.mxu1 %v648_v48 }
  0x1c   :  { %608 = vmatprep.subr.bf16.mxu0 %v649_v63  ;;  %633 = vmatprep.subr.bf16.mxu1 %v649_v63 }
  0x1f   :  { %609 = vmatpush3.bf16.msra.mxu0 %v649_v63  ;;  %641 = vmatpush3.bf16.msra.mxu1 %v649_v63 }
  0x22   :  { %611 = vmatmul.mubr.bf16.vlgmr.msra.gmra.mrb[0].mxu0 %v116_v14  ;;  %619 = vmatmul.mubr.bf16.vlgmr.msra.gmra.mrb[0].mxu1 %v120_v15 }
  0x23   :  { %614 = vmatprep.mubr.bf16.mxu0 %v117_v5  ;;  %622 = vmatprep.mubr.bf16.mxu1 %v121_v20 }
  0x2a   :  { %615 = vmatmul.mubr.bf16.gmra.mrb[4].mxu0 %v118_v25  ;;  %623 = vmatmul.mubr.bf16.gmra.mrb[4].mxu1 %v122_v26 }
  0xf5   :  { %v612_v27 = vpop.f32.mrb[0].mxu0  ;;  %v620_v28 = vpop.f32.mrb[0].mxu1 }
  0xf6   :  { %v221_v29 = vpop.f32.mrb[1].mxu0  ;;  %v253_v10 = vpop.f32.mrb[1].mxu1  ;;  %v380_v44 = vmul.f32 %v612_v27, %v612_v27  ;;  %v416_v47 = vmul.f32 %v620_v28, %v620_v28 }
  0xf7   :  { %v613_v30 = vpop.f32.mrb[2].mxu0  ;;  %v621_v31 = vpop.f32.mrb[2].mxu1  ;;  %v378_v32 = vmul.f32 %v221_v29, %v221_v29  ;;  %v414_v41 = vmul.f32 %v253_v10, %v253_v10 }
  0xf8   :  { %v532_v33 = vpack.c.bf16 %v613_v30, %v612_v27  ;;  %v552_v34 = vpack.c.bf16 %v621_v31, %v620_v28  ;;  %v224_v35 = vpop.f32.mrb[3].mxu0  ;;  %v256_v36 = vpop.f32.mrb[3].mxu1  ;;  %v381_v50 = vmul.f32 %v613_v30, %v613_v30  ;;  %v417_v55 = vmul.f32 %v621_v31, %v621_v31 }
  0xf9   :  { %v527_v37 = vpack.c.bf16 %v224_v35, %v221_v29  ;;  %v364_v38 = vadd.f32 %v224_v35, %v221_v29  ;;  %v379_v39 = vmul.f32 %v224_v35, %v224_v35  ;;  %v547_v40 = vpack.c.bf16 %v256_v36, %v253_v10 }
  0xfa   :  { %571 = vst [vmem:[%s809_s4 + $0x8] sm:$0xff] %v532_v33   ;;  %575 = vst [vmem:[%s809_s4 + $0x28] sm:$0xff] %v552_v34   ;;  %v400_v42 = vadd.f32 %v256_v36, %v253_v10  ;;  %v415_v43 = vmul.f32 %v256_v36, %v256_v36 }
  0xfb   :  { %528 = vst [vmem:[%s809_s4] sm:$0xff] %v527_v37   ;;  %v365_v45 = vadd.f32 %v612_v27, %v364_v38  ;;  %v386_v46 = vadd.f32 %v379_v39, %v378_v32  ;;  %574 = vst [vmem:[%s809_s4 + $0x20] sm:$0xff] %v547_v40  }
  0xfc   :  { %v401_v48 = vadd.f32 %v620_v28, %v400_v42  ;;  %v422_v49 = vadd.f32 %v415_v43, %v414_v41 }
  0xfd   :  { %v387_v51 = vadd.f32 %v386_v46, %v380_v44  ;;  %v616_v52 = vpop.f32.mrb[4].mxu0  ;;  %v624_v53 = vpop.f32.mrb[4].mxu1  ;;  %v366_v54 = vadd.f32 %v613_v30, %v365_v45 }
  0xfe   :  { %v423_v56 = vadd.f32 %v422_v49, %v416_v47  ;;  %v237_v57 = vpop.f32.mrb[5].mxu0  ;;  %v269_v58 = vpop.f32.mrb[5].mxu1  ;;  %v402_v59 = vadd.f32 %v621_v31, %v401_v48  ;;  %v384_v18 = vmul.f32 %v616_v52, %v616_v52  ;;  %v420_v20 = vmul.f32 %v624_v53, %v624_v53 }
  0xff   :  { %v367_v60 = vadd.f32 %v366_v54, %v237_v57  ;;  %v382_v61 = vmul.f32 %v237_v57, %v237_v57  ;;  %v388_v62 = vadd.f32 %v387_v51, %v381_v50  ;;  %v418_v63 = vmul.f32 %v269_v58, %v269_v58  ;;  %v617_v0 = vpop.f32.mrb[6].mxu0  ;;  %v625_v1 = vpop.f32.mrb[6].mxu1 }
 0x100   :  { %v403_v2 = vadd.f32 %v402_v59, %v269_v58  ;;  %v424_v3 = vadd.f32 %v423_v56, %v417_v55  ;;  %v542_v4 = vpack.c.bf16 %v617_v0, %v616_v52  ;;  %v240_v6 = vpop.f32.mrb[7].mxu0  ;;  %v272_v7 = vpop.f32.mrb[7].mxu1  ;;  %v562_v9 = vpack.c.bf16 %v625_v1, %v624_v53 }
 0x101   :  { %v389_v8 = vadd.f32 %v388_v62, %v382_v61  ;;  %v537_v11 = vpack.c.bf16 %v240_v6, %v237_v57  ;;  %v368_v13 = vadd.f32 %v367_v60, %v240_v6  ;;  %v383_v14 = vmul.f32 %v240_v6, %v240_v6 }
 0x102   :  { %v425_v12 = vadd.f32 %v424_v3, %v418_v63  ;;  %573 = vst [vmem:[%s809_s4 + $0x18] sm:$0xff] %v542_v4   ;;  %v557_v15 = vpack.c.bf16 %v272_v7, %v269_v58  ;;  %577 = vst [vmem:[%s809_s4 + $0x38] sm:$0xff] %v562_v9   ;;  %v404_v16 = vadd.f32 %v403_v2, %v272_v7 }
 0x103   :  { %572 = vst [vmem:[%s809_s4 + $0x10] sm:$0xff] %v537_v11   ;;  %v419_v17 = vmul.f32 %v272_v7, %v272_v7  ;;  %v369_v19 = vadd.f32 %v616_v52, %v368_v13  ;;  %v390_v5 = vadd.f32 %v389_v8, %v383_v14  ;;  %v385_v23 = vmul.f32 %v617_v0, %v617_v0 }
 0x104   :  { %576 = vst [vmem:[%s809_s4 + $0x30] sm:$0xff] %v557_v15   ;;  %v405_v21 = vadd.f32 %v624_v53, %v404_v16  ;;  %v421_v26 = vmul.f32 %v625_v1, %v625_v1 }
 0x105   :  { %v426_v22 = vadd.f32 %v425_v12, %v419_v17  ;;  %v370_v24 = vadd.f32 %v617_v0, %v369_v19  ;;  %v391_v25 = vadd.f32 %v390_v5, %v384_v18 }
 0x106   :  { %v406_v27 = vadd.f32 %v625_v1, %v405_v21 }
 0x107   :  { %v427_v28 = vadd.f32 %v426_v22, %v420_v20  ;;  %v371_v29 = vrot.slane %v370_v24, 4  ;;  %v392_v10 = vadd.f32 %v391_v25, %v385_v23 }
 0x108   :  { %v407_v30 = vrot.slane %v406_v27, 4 }
 0x109   :  { %v428_v31 = vadd.f32 %v427_v28, %v421_v26  ;;  %v372_v32 = vadd.f32 %v371_v29, %v370_v24  ;;  %v393_v33 = vrot.slane %v392_v10, 4 }
 0x10a   :  { %v408_v34 = vadd.f32 %v407_v30, %v406_v27 }
 0x10b   :  { %v429_v35 = vrot.slane %v428_v31, 4  ;;  %v373_v36 = vrot.slane %v372_v32, 2  ;;  %v394_v37 = vadd.f32 %v393_v33, %v392_v10 }
 0x10c   :  { %v409_v38 = vrot.slane %v408_v34, 2 }
 0x10d   :  { %v430_v39 = vadd.f32 %v429_v35, %v428_v31  ;;  %v374_v40 = vadd.f32 %v373_v36, %v372_v32  ;;  %v395_v41 = vrot.slane %v394_v37, 2 }
 0x10e   :  { %v410_v42 = vadd.f32 %v409_v38, %v408_v34 }
 0x10f   :  { %v431_v43 = vrot.slane %v430_v39, 2  ;;  %v375_v44 = vrot.slane %v374_v40, 1  ;;  %v396_v45 = vadd.f32 %v395_v41, %v394_v37 }
 0x110   :  { %v411_v46 = vrot.slane %v410_v42, 1 }
 0x111   :  { %v432_v47 = vadd.f32 %v431_v43, %v430_v39  ;;  %v376_v48 = vadd.f32 %v375_v44, %v374_v40  ;;  %v397_v49 = vrot.slane %v396_v45, 1 }
 0x112   :  { %v412_v50 = vadd.f32 %v411_v46, %v410_v42 }
 0x113   :  { %v433_v51 = vrot.slane %v432_v47, 1  ;;  %v398_v52 = vadd.f32 %v397_v49, %v396_v45 }
 0x114   :  { %v413_v53 = vadd.f32 %v412_v50, %v376_v48 }
 0x115   :  { %v434_v54 = vadd.f32 %v433_v51, %v432_v47 }
 0x116   :  { %436 = vst [vmem:[%s810_s5] sm:$0x1] %v413_v53 }
 0x117   :  { %v435_v55 = vadd.f32 %v434_v54, %v398_v52 }
 0x119   :  { %437 = vst [vmem:[%s811_s6] sm:$0x1] %v435_v55 }

// kernel: bottleneck_forward.8
= control target key start
LH: loop header
LB: loop body
LE: loop exit
PB: predicated region body
PF: predicated region fallthrough
CT: control target
= control target key end

     0   :  { %vm311_vm0 = vcmask 261120   ;;  %s1186_s1 = inlined_call_operand.vmem [shape: bf16[288,128], index: 1, kind: input, shape index: {}]   ;;  %s1187_s0 = inlined_call_operand.vmem [shape: bf16[128,288], index: 0, kind: input, shape index: {}]   ;;  %s1188_s2 = inlined_call_operand.vmem [shape: bf16[128,128], index: 2, kind: output, shape index: {0}]   ;;  %s1189_s3 = inlined_call_operand.vmem [shape: f32[1,1,128], index: 3, kind: output, shape index: {1}]   ;;  %s1190_s4 = inlined_call_operand.vmem [shape: f32[1,1,128], index: 4, kind: output, shape index: {2}]  }
   0x1   :  { %v935_v0 = vld [vmem:[%s1186_s1 + $0x40] sm:$0xff]   ;;  %v937_v2 = vld [vmem:[%s1186_s1 + $0x48] sm:$0xff]   ;;  %v939_v4 = vld [vmem:[%s1186_s1 + $0x50] sm:$0xff]  }
   0x2   :  { %v936_v1 = vld [vmem:[%s1186_s1] sm:$0xff]   ;;  %825 = vmatprep.subr.bf16.mxu0 %v935_v0  ;;  %919 = vmatprep.subr.bf16.mxu1 %v935_v0  ;;  %v938_v3 = vld [vmem:[%s1186_s1 + $0x8] sm:$0xff]   ;;  %v940_v5 = vld [vmem:[%s1186_s1 + $0x10] sm:$0xff]  }
   0x3   :  { %826 = vmatpush3.bf16.msra.mxu0 %v936_v1  ;;  %927 = vmatpush3.bf16.msra.mxu1 %v936_v1  ;;  %v941_v6 = vld [vmem:[%s1186_s1 + $0x58] sm:$0xff]   ;;  %v943_v8 = vld [vmem:[%s1186_s1 + $0x60] sm:$0xff]   ;;  %v945_v10 = vld [vmem:[%s1186_s1 + $0x68] sm:$0xff]  }
   0x4   :  { %827 = vmatprep.subr.bf16.mxu0 %v937_v2  ;;  %920 = vmatprep.subr.bf16.mxu1 %v937_v2  ;;  %v942_v7 = vld [vmem:[%s1186_s1 + $0x18] sm:$0xff]   ;;  %v944_v9 = vld [vmem:[%s1186_s1 + $0x20] sm:$0xff]   ;;  %v946_v13 = vld [vmem:[%s1186_s1 + $0x28] sm:$0xff]  }
   0x5   :  { %v953_v11 = vld [vmem:[%s1187_s0 + $0x4] ss:$12 sps:$4 sm:$0xff]   ;;  %v956_v12 = vld [vmem:[%s1187_s0 + $0x94] ss:$12 sps:$4 sm:$0xff]   ;;  %v949_v16 = vld [vmem:[%s1186_s1 + $0x78] sm:$0xff]  }
   0x6   :  { %v947_v14 = vld [vmem:[%s1186_s1 + $0x70] sm:$0xff]   ;;  %368 = vmatprep.mubr.bf16.mxu0 %v953_v11  ;;  %416 = vmatprep.mubr.bf16.mxu1 %v956_v12  ;;  %v950_v17 = vld [vmem:[%s1186_s1 + $0x38] sm:$0xff]   ;;  %v951_v18 = vld [vmem:[%s1187_s0] ss:$12 sps:$4 sm:$0xff]  }
   0x7   :  { %828 = vmatpush3.bf16.msra.mxu0 %v938_v3  ;;  %928 = vmatpush3.bf16.msra.mxu1 %v938_v3  ;;  %v948_v15 = vld [vmem:[%s1186_s1 + $0x30] sm:$0xff]   ;;  %v957_v19 = vld [vmem:[%s1186_s1 + $0x80] sm:$0xff]   ;;  %v958_v21 = vld [vmem:[%s1187_s0 + $0x1c] ss:$12 sps:$4 sm:$0xff]  }
   0x8   :  { %829 = vmatprep.subr.bf16.mxu0 %v939_v4  ;;  %921 = vmatprep.subr.bf16.mxu1 %v939_v4  ;;  %v954_v20 = vld [vmem:[%s1187_s0 + $0x90] ss:$12 sps:$4 sm:$0xff]   ;;  %v960_v22 = vld [vmem:[%s1187_s0 + $0xac] ss:$12 sps:$4 sm:$0xff]   ;;  %v963_v25 = vld [vmem:[%s1187_s0 + $0xa8] ss:$12 sps:$4 sm:$0xff]  }
   0x9   :  { %v964_v23 = vld [vmem:[%s1186_s1 + $0x88] sm:$0xff]   ;;  %v962_v24 = vld [vmem:[%s1187_s0 + $0x18] ss:$12 sps:$4 sm:$0xff]   ;;  %v965_v26 = vld [vmem:[%s1187_s0 + $0x34] ss:$12 sps:$4 sm:$0xff]  }
   0xa   :  { %v967_v27 = vld [vmem:[%s1187_s0 + $0x8] ss:$12 sps:$4 sm:$0xff]   ;;  %v968_v28 = vld [vmem:[%s1187_s0 + $0x30] ss:$12 sps:$4 sm:$0xff]   ;;  %v969_v29 = vld [vmem:[%s1187_s0 + $0x20] ss:$12 sps:$4 sm:$0xff]  }
   0xb   :  { %830 = vmatpush3.bf16.msra.mxu0 %v940_v5  ;;  %929 = vmatpush3.bf16.msra.mxu1 %v940_v5  ;;  %v970_v30 = vld [vmem:[%s1187_s0 + $0x4c] ss:$12 sps:$4 sm:$0xff]   ;;  %v973_v32 = vld [vmem:[%s1187_s0 + $0x48] ss:$12 sps:$4 sm:$0xff]   ;;  %v974_v33 = vld [vmem:[%s1187_s0 + $0x50] ss:$12 sps:$4 sm:$0xff]  }
   0xc   :  { %831 = vmatprep.subr.bf16.mxu0 %v941_v6  ;;  %922 = vmatprep.subr.bf16.mxu1 %v941_v6  ;;  %v972_v31 = vld [vmem:[%s1187_s0 + $0x38] ss:$12 sps:$4 sm:$0xff]   ;;  %v977_v35 = vld [vmem:[%s1187_s0 + $0x68] ss:$12 sps:$4 sm:$0xff]   ;;  %v978_v36 = vld [vmem:[%s1187_s0 + $0x60] ss:$12 sps:$4 sm:$0xff]  }
   0xd   :  { %v975_v34 = vld [vmem:[%s1187_s0 + $0x64] ss:$12 sps:$4 sm:$0xff]   ;;  %v979_v37 = vld [vmem:[%s1187_s0 + $0x80] ss:$12 sps:$4 sm:$0xff]   ;;  %v980_v38 = vld [vmem:[%s1187_s0 + $0x7c] ss:$12 sps:$4 sm:$0xff]  }
   0xe   :  { %v982_v39 = vld [vmem:[%s1187_s0 + $0x98] ss:$12 sps:$4 sm:$0xff]   ;;  %v984_v41 = vld [vmem:[%s1187_s0 + $0xb0] ss:$12 sps:$4 sm:$0xff]  }
   0xf   :  { %832 = vmatpush3.bf16.msra.mxu0 %v942_v7  ;;  %930 = vmatpush3.bf16.msra.mxu1 %v942_v7  ;;  %v983_v40 = vld [vmem:[%s1187_s0 + $0x78] ss:$12 sps:$4 sm:$0xff]  }
  0x10   :  { %833 = vmatprep.subr.bf16.mxu0 %v943_v8  ;;  %923 = vmatprep.subr.bf16.mxu1 %v943_v8 }
  0x13   :  { %834 = vmatpush3.bf16.msra.mxu0 %v944_v9  ;;  %931 = vmatpush3.bf16.msra.mxu1 %v944_v9 }
  0x14   :  { %835 = vmatprep.subr.bf16.mxu0 %v945_v10  ;;  %924 = vmatprep.subr.bf16.mxu1 %v945_v10 }
  0x17   :  { %836 = vmatpush3.bf16.msra.mxu0 %v946_v13  ;;  %932 = vmatpush3.bf16.msra.mxu1 %v946_v13 }
  0x18   :  { %837 = vmatprep.subr.bf16.mxu0 %v947_v14  ;;  %925 = vmatprep.subr.bf16.mxu1 %v947_v14 }
  0x1b   :  { %838 = vmatpush3.bf16.msra.mxu0 %v948_v15  ;;  %933 = vmatpush3.bf16.msra.mxu1 %v948_v15 }
  0x1c   :  { %839 = vmatprep.subr.bf16.mxu0 %v949_v16  ;;  %926 = vmatprep.subr.bf16.mxu1 %v949_v16 }
  0x1f   :  { %840 = vmatpush3.bf16.msra.mxu0 %v950_v17  ;;  %934 = vmatpush3.bf16.msra.mxu1 %v950_v17 }
  0x20   :  { %899 = vmatprep.subr.bf16.mxu1 %v957_v19 }
  0x22   :  { %369 = vmatmul.mubr.bf16.vlgmr.msra.gmra.mrb[0].mxu0 %v951_v18  ;;  %417 = vmatmul.mubr.bf16.vlgmr.msra.gmra.mrb[0].mxu1 %v954_v20 }
  0x23   :  { %900 = vmatpush3.bf16.msra.mxu1 %v957_v19  ;;  %376 = vmatprep.mubr.bf16.mxu0 %v958_v21 }
  0x24   :  { %424 = vmatprep.mubr.bf16.mxu1 %v960_v22  ;;  %901 = vmatprep.subr.bf16.mxu1 %v964_v23 }
  0x27   :  { %902 = vmatpush3.bf16.msra.mxu1 %v964_v23 }
  0x2a   :  { %377 = vmatmul.mubr.bf16.gmra.mrb[4].mxu0 %v962_v24  ;;  %425 = vmatmul.mubr.bf16.gmra.mrb[4].mxu1 %v963_v25 }
  0x2b   :  { %384 = vmatprep.mubr.bf16.mxu0 %v965_v26  ;;  %903 = vmatprep.mubr.msk.bf16.mxu1 %vm311_vm0, %v967_v27 }
  0x32   :  { %385 = vmatmul.mubr.bf16.gmra.mrb[8].mxu0 %v968_v28  ;;  %904 = vmatmul.mubr.msk.bf16.vlgmr.msra.gmra.mrb[8].mxu1 %vm311_vm0, %v969_v29 }
  0x33   :  { %392 = vmatprep.mubr.bf16.mxu0 %v970_v30  ;;  %907 = vmatprep.mubr.msk.bf16.mxu1 %vm311_vm0, %v972_v31 }
  0x3a   :  { %393 = vmatmul.mubr.bf16.gmra.mrb[12].mxu0 %v973_v32  ;;  %908 = vmatmul.mubr.msk.bf16.gmra.mrb[12].mxu1 %vm311_vm0, %v974_v33 }
  0x3b   :  { %400 = vmatprep.mubr.bf16.mxu0 %v975_v34  ;;  %911 = vmatprep.mubr.msk.bf16.mxu1 %vm311_vm0, %v977_v35 }
  0x42   :  { %401 = vmatmul.mubr.bf16.gmra.mrb[16].mxu0 %v978_v36  ;;  %912 = vmatmul.mubr.msk.bf16.gmra.mrb[16].mxu1 %vm311_vm0, %v979_v37 }
  0x43   :  { %408 = vmatprep.mubr.bf16.mxu0 %v980_v38  ;;  %915 = vmatprep.mubr.msk.bf16.mxu1 %vm311_vm0, %v982_v39 }
  0x4a   :  { %409 = vmatmul.mubr.bf16.gmra.mrb[20].mxu0 %v983_v40  ;;  %916 = vmatmul.mubr.msk.bf16.gmra.mrb[20].mxu1 %vm311_vm0, %v984_v41 }
  0xf5   :  { %v841_v42 = vpop.f32.mrb[0].mxu0  ;;  %v877_v43 = vpop.f32.mrb[0].mxu1 }
  0xf6   :  { %v842_v44 = vpop.f32.mrb[1].mxu0  ;;  %v878_v45 = vpop.f32.mrb[1].mxu1 }
  0xf7   :  { %v843_v46 = vadd.f32 %v842_v44, %v841_v42  ;;  %v844_v47 = vpop.f32.mrb[2].mxu0  ;;  %v1144_v48 = vadd.f32 %v878_v45, %v877_v43  ;;  %v880_v49 = vpop.f32.mrb[2].mxu1 }
  0xf8   :  { %v845_v50 = vpop.f32.mrb[3].mxu0  ;;  %v881_v51 = vpop.f32.mrb[3].mxu1 }
  0xf9   :  { %v846_v52 = vadd.f32 %v845_v50, %v844_v47  ;;  %v1146_v53 = vadd.f32 %v881_v51, %v880_v49 }
  0xfd   :  { %v847_v54 = vpop.f32.mrb[4].mxu0  ;;  %v883_v55 = vpop.f32.mrb[4].mxu1 }
  0xfe   :  { %v848_v56 = vpop.f32.mrb[5].mxu0  ;;  %v884_v57 = vpop.f32.mrb[5].mxu1 }
  0xff   :  { %v849_v58 = vadd.f32 %v848_v56, %v847_v54  ;;  %v850_v59 = vpop.f32.mrb[6].mxu0  ;;  %v1148_v60 = vadd.f32 %v884_v57, %v883_v55  ;;  %v886_v61 = vpop.f32.mrb[6].mxu1 }
 0x100   :  { %v851_v62 = vpop.f32.mrb[7].mxu0  ;;  %v887_v63 = vpop.f32.mrb[7].mxu1 }
 0x101   :  { %v852_v0 = vadd.f32 %v851_v62, %v850_v59  ;;  %v1150_v1 = vadd.f32 %v887_v63, %v886_v61 }
 0x105   :  { %v853_v2 = vpop.f32.mrb[8].mxu0  ;;  %v905_v3 = vpop.f32.mrb[8].mxu1 }
 0x106   :  { %v476_v4 = vadd.f32 %v905_v3, %v849_v58  ;;  %v854_v5 = vpop.f32.mrb[9].mxu0  ;;  %v467_v6 = vpop.f32.mrb[9].mxu1 }
 0x107   :  { %v855_v7 = vadd.f32 %v854_v5, %v853_v2  ;;  %v468_v8 = vadd.f32 %v843_v46, %v467_v6  ;;  %v856_v9 = vpop.f32.mrb[10].mxu0  ;;  %v906_v10 = vpop.f32.mrb[10].mxu1 }
 0x108   :  { %v479_v11 = vadd.f32 %v906_v10, %v852_v0  ;;  %v857_v12 = vpop.f32.mrb[11].mxu0  ;;  %v470_v13 = vpop.f32.mrb[11].mxu1  ;;  %v626_v21 = vmul.f32 %v476_v4, %v476_v4 }
 0x109   :  { %v858_v14 = vadd.f32 %v857_v12, %v856_v9  ;;  %v471_v15 = vadd.f32 %v846_v52, %v470_v13  ;;  %v624_v17 = vmul.f32 %v468_v8, %v468_v8 }
 0x10a   :  { %v786_v16 = vpack.c.bf16 %v479_v11, %v476_v4  ;;  %v627_v26 = vmul.f32 %v479_v11, %v479_v11 }
 0x10b   :  { %v781_v18 = vpack.c.bf16 %v471_v15, %v468_v8  ;;  %v610_v19 = vadd.f32 %v471_v15, %v468_v8  ;;  %v625_v20 = vmul.f32 %v471_v15, %v471_v15 }
 0x10c   :  { %818 = vst [vmem:[%s1188_s2 + $0x8] sm:$0xff] %v786_v16  }
 0x10d   :  { %782 = vst [vmem:[%s1188_s2] sm:$0xff] %v781_v18   ;;  %v611_v22 = vadd.f32 %v610_v19, %v476_v4  ;;  %v632_v23 = vadd.f32 %v625_v20, %v624_v17  ;;  %v859_v24 = vpop.f32.mrb[12].mxu0  ;;  %v909_v25 = vpop.f32.mrb[12].mxu1 }
 0x10e   :  { %v860_v27 = vpop.f32.mrb[13].mxu0  ;;  %v483_v28 = vpop.f32.mrb[13].mxu1 }
 0x10f   :  { %v633_v29 = vadd.f32 %v632_v23, %v626_v21  ;;  %v861_v30 = vadd.f32 %v860_v27, %v859_v24  ;;  %v484_v31 = vadd.f32 %v855_v7, %v483_v28  ;;  %v612_v32 = vadd.f32 %v611_v22, %v479_v11  ;;  %v862_v33 = vpop.f32.mrb[14].mxu0  ;;  %v910_v34 = vpop.f32.mrb[14].mxu1 }
 0x110   :  { %v863_v35 = vpop.f32.mrb[15].mxu0  ;;  %v486_v36 = vpop.f32.mrb[15].mxu1 }
 0x111   :  { %v492_v37 = vadd.f32 %v909_v25, %v861_v30  ;;  %v613_v38 = vadd.f32 %v612_v32, %v484_v31  ;;  %v628_v39 = vmul.f32 %v484_v31, %v484_v31  ;;  %v634_v40 = vadd.f32 %v633_v29, %v627_v26 }
 0x112   :  { %v864_v41 = vadd.f32 %v863_v35, %v862_v33  ;;  %v487_v42 = vadd.f32 %v858_v14, %v486_v36 }
 0x113   :  { %v635_v43 = vadd.f32 %v634_v40, %v628_v39  ;;  %v630_v51 = vmul.f32 %v492_v37, %v492_v37 }
 0x114   :  { %v495_v44 = vadd.f32 %v910_v34, %v864_v41  ;;  %v791_v45 = vpack.c.bf16 %v487_v42, %v484_v31  ;;  %v614_v46 = vadd.f32 %v613_v38, %v487_v42  ;;  %v629_v47 = vmul.f32 %v487_v42, %v487_v42 }
 0x115   :  { %v865_v49 = vpop.f32.mrb[16].mxu0  ;;  %v913_v50 = vpop.f32.mrb[16].mxu1 }
 0x116   :  { %v796_v52 = vpack.c.bf16 %v495_v44, %v492_v37  ;;  %819 = vst [vmem:[%s1188_s2 + $0x10] sm:$0xff] %v791_v45   ;;  %v615_v54 = vadd.f32 %v614_v46, %v492_v37  ;;  %v636_v55 = vadd.f32 %v635_v43, %v629_v47  ;;  %v866_v56 = vpop.f32.mrb[17].mxu0  ;;  %v499_v57 = vpop.f32.mrb[17].mxu1  ;;  %v631_v62 = vmul.f32 %v495_v44, %v495_v44 }
 0x117   :  { %v867_v58 = vadd.f32 %v866_v56, %v865_v49  ;;  %v868_v59 = vpop.f32.mrb[18].mxu0  ;;  %v914_v61 = vpop.f32.mrb[18].mxu1 }
 0x118   :  { %820 = vst [vmem:[%s1188_s2 + $0x18] sm:$0xff] %v796_v52   ;;  %v616_v63 = vadd.f32 %v615_v54, %v495_v44  ;;  %v637_v0 = vadd.f32 %v636_v55, %v630_v51  ;;  %v869_v2 = vpop.f32.mrb[19].mxu0  ;;  %v502_v3 = vpop.f32.mrb[19].mxu1 }
 0x119   :  { %v870_v4 = vadd.f32 %v869_v2, %v868_v59  ;;  %v500_v5 = vadd.f32 %v867_v58, %v499_v57 }
 0x11a   :  { %v638_v6 = vadd.f32 %v637_v0, %v631_v62  ;;  %v617_v32 = vrot.slane %v616_v63, 4 }
 0x11b   :  { %v503_v7 = vadd.f32 %v870_v4, %v502_v3  ;;  %v660_v8 = vmul.f32 %v500_v5, %v500_v5 }
 0x11c   :  { %v639_v35 = vrot.slane %v638_v6, 4  ;;  %v618_v38 = vadd.f32 %v617_v32, %v616_v63 }
 0x11d   :  { %v801_v9 = vpack.c.bf16 %v503_v7, %v500_v5  ;;  %v646_v10 = vadd.f32 %v503_v7, %v500_v5  ;;  %v661_v11 = vmul.f32 %v503_v7, %v503_v7  ;;  %v871_v12 = vpop.f32.mrb[20].mxu0  ;;  %v917_v13 = vpop.f32.mrb[20].mxu1 }
 0x11e   :  { %v524_v14 = vadd.f32 %v917_v13, %v1148_v60  ;;  %v872_v15 = vpop.f32.mrb[21].mxu0  ;;  %v515_v16 = vpop.f32.mrb[21].mxu1  ;;  %v640_v42 = vadd.f32 %v639_v35, %v638_v6  ;;  %v619_v46 = vrot.slane %v618_v38, 2 }
 0x11f   :  { %821 = vst [vmem:[%s1188_s2 + $0x20] sm:$0xff] %v801_v9   ;;  %v668_v17 = vadd.f32 %v661_v11, %v660_v8  ;;  %v873_v18 = vadd.f32 %v872_v15, %v871_v12  ;;  %v516_v19 = vadd.f32 %v1144_v48, %v515_v16  ;;  %v874_v20 = vpop.f32.mrb[22].mxu0  ;;  %v918_v21 = vpop.f32.mrb[22].mxu1 }
 0x120   :  { %v527_v22 = vadd.f32 %v918_v21, %v1150_v1  ;;  %v875_v23 = vpop.f32.mrb[23].mxu0  ;;  %v518_v24 = vpop.f32.mrb[23].mxu1  ;;  %v666_v43 = vmul.f32 %v524_v14, %v524_v14  ;;  %v641_v51 = vrot.slane %v640_v42, 2  ;;  %v620_v55 = vadd.f32 %v619_v46, %v618_v38 }
 0x121   :  { %v508_v25 = vadd.f32 %v913_v50, %v873_v18  ;;  %v876_v26 = vadd.f32 %v875_v23, %v874_v20  ;;  %v519_v60 = vadd.f32 %v1146_v53, %v518_v24  ;;  %v664_v53 = vmul.f32 %v516_v19, %v516_v19 }
 0x122   :  { %v816_v27 = vpack.c.bf16 %v527_v22, %v524_v14  ;;  %v667_v47 = vmul.f32 %v527_v22, %v527_v22  ;;  %v642_v58 = vadd.f32 %v641_v51, %v640_v42  ;;  %v621_v62 = vrot.slane %v620_v55, 1 }
 0x123   :  { %v647_v28 = vadd.f32 %v646_v10, %v508_v25  ;;  %v662_v29 = vmul.f32 %v508_v25, %v508_v25  ;;  %v511_v30 = vadd.f32 %v914_v61, %v876_v26  ;;  %v811_v31 = vpack.c.bf16 %v519_v60, %v516_v19 }
 0x124   :  { %824 = vst [vmem:[%s1188_s2 + $0x38] sm:$0xff] %v816_v27   ;;  %v665_v40 = vmul.f32 %v519_v60, %v519_v60  ;;  %v643_v2 = vrot.slane %v642_v58, 1  ;;  %v622_v5 = vadd.f32 %v621_v62, %v620_v55 }
 0x125   :  { %v669_v48 = vadd.f32 %v668_v17, %v662_v29  ;;  %v806_v33 = vpack.c.bf16 %v511_v30, %v508_v25  ;;  %v648_v34 = vadd.f32 %v647_v28, %v511_v30  ;;  %v663_v1 = vmul.f32 %v511_v30, %v511_v30  ;;  %823 = vst [vmem:[%s1188_s2 + $0x30] sm:$0xff] %v811_v31  }
 0x126   :  { %v644_v8 = vadd.f32 %v643_v2, %v642_v58 }
 0x127   :  { %822 = vst [vmem:[%s1188_s2 + $0x28] sm:$0xff] %v806_v33   ;;  %v670_v36 = vadd.f32 %v669_v48, %v663_v1  ;;  %v649_v37 = vadd.f32 %v648_v34, %v516_v19 }
 0x129   :  { %v650_v39 = vadd.f32 %v649_v37, %v519_v60  ;;  %v671_v41 = vadd.f32 %v670_v36, %v664_v53 }
 0x12b   :  { %v651_v44 = vadd.f32 %v650_v39, %v524_v14  ;;  %v672_v45 = vadd.f32 %v671_v41, %v665_v40 }
 0x12d   :  { %v652_v49 = vadd.f32 %v651_v44, %v527_v22  ;;  %v673_v50 = vadd.f32 %v672_v45, %v666_v43 }
 0x12f   :  { %v653_v52 = vrot.slane %v652_v49, 4  ;;  %v674_v54 = vadd.f32 %v673_v50, %v667_v47 }
 0x131   :  { %v654_v56 = vadd.f32 %v653_v52, %v652_v49  ;;  %v675_v57 = vrot.slane %v674_v54, 4 }
 0x133   :  { %v655_v59 = vrot.slane %v654_v56, 2  ;;  %v676_v61 = vadd.f32 %v675_v57, %v674_v54 }
 0x135   :  { %v656_v63 = vadd.f32 %v655_v59, %v654_v56  ;;  %v677_v0 = vrot.slane %v676_v61, 2 }
 0x137   :  { %v657_v3 = vrot.slane %v656_v63, 1  ;;  %v678_v4 = vadd.f32 %v677_v0, %v676_v61 }
 0x139   :  { %v658_v6 = vadd.f32 %v657_v3, %v656_v63  ;;  %v679_v7 = vrot.slane %v678_v4, 1 }
 0x13b   :  { %v659_v9 = vadd.f32 %v658_v6, %v622_v5  ;;  %v680_v10 = vadd.f32 %v679_v7, %v678_v4 }
 0x13d   :  { %v681_v11 = vadd.f32 %v680_v10, %v644_v8  ;;  %682 = vst [vmem:[%s1189_s3] sm:$0x1] %v659_v9 }
 0x13f   :  { %683 = vst [vmem:[%s1190_s4] sm:$0x1] %v681_v11 }

// kernel: bottleneck_forward.10
= control target key start
LH: loop header
LB: loop body
LE: loop exit
PB: predicated region body
PF: predicated region fallthrough
CT: control target
= control target key end

     0   :  { %vm103_vm0 = vcmask 523264   ;;  %s645_s1 = inlined_call_operand.vmem [shape: bf16[64,128], index: 1, kind: input, shape index: {}]   ;;  %s646_s0 = inlined_call_operand.vmem [shape: bf16[128,64], index: 0, kind: input, shape index: {}]   ;;  %s647_s2 = inlined_call_operand.vmem [shape: bf16[128,128], index: 2, kind: output, shape index: {0}]   ;;  %s648_s3 = inlined_call_operand.vmem [shape: f32[1,1,128], index: 3, kind: output, shape index: {1}]   ;;  %s649_s4 = inlined_call_operand.vmem [shape: f32[1,1,128], index: 4, kind: output, shape index: {2}]  }
   0x1   :  { %v534_v0 = vld [vmem:[%s645_s1] sm:$0xff]   ;;  %v535_v1 = vld [vmem:[%s645_s1 + $0x8] sm:$0xff]   ;;  %v536_v2 = vld [vmem:[%s645_s1 + $0x10] sm:$0xff]  }
   0x2   :  { %502 = vmatprep.subr.bf16.mxu0 %v534_v0  ;;  %526 = vmatprep.subr.bf16.mxu1 %v534_v0  ;;  %v538_v3 = vld [vmem:[%s646_s0] sm:$0xff]   ;;  %v537_v5 = vld [vmem:[%s645_s1 + $0x18] sm:$0xff]   ;;  %v540_v6 = vld [vmem:[%s646_s0 + $0x8] sm:$0xff]  }
   0x3   :  { %503 = vmatpush3.bf16.msra.mxu0 %v534_v0  ;;  %530 = vmatpush3.bf16.msra.mxu1 %v534_v0  ;;  %v539_v4 = vld [vmem:[%s646_s0 + $0x20] sm:$0xff]   ;;  %v541_v7 = vld [vmem:[%s646_s0 + $0x28] sm:$0xff]   ;;  %v542_v8 = vld [vmem:[%s646_s0 + $0x10] sm:$0xff]  }
   0x4   :  { %504 = vmatprep.subr.bf16.mxu0 %v535_v1  ;;  %527 = vmatprep.subr.bf16.mxu1 %v535_v1  ;;  %v543_v9 = vld [vmem:[%s646_s0 + $0x30] sm:$0xff]   ;;  %v544_v10 = vld [vmem:[%s646_s0 + $0x18] sm:$0xff]  }
   0x5   :  { %510 = vmatprep.mubr.msk.bf16.mxu0 %vm103_vm0, %v538_v3  ;;  %518 = vmatprep.mubr.msk.bf16.mxu1 %vm103_vm0, %v539_v4  ;;  %v545_v11 = vld [vmem:[%s646_s0 + $0x38] sm:$0xff]  }
   0x7   :  { %505 = vmatpush3.bf16.msra.mxu0 %v535_v1  ;;  %531 = vmatpush3.bf16.msra.mxu1 %v535_v1 }
   0x8   :  { %506 = vmatprep.subr.bf16.mxu0 %v536_v2  ;;  %528 = vmatprep.subr.bf16.mxu1 %v536_v2 }
   0xb   :  { %507 = vmatpush3.bf16.msra.mxu0 %v536_v2  ;;  %532 = vmatpush3.bf16.msra.mxu1 %v536_v2 }
   0xc   :  { %508 = vmatprep.subr.bf16.mxu0 %v537_v5  ;;  %529 = vmatprep.subr.bf16.mxu1 %v537_v5 }
   0xf   :  { %509 = vmatpush3.bf16.msra.mxu0 %v537_v5  ;;  %533 = vmatpush3.bf16.msra.mxu1 %v537_v5 }
  0x12   :  { %511 = vmatmul.mubr.msk.bf16.vlgmr.msra.gmra.mrb[0].mxu0 %vm103_vm0, %v540_v6  ;;  %519 = vmatmul.mubr.msk.bf16.vlgmr.msra.gmra.mrb[0].mxu1 %vm103_vm0, %v541_v7 }
  0x13   :  { %514 = vmatprep.mubr.msk.bf16.mxu0 %vm103_vm0, %v542_v8  ;;  %522 = vmatprep.mubr.msk.bf16.mxu1 %vm103_vm0, %v543_v9 }
  0x1a   :  { %515 = vmatmul.mubr.msk.bf16.gmra.mrb[4].mxu0 %vm103_vm0, %v544_v10  ;;  %523 = vmatmul.mubr.msk.bf16.gmra.mrb[4].mxu1 %vm103_vm0, %v545_v11 }
  0xe5   :  { %v512_v12 = vpop.f32.mrb[0].mxu0  ;;  %v520_v13 = vpop.f32.mrb[0].mxu1 }
  0xe6   :  { %v162_v14 = vpop.f32.mrb[1].mxu0  ;;  %v194_v15 = vpop.f32.mrb[1].mxu1  ;;  %v321_v30 = vmul.f32 %v512_v12, %v512_v12  ;;  %v357_v33 = vmul.f32 %v520_v13, %v520_v13 }
  0xe7   :  { %v513_v16 = vpop.f32.mrb[2].mxu0  ;;  %v521_v17 = vpop.f32.mrb[2].mxu1  ;;  %v319_v18 = vmul.f32 %v162_v14, %v162_v14  ;;  %v355_v27 = vmul.f32 %v194_v15, %v194_v15 }
  0xe8   :  { %v451_v19 = vpack.c.bf16 %v513_v16, %v512_v12  ;;  %v471_v20 = vpack.c.bf16 %v521_v17, %v520_v13  ;;  %v165_v21 = vpop.f32.mrb[3].mxu0  ;;  %v197_v22 = vpop.f32.mrb[3].mxu1  ;;  %v322_v36 = vmul.f32 %v513_v16, %v513_v16  ;;  %v358_v41 = vmul.f32 %v521_v17, %v521_v17 }
  0xe9   :  { %v446_v23 = vpack.c.bf16 %v165_v21, %v162_v14  ;;  %v305_v24 = vadd.f32 %v165_v21, %v162_v14  ;;  %v320_v25 = vmul.f32 %v165_v21, %v165_v21  ;;  %v466_v26 = vpack.c.bf16 %v197_v22, %v194_v15 }
  0xea   :  { %483 = vst [vmem:[%s647_s2 + $0x8] sm:$0xff] %v451_v19   ;;  %487 = vst [vmem:[%s647_s2 + $0x28] sm:$0xff] %v471_v20   ;;  %v341_v28 = vadd.f32 %v197_v22, %v194_v15  ;;  %v356_v29 = vmul.f32 %v197_v22, %v197_v22 }
  0xeb   :  { %447 = vst [vmem:[%s647_s2] sm:$0xff] %v446_v23   ;;  %v306_v31 = vadd.f32 %v512_v12, %v305_v24  ;;  %v327_v32 = vadd.f32 %v320_v25, %v319_v18  ;;  %486 = vst [vmem:[%s647_s2 + $0x20] sm:$0xff] %v466_v26  }
  0xec   :  { %v342_v34 = vadd.f32 %v520_v13, %v341_v28  ;;  %v363_v35 = vadd.f32 %v356_v29, %v355_v27 }
  0xed   :  { %v328_v37 = vadd.f32 %v327_v32, %v321_v30  ;;  %v516_v38 = vpop.f32.mrb[4].mxu0  ;;  %v524_v39 = vpop.f32.mrb[4].mxu1  ;;  %v307_v40 = vadd.f32 %v513_v16, %v306_v31 }
  0xee   :  { %v364_v42 = vadd.f32 %v363_v35, %v357_v33  ;;  %v178_v43 = vpop.f32.mrb[5].mxu0  ;;  %v210_v44 = vpop.f32.mrb[5].mxu1  ;;  %v343_v45 = vadd.f32 %v521_v17, %v342_v34  ;;  %v325_v2 = vmul.f32 %v516_v38, %v516_v38  ;;  %v361_v5 = vmul.f32 %v524_v39, %v524_v39 }
  0xef   :  { %v308_v46 = vadd.f32 %v307_v40, %v178_v43  ;;  %v323_v47 = vmul.f32 %v178_v43, %v178_v43  ;;  %v329_v48 = vadd.f32 %v328_v37, %v322_v36  ;;  %v359_v49 = vmul.f32 %v210_v44, %v210_v44  ;;  %v517_v50 = vpop.f32.mrb[6].mxu0  ;;  %v525_v51 = vpop.f32.mrb[6].mxu1 }
  0xf0   :  { %v344_v52 = vadd.f32 %v343_v45, %v210_v44  ;;  %v365_v53 = vadd.f32 %v364_v42, %v358_v41  ;;  %v461_v54 = vpack.c.bf16 %v517_v50, %v516_v38  ;;  %v181_v55 = vpop.f32.mrb[7].mxu0  ;;  %v213_v56 = vpop.f32.mrb[7].mxu1  ;;  %v481_v58 = vpack.c.bf16 %v525_v51, %v524_v39 }
  0xf1   :  { %v330_v57 = vadd.f32 %v329_v48, %v323_v47  ;;  %v456_v59 = vpack.c.bf16 %v181_v55, %v178_v43  ;;  %v309_v61 = vadd.f32 %v308_v46, %v181_v55  ;;  %v324_v62 = vmul.f32 %v181_v55, %v181_v55 }
  0xf2   :  { %v366_v60 = vadd.f32 %v365_v53, %v359_v49  ;;  %485 = vst [vmem:[%s647_s2 + $0x18] sm:$0xff] %v461_v54   ;;  %v476_v63 = vpack.c.bf16 %v213_v56, %v210_v44  ;;  %489 = vst [vmem:[%s647_s2 + $0x38] sm:$0xff] %v481_v58   ;;  %v345_v0 = vadd.f32 %v344_v52, %v213_v56 }
  0xf3   :  { %484 = vst [vmem:[%s647_s2 + $0x10] sm:$0xff] %v456_v59   ;;  %v360_v1 = vmul.f32 %v213_v56, %v213_v56  ;;  %v310_v3 = vadd.f32 %v516_v38, %v309_v61  ;;  %v331_v4 = vadd.f32 %v330_v57, %v324_v62  ;;  %v326_v8 = vmul.f32 %v517_v50, %v517_v50 }
  0xf4   :  { %488 = vst [vmem:[%s647_s2 + $0x30] sm:$0xff] %v476_v63   ;;  %v346_v6 = vadd.f32 %v524_v39, %v345_v0  ;;  %v362_v11 = vmul.f32 %v525_v51, %v525_v51 }
  0xf5   :  { %v367_v7 = vadd.f32 %v366_v60, %v360_v1  ;;  %v311_v9 = vadd.f32 %v517_v50, %v310_v3  ;;  %v332_v10 = vadd.f32 %v331_v4, %v325_v2 }
  0xf6   :  { %v347_v12 = vadd.f32 %v525_v51, %v346_v6 }
  0xf7   :  { %v368_v13 = vadd.f32 %v367_v7, %v361_v5  ;;  %v312_v14 = vrot.slane %v311_v9, 4  ;;  %v333_v15 = vadd.f32 %v332_v10, %v326_v8 }
  0xf8   :  { %v348_v16 = vrot.slane %v347_v12, 4 }
  0xf9   :  { %v369_v17 = vadd.f32 %v368_v13, %v362_v11  ;;  %v313_v18 = vadd.f32 %v312_v14, %v311_v9  ;;  %v334_v19 = vrot.slane %v333_v15, 4 }
  0xfa   :  { %v349_v20 = vadd.f32 %v348_v16, %v347_v12 }
  0xfb   :  { %v370_v21 = vrot.slane %v369_v17, 4  ;;  %v314_v22 = vrot.slane %v313_v18, 2  ;;  %v335_v23 = vadd.f32 %v334_v19, %v333_v15 }
  0xfc   :  { %v350_v24 = vrot.slane %v349_v20, 2 }
  0xfd   :  { %v371_v25 = vadd.f32 %v370_v21, %v369_v17  ;;  %v315_v26 = vadd.f32 %v314_v22, %v313_v18  ;;  %v336_v27 = vrot.slane %v335_v23, 2 }
  0xfe   :  { %v351_v28 = vadd.f32 %v350_v24, %v349_v20 }
  0xff   :  { %v372_v29 = vrot.slane %v371_v25, 2  ;;  %v316_v30 = vrot.slane %v315_v26, 1  ;;  %v337_v31 = vadd.f32 %v336_v27, %v335_v23 }
 0x100   :  { %v352_v32 = vrot.slane %v351_v28, 1 }
 0x101   :  { %v373_v33 = vadd.f32 %v372_v29, %v371_v25  ;;  %v317_v34 = vadd.f32 %v316_v30, %v315_v26  ;;  %v338_v35 = vrot.slane %v337_v31, 1 }
 0x102   :  { %v353_v36 = vadd.f32 %v352_v32, %v351_v28 }
 0x103   :  { %v374_v37 = vrot.slane %v373_v33, 1  ;;  %v339_v38 = vadd.f32 %v338_v35, %v337_v31 }
 0x104   :  { %v354_v39 = vadd.f32 %v353_v36, %v317_v34 }
 0x105   :  { %v375_v40 = vadd.f32 %v374_v37, %v373_v33 }
 0x106   :  { %377 = vst [vmem:[%s648_s3] sm:$0x1] %v354_v39 }
 0x107   :  { %v376_v41 = vadd.f32 %v375_v40, %v339_v38 }
 0x109   :  { %378 = vst [vmem:[%s649_s4] sm:$0x1] %v376_v41 }

// kernel: bottleneck_forward.11
= control target key start
LH: loop header
LB: loop body
LE: loop exit
PB: predicated region body
PF: predicated region fallthrough
CT: control target
= control target key end

     0   :  { %s647_s0 = inlined_call_operand.vmem [shape: bf16[128,128], index: 0, kind: input, shape index: {}]   ;;  %s648_s1 = inlined_call_operand.vmem [shape: bf16[128,128], index: 1, kind: input, shape index: {}]   ;;  %s649_s2 = inlined_call_operand.vmem [shape: f32[1,128], index: 2, kind: input, shape index: {}]   ;;  %s650_s3 = inlined_call_operand.vmem [shape: f32[1,128], index: 3, kind: input, shape index: {}]   ;;  %s651_s4 = inlined_call_operand.vmem [shape: f32[1,128], index: 4, kind: input, shape index: {}]   ;;  %s652_s5 = inlined_call_operand.vmem [shape: f32[1,128], index: 5, kind: input, shape index: {}]   ;;  %s653_s6 = inlined_call_operand.vmem [shape: bf16[128,128], index: 6, kind: output, shape index: {}]  }
   0x1   :  { %v332_v0 = vld [vmem:[%s647_s0] sm:$0xff]   ;;  %v435_v9 = vld [vmem:[%s647_s0 + $0x8] sm:$0xff]   ;;  %v436_v20 = vld [vmem:[%s647_s0 + $0x10] sm:$0xff]  }
   0x2   :  { %v497_v1 = vld [vmem:[%s649_s2] ss:$0 sm:$0xff]  ;;  %v333_v2 = vunpack.c.l.bf16 %v332_v0  ;;  %v334_v3 = vunpack.c.h.bf16 %v332_v0  ;;  %v442_v10 = vld [vmem:[%s648_s1 + $0x8] sm:$0xff]   ;;  %v337_v14 = vunpack.c.l.bf16 %v435_v9  ;;  %v338_v15 = vunpack.c.h.bf16 %v435_v9  ;;  %v443_v29 = vld [vmem:[%s648_s1 + $0x10] sm:$0xff]  }
   0x3   :  { %v364_v4 = vld [vmem:[%s648_s1] sm:$0xff]   ;;  %v369_v18 = vunpack.c.l.bf16 %v442_v10  ;;  %v370_v19 = vunpack.c.h.bf16 %v442_v10  ;;  %v341_v32 = vunpack.c.l.bf16 %v436_v20  ;;  %v342_v33 = vunpack.c.h.bf16 %v436_v20  ;;  %v437_v42 = vld [vmem:[%s647_s0 + $0x18] sm:$0xff]  }
   0x4   :  { %v505_v5 = vld [vmem:[%s651_s4] ss:$0 sm:$0xff]  ;;  %v365_v7 = vunpack.c.l.bf16 %v364_v4  ;;  %v366_v8 = vunpack.c.h.bf16 %v364_v4  ;;  %v62_v11 = vmul.f32 %v333_v2, %v497_v1  ;;  %v63_v12 = vmul.f32 %v334_v3, %v497_v1  ;;  %v444_v47 = vld [vmem:[%s648_s1 + $0x18] sm:$0xff]  }
   0x5   :  { %v510_v6 = vld [vmem:[%s650_s3] ss:$0 sm:$0xff]  ;;  %v64_v23 = vmul.f32 %v337_v14, %v497_v1  ;;  %v65_v24 = vmul.f32 %v338_v15, %v497_v1  ;;  %v142_v27 = vmul.f32 %v369_v18, %v505_v5  ;;  %v143_v28 = vmul.f32 %v370_v19, %v505_v5  ;;  %v439_v14 = vld [vmem:[%s647_s0 + $0x28] sm:$0xff]  }
   0x6   :  { %v523_v13 = vld [vmem:[%s652_s5] ss:$0 sm:$0xff]  ;;  %v140_v16 = vmul.f32 %v365_v7, %v505_v5  ;;  %v141_v17 = vmul.f32 %v366_v8, %v505_v5  ;;  %v85_v21 = vadd.f32 %v510_v6, %v62_v11  ;;  %v86_v22 = vadd.f32 %v510_v6, %v63_v12 }
   0x7   :  { %v87_v30 = vadd.f32 %v510_v6, %v64_v23  ;;  %v88_v31 = vadd.f32 %v510_v6, %v65_v24  ;;  %v165_v36 = vadd.f32 %v523_v13, %v142_v27  ;;  %v166_v37 = vadd.f32 %v523_v13, %v143_v28  ;;  %v438_v52 = vld [vmem:[%s647_s0 + $0x20] sm:$0xff]   ;;  %v446_v23 = vld [vmem:[%s648_s1 + $0x28] sm:$0xff]  }
   0x8   :  { %v163_v25 = vadd.f32 %v523_v13, %v140_v16  ;;  %v164_v26 = vadd.f32 %v523_v13, %v141_v17  ;;  %v66_v38 = vmul.f32 %v341_v32, %v497_v1  ;;  %v67_v39 = vmul.f32 %v342_v33, %v497_v1  ;;  %v445_v8 = vld [vmem:[%s648_s1 + $0x20] sm:$0xff]   ;;  %v440_v32 = vld [vmem:[%s647_s0 + $0x30] sm:$0xff]  }
   0x9   :  { %v373_v40 = vunpack.c.l.bf16 %v443_v29  ;;  %v374_v41 = vunpack.c.h.bf16 %v443_v29  ;;  %v181_v45 = vadd.f32 %v165_v36, %v87_v30  ;;  %v182_v46 = vadd.f32 %v166_v37, %v88_v31 }
   0xa   :  { %v179_v34 = vadd.f32 %v163_v25, %v85_v21  ;;  %v180_v35 = vadd.f32 %v164_v26, %v86_v22  ;;  %v89_v48 = vadd.f32 %v510_v6, %v66_v38  ;;  %v90_v49 = vadd.f32 %v510_v6, %v67_v39 }
   0xb   :  { %v144_v50 = vmul.f32 %v373_v40, %v505_v5  ;;  %v145_v51 = vmul.f32 %v374_v41, %v505_v5  ;;  %v197_v54 = vmax.f32 %v181_v45, 0.0  ;;  %v198_v55 = vmax.f32 %v182_v46, 0.0  ;;  %v447_v45 = vld [vmem:[%s648_s1 + $0x30] sm:$0xff]  }
   0xc   :  { %v195_v43 = vmax.f32 %v179_v34, 0.0  ;;  %v196_v44 = vmax.f32 %v180_v35, 0.0  ;;  %v345_v56 = vunpack.c.l.bf16 %v437_v42  ;;  %v346_v59 = vunpack.c.h.bf16 %v437_v42 }
   0xd   :  { %v167_v57 = vadd.f32 %v523_v13, %v144_v50  ;;  %v168_v58 = vadd.f32 %v523_v13, %v145_v51  ;;  %v377_v60 = vunpack.c.l.bf16 %v444_v47  ;;  %v403_v61 = vpack.c.bf16 %v198_v55, %v197_v54  ;;  %v441_v54 = vld [vmem:[%s647_s0 + $0x38] sm:$0xff]  }
   0xe   :  { %v398_v53 = vpack.c.bf16 %v196_v44, %v195_v43  ;;  %v68_v62 = vmul.f32 %v345_v56, %v497_v1  ;;  %v378_v63 = vunpack.c.h.bf16 %v444_v47  ;;  %v349_v0 = vunpack.c.l.bf16 %v438_v52 }
   0xf   :  { %v183_v2 = vadd.f32 %v167_v57, %v89_v48  ;;  %v184_v3 = vadd.f32 %v168_v58, %v90_v49  ;;  %v69_v4 = vmul.f32 %v346_v59, %v497_v1  ;;  %v146_v7 = vmul.f32 %v377_v60, %v505_v5  ;;  %449 = vst [vmem:[%s653_s6 + $0x8] sm:$0xff] %v403_v61  }
  0x10   :  { %399 = vst [vmem:[%s653_s6] sm:$0xff] %v398_v53   ;;  %v91_v9 = vadd.f32 %v510_v6, %v68_v62  ;;  %v147_v10 = vmul.f32 %v378_v63, %v505_v5  ;;  %v350_v11 = vunpack.c.h.bf16 %v438_v52  ;;  %v70_v12 = vmul.f32 %v349_v0, %v497_v1 }
  0x11   :  { %v199_v15 = vmax.f32 %v183_v2, 0.0  ;;  %v200_v16 = vmax.f32 %v184_v3, 0.0  ;;  %v92_v17 = vadd.f32 %v510_v6, %v69_v4  ;;  %v169_v18 = vadd.f32 %v523_v13, %v146_v7  ;;  %v448_v4 = vld [vmem:[%s648_s1 + $0x38] sm:$0xff]  }
  0x12   :  { %v170_v19 = vadd.f32 %v523_v13, %v147_v10  ;;  %v71_v20 = vmul.f32 %v350_v11, %v497_v1  ;;  %v93_v21 = vadd.f32 %v510_v6, %v70_v12  ;;  %v381_v22 = vunpack.c.l.bf16 %v445_v8 }
  0x13   :  { %v408_v24 = vpack.c.bf16 %v200_v16, %v199_v15  ;;  %v185_v25 = vadd.f32 %v169_v18, %v91_v9  ;;  %v382_v26 = vunpack.c.h.bf16 %v445_v8  ;;  %v353_v27 = vunpack.c.l.bf16 %v439_v14 }
  0x14   :  { %v186_v28 = vadd.f32 %v170_v19, %v92_v17  ;;  %v94_v29 = vadd.f32 %v510_v6, %v71_v20  ;;  %v148_v30 = vmul.f32 %v381_v22, %v505_v5  ;;  %v354_v31 = vunpack.c.h.bf16 %v439_v14 }
  0x15   :  { %450 = vst [vmem:[%s653_s6 + $0x10] sm:$0xff] %v408_v24   ;;  %v201_v33 = vmax.f32 %v185_v25, 0.0  ;;  %v149_v34 = vmul.f32 %v382_v26, %v505_v5  ;;  %v72_v35 = vmul.f32 %v353_v27, %v497_v1  ;;  %v385_v36 = vunpack.c.l.bf16 %v446_v23 }
  0x16   :  { %v202_v37 = vmax.f32 %v186_v28, 0.0  ;;  %v171_v38 = vadd.f32 %v523_v13, %v148_v30  ;;  %v73_v39 = vmul.f32 %v354_v31, %v497_v1  ;;  %v386_v40 = vunpack.c.h.bf16 %v446_v23 }
  0x17   :  { %v172_v41 = vadd.f32 %v523_v13, %v149_v34  ;;  %v95_v42 = vadd.f32 %v510_v6, %v72_v35  ;;  %v150_v43 = vmul.f32 %v385_v36, %v505_v5  ;;  %v357_v44 = vunpack.c.l.bf16 %v440_v32 }
  0x18   :  { %v413_v46 = vpack.c.bf16 %v202_v37, %v201_v33  ;;  %v187_v47 = vadd.f32 %v171_v38, %v93_v21  ;;  %v96_v48 = vadd.f32 %v510_v6, %v73_v39  ;;  %v151_v49 = vmul.f32 %v386_v40, %v505_v5 }
  0x19   :  { %v188_v50 = vadd.f32 %v172_v41, %v94_v29  ;;  %v173_v51 = vadd.f32 %v523_v13, %v150_v43  ;;  %v358_v52 = vunpack.c.h.bf16 %v440_v32  ;;  %v74_v53 = vmul.f32 %v357_v44, %v497_v1 }
  0x1a   :  { %451 = vst [vmem:[%s653_s6 + $0x18] sm:$0xff] %v413_v46   ;;  %v203_v55 = vmax.f32 %v187_v47, 0.0  ;;  %v174_v56 = vadd.f32 %v523_v13, %v151_v49  ;;  %v389_v57 = vunpack.c.l.bf16 %v447_v45  ;;  %v390_v58 = vunpack.c.h.bf16 %v447_v45 }
  0x1b   :  { %v204_v59 = vmax.f32 %v188_v50, 0.0  ;;  %v189_v60 = vadd.f32 %v173_v51, %v95_v42  ;;  %v75_v61 = vmul.f32 %v358_v52, %v497_v1  ;;  %v97_v62 = vadd.f32 %v510_v6, %v74_v53 }
  0x1c   :  { %v190_v63 = vadd.f32 %v174_v56, %v96_v48  ;;  %v152_v0 = vmul.f32 %v389_v57, %v505_v5  ;;  %v153_v2 = vmul.f32 %v390_v58, %v505_v5  ;;  %v361_v3 = vunpack.c.l.bf16 %v441_v54 }
  0x1d   :  { %v418_v7 = vpack.c.bf16 %v204_v59, %v203_v55  ;;  %v205_v8 = vmax.f32 %v189_v60, 0.0  ;;  %v98_v9 = vadd.f32 %v510_v6, %v75_v61  ;;  %v362_v10 = vunpack.c.h.bf16 %v441_v54 }
  0x1e   :  { %v206_v11 = vmax.f32 %v190_v63, 0.0  ;;  %v175_v12 = vadd.f32 %v523_v13, %v152_v0  ;;  %v176_v14 = vadd.f32 %v523_v13, %v153_v2  ;;  %v76_v15 = vmul.f32 %v361_v3, %v497_v1 }
  0x1f   :  { %452 = vst [vmem:[%s653_s6 + $0x20] sm:$0xff] %v418_v7   ;;  %v77_v16 = vmul.f32 %v362_v10, %v497_v1  ;;  %v393_v17 = vunpack.c.l.bf16 %v448_v4  ;;  %v394_v18 = vunpack.c.h.bf16 %v448_v4 }
  0x20   :  { %v423_v19 = vpack.c.bf16 %v206_v11, %v205_v8  ;;  %v191_v20 = vadd.f32 %v175_v12, %v97_v62  ;;  %v192_v21 = vadd.f32 %v176_v14, %v98_v9  ;;  %v99_v22 = vadd.f32 %v510_v6, %v76_v15 }
  0x21   :  { %v100_v23 = vadd.f32 %v510_v6, %v77_v16  ;;  %v154_v24 = vmul.f32 %v393_v17, %v505_v5  ;;  %v155_v25 = vmul.f32 %v394_v18, %v505_v5 }
  0x22   :  { %453 = vst [vmem:[%s653_s6 + $0x28] sm:$0xff] %v423_v19   ;;  %v207_v26 = vmax.f32 %v191_v20, 0.0  ;;  %v208_v27 = vmax.f32 %v192_v21, 0.0 }
  0x23   :  { %v177_v1 = vadd.f32 %v523_v13, %v154_v24  ;;  %v178_v28 = vadd.f32 %v523_v13, %v155_v25 }
  0x24   :  { %v428_v29 = vpack.c.bf16 %v208_v27, %v207_v26 }
  0x25   :  { %v193_v30 = vadd.f32 %v177_v1, %v99_v22  ;;  %v194_v31 = vadd.f32 %v178_v28, %v100_v23 }
  0x26   :  { %454 = vst [vmem:[%s653_s6 + $0x30] sm:$0xff] %v428_v29  }
  0x27   :  { %v209_v6 = vmax.f32 %v193_v30, 0.0  ;;  %v210_v32 = vmax.f32 %v194_v31, 0.0 }
  0x29   :  { %v433_v5 = vpack.c.bf16 %v210_v32, %v209_v6 }
  0x2b   :  { %455 = vst [vmem:[%s653_s6 + $0x38] sm:$0xff] %v433_v5  }

</bundles_post_ra>
